<compile_context>
chip_gen: v5e
topology: v5e:2x2
jax: 0.10.0
libtpu: 0.0.40
codegen_flags: <defaults>
</compile_context>

<pallas_src>
import jax
import jax.numpy as jnp
from jax.experimental import pallas as pl
from jax.experimental.pallas import tpu as pltpu


def _resblock_kernel(x_ref, w1_ref, b1_ref, w2_ref, b2_ref, o_ref, pad_ref):
    # x_ref block: (1, H, W, C) in the input dtype.
    # w*_ref: (9*C, C) im2col-flattened weights, b*_ref: (1, C) f32 biases.
    # pad_ref scratch: (H+2, Wp, C) in the input dtype, Wp = roundup(W+2, 8).
    _, H, W, C = x_ref.shape
    _, Wp, _ = pad_ref.shape

    x = x_ref[0]                                   # (H, W, C), input dtype

    # Zero only the 1-pixel border the taps actually read.  The interior is
    # fully overwritten before each conv; columns >= W+2 are never read.
    zrow = jnp.zeros((1, Wp, C), pad_ref.dtype)
    pad_ref[0:1, :, :] = zrow
    pad_ref[H + 1:H + 2, :, :] = zrow
    zcol = jnp.zeros((H, 1, C), pad_ref.dtype)
    pad_ref[1:H + 1, 0:1, :] = zcol
    pad_ref[1:H + 1, W + 1:W + 2, :] = zcol

    def conv3x3(w_flat, b):
        # im2col: one (H*W, 9*C) x (9*C, C) matmul on the MXU instead of
        # nine K=C dots + eight VPU accumulation passes.
        cols = [pad_ref[dy:dy + H, dx:dx + W, :].reshape(H * W, C)
                for dy in range(3) for dx in range(3)]
        patches = jnp.concatenate(cols, axis=-1)            # (H*W, 9*C)
        acc = jnp.dot(patches, w_flat,
                      preferred_element_type=jnp.float32)   # (H*W, C) f32
        return acc + b                                       # bias in f32

    # conv1 -> ReLU
    pad_ref[1:H + 1, 1:W + 1, :] = x
    y = conv3x3(w1_ref[...], b1_ref[...])
    y = jnp.maximum(y, 0.0)

    # conv2 (intermediate activation written back in the compute dtype)
    pad_ref[1:H + 1, 1:W + 1, :] = y.astype(pad_ref.dtype).reshape(H, W, C)
    y = conv3x3(w2_ref[...], b2_ref[...])

    # residual add
    o_ref[0] = (x.astype(jnp.float32) + y.reshape(H, W, C)).astype(o_ref.dtype)


def resblock_forward(x_nchw, w1, b1, w2, b2):
    """x_nchw: (N, C, H, W); w*: (Cout, Cin, 3, 3); b*: (Cout,). Returns NCHW."""
    N, C, H, W = x_nchw.shape
    x = jnp.transpose(x_nchw, (0, 2, 3, 1))                  # -> NHWC

    # Hoist all constant prep out of the kernel:
    #   (Cout, Cin, kh, kw) -> (kh, kw, Cin, Cout) -> (9*Cin, Cout)
    w1k = jnp.transpose(w1, (2, 3, 1, 0)).reshape(9 * C, C)
    w2k = jnp.transpose(w2, (2, 3, 1, 0)).reshape(9 * C, C)
    b1k = b1.reshape(1, C).astype(jnp.float32)
    b2k = b2.reshape(1, C).astype(jnp.float32)

    Wp = ((W + 2 + 7) // 8) * 8                              # sublane-aligned pad width

    out = pl.pallas_call(
        _resblock_kernel,
        out_shape=jax.ShapeDtypeStruct((N, H, W, C), x.dtype),
        grid_spec=pltpu.PrefetchScalarGridSpec(
            num_scalar_prefetch=0,
            grid=(N,),
            in_specs=[
                pl.BlockSpec((1, H, W, C), lambda n: (n, 0, 0, 0)),
                pl.BlockSpec((9 * C, C), lambda n: (0, 0)),
                pl.BlockSpec((1, C), lambda n: (0, 0)),
                pl.BlockSpec((9 * C, C), lambda n: (0, 0)),
                pl.BlockSpec((1, C), lambda n: (0, 0)),
            ],
            out_specs=pl.BlockSpec((1, H, W, C), lambda n: (n, 0, 0, 0)),
            scratch_shapes=[pltpu.VMEM((H + 2, Wp, C), x.dtype)],
        ),
        compiler_params=pltpu.CompilerParams(
            dimension_semantics=("parallel",)),
    )(x, w1k, b1k, w2k, b2k)
    return jnp.transpose(out, (0, 3, 1, 2))                  # -> NCHW


def _resblock_ref(x, w1, b1, w2, b2):
    """Plain-JAX reference (matches PyTorch ResBlock forward with mode='CRC')."""
    def conv(z, w, b):
        y = jax.lax.conv_general_dilated(
            z, w, window_strides=(1, 1), padding=((1, 1), (1, 1)),
            dimension_numbers=('NCHW', 'OIHW', 'NCHW'))
        return y + b.reshape(1, -1, 1, 1)
    y = conv(x, w1, b1)
    y = jnp.maximum(y, 0.0)
    y = conv(y, w2, b2)
    return x + y


if __name__ == "__main__":
    N, C, H, W = 2, 32, 16, 16
    key = jax.random.PRNGKey(0)
    kx, kw1, kb1, kw2, kb2 = jax.random.split(key, 5)

    x = jax.random.normal(kx, (N, C, H, W), dtype=jnp.float32)
    # deterministic synthetic parameters (Conv2d(C, C, 3, 3, bias=True) x 2)
    w1 = jax.random.normal(kw1, (C, C, 3, 3), dtype=jnp.float32) * 0.05
    b1 = jax.random.normal(kb1, (C,), dtype=jnp.float32) * 0.05
    w2 = jax.random.normal(kw2, (C, C, 3, 3), dtype=jnp.float32) * 0.05
    b2 = jax.random.normal(kb2, (C,), dtype=jnp.float32) * 0.05

    out = resblock_forward(x, w1, b1, w2, b2)
    out = jax.block_until_ready(out)

    ref = _resblock_ref(x, w1, b1, w2, b2)
    assert out.shape == ref.shape and out.dtype == ref.dtype
    assert jnp.allclose(out, ref, rtol=1e-3, atol=1e-3), "mismatch vs reference"

    print("KERNEL_OK")
</pallas_src>

<mosaic_0001>
module attributes {stable_mosaic.version = 11 : i64} {
  func.func @_resblock_kernel(%arg0: i32, %arg1: memref<1x16x16x32xf32, #tpu.memory_space<vmem>>, %arg2: memref<288x32xf32, #tpu.memory_space<vmem>>, %arg3: memref<1x32xf32, #tpu.memory_space<vmem>>, %arg4: memref<288x32xf32, #tpu.memory_space<vmem>>, %arg5: memref<1x32xf32, #tpu.memory_space<vmem>>, %arg6: memref<1x16x16x32xf32, #tpu.memory_space<vmem>>, %arg7: memref<18x24x32xf32, #tpu.memory_space<vmem>>) attributes {dimension_semantics = [#tpu.dimension_semantics<parallel>], iteration_bounds = array<i64: 2>, scalar_prefetch = 0 : i64, scratch_operands = 1 : i64, tpu.core_type = #tpu.core_type<tc>, window_params = [{transform_indices = @transform_0, window_bounds = array<i64: 1, 16, 16, 32>}, {pipeline_mode = #tpu.pipeline_mode<synchronous>, transform_indices = @transform_1, window_bounds = array<i64: 288, 32>}, {pipeline_mode = #tpu.pipeline_mode<synchronous>, transform_indices = @transform_2, window_bounds = array<i64: 1, 32>}, {pipeline_mode = #tpu.pipeline_mode<synchronous>, transform_indices = @transform_3, window_bounds = array<i64: 288, 32>}, {pipeline_mode = #tpu.pipeline_mode<synchronous>, transform_indices = @transform_4, window_bounds = array<i64: 1, 32>}, {transform_indices = @transform_5, window_bounds = array<i64: 1, 16, 16, 32>}]} {
    %c0 = arith.constant 0 : index
    %c0_0 = arith.constant 0 : index
    %c0_1 = arith.constant 0 : index
    %c0_2 = arith.constant 0 : index
    %0 = vector.load %arg1[%c0, %c0_0, %c0_1, %c0_2] : memref<1x16x16x32xf32, #tpu.memory_space<vmem>>, vector<1x16x16x32xf32>
    %1 = vector.shape_cast %0 : vector<1x16x16x32xf32> to vector<16x16x32xf32>
    %cst = arith.constant 0.000000e+00 : f32
    %2 = vector.broadcast %cst : f32 to vector<1x24x32xf32>
    %c0_3 = arith.constant 0 : index
    %c0_4 = arith.constant 0 : index
    %c0_5 = arith.constant 0 : index
    %3 = vector.load %arg7[%c0_3, %c0_4, %c0_5] : memref<18x24x32xf32, #tpu.memory_space<vmem>>, vector<1x24x32xf32>
    tpu.vector_store %arg7[%c0_3, %c0_4, %c0_5], %2 {strides = array<i32>} : memref<18x24x32xf32, #tpu.memory_space<vmem>>, vector<1x24x32xf32>,
    %c17 = arith.constant 17 : index
    %c0_6 = arith.constant 0 : index
    %c0_7 = arith.constant 0 : index
    %4 = vector.load %arg7[%c17, %c0_6, %c0_7] : memref<18x24x32xf32, #tpu.memory_space<vmem>>, vector<1x24x32xf32>
    tpu.vector_store %arg7[%c17, %c0_6, %c0_7], %2 {strides = array<i32>} : memref<18x24x32xf32, #tpu.memory_space<vmem>>, vector<1x24x32xf32>,
    %cst_8 = arith.constant 0.000000e+00 : f32
    %5 = vector.broadcast %cst_8 : f32 to vector<16x1x32xf32>
    %c1 = arith.constant 1 : index
    %c0_9 = arith.constant 0 : index
    %c0_10 = arith.constant 0 : index
    %6 = vector.load %arg7[%c1, %c0_9, %c0_10] : memref<18x24x32xf32, #tpu.memory_space<vmem>>, vector<16x1x32xf32>
    tpu.vector_store %arg7[%c1, %c0_9, %c0_10], %5 {strides = array<i32>} : memref<18x24x32xf32, #tpu.memory_space<vmem>>, vector<16x1x32xf32>,
    %c1_11 = arith.constant 1 : index
    %c17_12 = arith.constant 17 : index
    %c0_13 = arith.constant 0 : index
    %7 = vector.load %arg7[%c1_11, %c17_12, %c0_13] : memref<18x24x32xf32, #tpu.memory_space<vmem>>, vector<16x1x32xf32>
    tpu.vector_store %arg7[%c1_11, %c17_12, %c0_13], %5 {strides = array<i32>} : memref<18x24x32xf32, #tpu.memory_space<vmem>>, vector<16x1x32xf32>,
    %c1_14 = arith.constant 1 : index
    %c1_15 = arith.constant 1 : index
    %c0_16 = arith.constant 0 : index
    %8 = vector.load %arg7[%c1_14, %c1_15, %c0_16] : memref<18x24x32xf32, #tpu.memory_space<vmem>>, vector<16x16x32xf32>
    tpu.vector_store %arg7[%c1_14, %c1_15, %c0_16], %1 {strides = array<i32>} : memref<18x24x32xf32, #tpu.memory_space<vmem>>, vector<16x16x32xf32>,
    %c0_17 = arith.constant 0 : index
    %c0_18 = arith.constant 0 : index
    %9 = vector.load %arg2[%c0_17, %c0_18] : memref<288x32xf32, #tpu.memory_space<vmem>>, vector<288x32xf32>
    %c0_19 = arith.constant 0 : index
    %c0_20 = arith.constant 0 : index
    %10 = vector.load %arg3[%c0_19, %c0_20] : memref<1x32xf32, #tpu.memory_space<vmem>>, vector<1x32xf32>
    %c0_21 = arith.constant 0 : index
    %c0_22 = arith.constant 0 : index
    %c0_23 = arith.constant 0 : index
    %11 = vector.load %arg7[%c0_21, %c0_22, %c0_23] : memref<18x24x32xf32, #tpu.memory_space<vmem>>, vector<16x16x32xf32>
    %12 = vector.shape_cast %11 : vector<16x16x32xf32> to vector<256x32xf32>
    %c0_24 = arith.constant 0 : index
    %c1_25 = arith.constant 1 : index
    %c0_26 = arith.constant 0 : index
    %13 = vector.load %arg7[%c0_24, %c1_25, %c0_26] : memref<18x24x32xf32, #tpu.memory_space<vmem>>, vector<16x16x32xf32>
    %14 = vector.shape_cast %13 : vector<16x16x32xf32> to vector<256x32xf32>
    %c0_27 = arith.constant 0 : index
    %c2 = arith.constant 2 : index
    %c0_28 = arith.constant 0 : index
    %15 = vector.load %arg7[%c0_27, %c2, %c0_28] : memref<18x24x32xf32, #tpu.memory_space<vmem>>, vector<16x16x32xf32>
    %16 = vector.shape_cast %15 : vector<16x16x32xf32> to vector<256x32xf32>
    %c1_29 = arith.constant 1 : index
    %c0_30 = arith.constant 0 : index
    %c0_31 = arith.constant 0 : index
    %17 = vector.load %arg7[%c1_29, %c0_30, %c0_31] : memref<18x24x32xf32, #tpu.memory_space<vmem>>, vector<16x16x32xf32>
    %18 = vector.shape_cast %17 : vector<16x16x32xf32> to vector<256x32xf32>
    %c1_32 = arith.constant 1 : index
    %c1_33 = arith.constant 1 : index
    %c0_34 = arith.constant 0 : index
    %19 = vector.load %arg7[%c1_32, %c1_33, %c0_34] : memref<18x24x32xf32, #tpu.memory_space<vmem>>, vector<16x16x32xf32>
    %20 = vector.shape_cast %19 : vector<16x16x32xf32> to vector<256x32xf32>
    %c1_35 = arith.constant 1 : index
    %c2_36 = arith.constant 2 : index
    %c0_37 = arith.constant 0 : index
    %21 = vector.load %arg7[%c1_35, %c2_36, %c0_37] : memref<18x24x32xf32, #tpu.memory_space<vmem>>, vector<16x16x32xf32>
    %22 = vector.shape_cast %21 : vector<16x16x32xf32> to vector<256x32xf32>
    %c2_38 = arith.constant 2 : index
    %c0_39 = arith.constant 0 : index
    %c0_40 = arith.constant 0 : index
    %23 = vector.load %arg7[%c2_38, %c0_39, %c0_40] : memref<18x24x32xf32, #tpu.memory_space<vmem>>, vector<16x16x32xf32>
    %24 = vector.shape_cast %23 : vector<16x16x32xf32> to vector<256x32xf32>
    %c2_41 = arith.constant 2 : index
    %c1_42 = arith.constant 1 : index
    %c0_43 = arith.constant 0 : index
    %25 = vector.load %arg7[%c2_41, %c1_42, %c0_43] : memref<18x24x32xf32, #tpu.memory_space<vmem>>, vector<16x16x32xf32>
    %26 = vector.shape_cast %25 : vector<16x16x32xf32> to vector<256x32xf32>
    %c2_44 = arith.constant 2 : index
    %c2_45 = arith.constant 2 : index
    %c0_46 = arith.constant 0 : index
    %27 = vector.load %arg7[%c2_44, %c2_45, %c0_46] : memref<18x24x32xf32, #tpu.memory_space<vmem>>, vector<16x16x32xf32>
    %28 = vector.shape_cast %27 : vector<16x16x32xf32> to vector<256x32xf32>
    %29 = tpu.concatenate %12, %14, %16, %18, %20, %22, %24, %26, %28 in 1 : vector<256x32xf32>, vector<256x32xf32>, vector<256x32xf32>, vector<256x32xf32>, vector<256x32xf32>, vector<256x32xf32>, vector<256x32xf32>, vector<256x32xf32>, vector<256x32xf32> -> vector<256x288xf32>
    %cst_47 = arith.constant dense<0.000000e+00> : vector<256x32xf32>
    %30 = tpu.matmul %29, %9, %cst_47 {dimension_numbers = #tpu.dot_dimension_numbers<[1], [0], [0], [1], [0, 0, 1, 1], [], []>} : vector<256x288xf32>, vector<288x32xf32>, vector<256x32xf32> -> vector<256x32xf32>
    %31 = vector.broadcast %10 : vector<1x32xf32> to vector<256x32xf32>
    %32 = arith.addf %30, %31 : vector<256x32xf32>
    %cst_48 = arith.constant 0.000000e+00 : f32
    %33 = vector.broadcast %cst_48 : f32 to vector<256x32xf32>
    %34 = arith.maximumf %32, %33 : vector<256x32xf32>
    %35 = vector.shape_cast %34 : vector<256x32xf32> to vector<16x16x32xf32>
    %c1_49 = arith.constant 1 : index
    %c1_50 = arith.constant 1 : index
    %c0_51 = arith.constant 0 : index
    %36 = vector.load %arg7[%c1_49, %c1_50, %c0_51] : memref<18x24x32xf32, #tpu.memory_space<vmem>>, vector<16x16x32xf32>
    tpu.vector_store %arg7[%c1_49, %c1_50, %c0_51], %35 {strides = array<i32>} : memref<18x24x32xf32, #tpu.memory_space<vmem>>, vector<16x16x32xf32>,
    %c0_52 = arith.constant 0 : index
    %c0_53 = arith.constant 0 : index
    %37 = vector.load %arg4[%c0_52, %c0_53] : memref<288x32xf32, #tpu.memory_space<vmem>>, vector<288x32xf32>
    %c0_54 = arith.constant 0 : index
    %c0_55 = arith.constant 0 : index
    %38 = vector.load %arg5[%c0_54, %c0_55] : memref<1x32xf32, #tpu.memory_space<vmem>>, vector<1x32xf32>
    %c0_56 = arith.constant 0 : index
    %c0_57 = arith.constant 0 : index
    %c0_58 = arith.constant 0 : index
    %39 = vector.load %arg7[%c0_56, %c0_57, %c0_58] : memref<18x24x32xf32, #tpu.memory_space<vmem>>, vector<16x16x32xf32>
    %40 = vector.shape_cast %39 : vector<16x16x32xf32> to vector<256x32xf32>
    %c0_59 = arith.constant 0 : index
    %c1_60 = arith.constant 1 : index
    %c0_61 = arith.constant 0 : index
    %41 = vector.load %arg7[%c0_59, %c1_60, %c0_61] : memref<18x24x32xf32, #tpu.memory_space<vmem>>, vector<16x16x32xf32>
    %42 = vector.shape_cast %41 : vector<16x16x32xf32> to vector<256x32xf32>
    %c0_62 = arith.constant 0 : index
    %c2_63 = arith.constant 2 : index
    %c0_64 = arith.constant 0 : index
    %43 = vector.load %arg7[%c0_62, %c2_63, %c0_64] : memref<18x24x32xf32, #tpu.memory_space<vmem>>, vector<16x16x32xf32>
    %44 = vector.shape_cast %43 : vector<16x16x32xf32> to vector<256x32xf32>
    %c1_65 = arith.constant 1 : index
    %c0_66 = arith.constant 0 : index
    %c0_67 = arith.constant 0 : index
    %45 = vector.load %arg7[%c1_65, %c0_66, %c0_67] : memref<18x24x32xf32, #tpu.memory_space<vmem>>, vector<16x16x32xf32>
    %46 = vector.shape_cast %45 : vector<16x16x32xf32> to vector<256x32xf32>
    %c1_68 = arith.constant 1 : index
    %c1_69 = arith.constant 1 : index
    %c0_70 = arith.constant 0 : index
    %47 = vector.load %arg7[%c1_68, %c1_69, %c0_70] : memref<18x24x32xf32, #tpu.memory_space<vmem>>, vector<16x16x32xf32>
    %48 = vector.shape_cast %47 : vector<16x16x32xf32> to vector<256x32xf32>
    %c1_71 = arith.constant 1 : index
    %c2_72 = arith.constant 2 : index
    %c0_73 = arith.constant 0 : index
    %49 = vector.load %arg7[%c1_71, %c2_72, %c0_73] : memref<18x24x32xf32, #tpu.memory_space<vmem>>, vector<16x16x32xf32>
    %50 = vector.shape_cast %49 : vector<16x16x32xf32> to vector<256x32xf32>
    %c2_74 = arith.constant 2 : index
    %c0_75 = arith.constant 0 : index
    %c0_76 = arith.constant 0 : index
    %51 = vector.load %arg7[%c2_74, %c0_75, %c0_76] : memref<18x24x32xf32, #tpu.memory_space<vmem>>, vector<16x16x32xf32>
    %52 = vector.shape_cast %51 : vector<16x16x32xf32> to vector<256x32xf32>
    %c2_77 = arith.constant 2 : index
    %c1_78 = arith.constant 1 : index
    %c0_79 = arith.constant 0 : index
    %53 = vector.load %arg7[%c2_77, %c1_78, %c0_79] : memref<18x24x32xf32, #tpu.memory_space<vmem>>, vector<16x16x32xf32>
    %54 = vector.shape_cast %53 : vector<16x16x32xf32> to vector<256x32xf32>
    %c2_80 = arith.constant 2 : index
    %c2_81 = arith.constant 2 : index
    %c0_82 = arith.constant 0 : index
    %55 = vector.load %arg7[%c2_80, %c2_81, %c0_82] : memref<18x24x32xf32, #tpu.memory_space<vmem>>, vector<16x16x32xf32>
    %56 = vector.shape_cast %55 : vector<16x16x32xf32> to vector<256x32xf32>
    %57 = tpu.concatenate %40, %42, %44, %46, %48, %50, %52, %54, %56 in 1 : vector<256x32xf32>, vector<256x32xf32>, vector<256x32xf32>, vector<256x32xf32>, vector<256x32xf32>, vector<256x32xf32>, vector<256x32xf32>, vector<256x32xf32>, vector<256x32xf32> -> vector<256x288xf32>
    %cst_83 = arith.constant dense<0.000000e+00> : vector<256x32xf32>
    %58 = tpu.matmul %57, %37, %cst_83 {dimension_numbers = #tpu.dot_dimension_numbers<[1], [0], [0], [1], [0, 0, 1, 1], [], []>} : vector<256x288xf32>, vector<288x32xf32>, vector<256x32xf32> -> vector<256x32xf32>
    %59 = vector.broadcast %38 : vector<1x32xf32> to vector<256x32xf32>
    %60 = arith.addf %58, %59 : vector<256x32xf32>
    %61 = vector.shape_cast %60 : vector<256x32xf32> to vector<16x16x32xf32>
    %62 = arith.addf %1, %61 : vector<16x16x32xf32>
    %c0_84 = arith.constant 0 : index
    %c0_85 = arith.constant 0 : index
    %c0_86 = arith.constant 0 : index
    %c0_87 = arith.constant 0 : index
    %63 = vector.load %arg6[%c0_84, %c0_85, %c0_86, %c0_87] : memref<1x16x16x32xf32, #tpu.memory_space<vmem>>, vector<1x16x16x32xf32>
    %64 = vector.shape_cast %63 : vector<1x16x16x32xf32> to vector<16x16x32xf32>
    %65 = vector.shape_cast %62 : vector<16x16x32xf32> to vector<1x16x16x32xf32>
    tpu.vector_store %arg6[%c0_84, %c0_85, %c0_86, %c0_87], %65 {strides = array<i32>} : memref<1x16x16x32xf32, #tpu.memory_space<vmem>>, vector<1x16x16x32xf32>,
    return
  }
  func.func @transform_0(%arg0: i32) -> (i32, i32, i32, i32) {
    %c0_i32 = arith.constant 0 : i32
    %c0_i32_0 = arith.constant 0 : i32
    %c0_i32_1 = arith.constant 0 : i32
    %c0_i32_2 = arith.constant 0 : i32
    return %arg0, %c0_i32, %c0_i32_0, %c0_i32_1 : i32, i32, i32, i32
  }
  func.func @transform_1(%arg0: i32) -> (i32, i32) {
    %c0_i32 = arith.constant 0 : i32
    %c0_i32_0 = arith.constant 0 : i32
    %c0_i32_1 = arith.constant 0 : i32
    return %c0_i32, %c0_i32_0 : i32, i32
  }
  func.func @transform_2(%arg0: i32) -> (i32, i32) {
    %c0_i32 = arith.constant 0 : i32
    %c0_i32_0 = arith.constant 0 : i32
    %c0_i32_1 = arith.constant 0 : i32
    return %c0_i32, %c0_i32_0 : i32, i32
  }
  func.func @transform_3(%arg0: i32) -> (i32, i32) {
    %c0_i32 = arith.constant 0 : i32
    %c0_i32_0 = arith.constant 0 : i32
    %c0_i32_1 = arith.constant 0 : i32
    return %c0_i32, %c0_i32_0 : i32, i32
  }
  func.func @transform_4(%arg0: i32) -> (i32, i32) {
    %c0_i32 = arith.constant 0 : i32
    %c0_i32_0 = arith.constant 0 : i32
    %c0_i32_1 = arith.constant 0 : i32
    return %c0_i32, %c0_i32_0 : i32, i32
  }
  func.func @transform_5(%arg0: i32) -> (i32, i32, i32, i32) {
    %c0_i32 = arith.constant 0 : i32
    %c0_i32_0 = arith.constant 0 : i32
    %c0_i32_1 = arith.constant 0 : i32
    %c0_i32_2 = arith.constant 0 : i32
    return %arg0, %c0_i32, %c0_i32_0, %c0_i32_1 : i32, i32, i32, i32
  }
}

</mosaic_0001>

<bundles_post_ra>
// kernel: tpu_custom_call.1
= control target key start
LH: loop header
LB: loop body
LE: loop exit
PB: predicated region body
PF: predicated region fallthrough
CT: control target
= control target key end

     0   :  { %10 = vsyncpa [#allocation4], 0  ;;  %s7649_s0 = inlined_call_operand.vmem [shape: f32[2,16,16,32], index: 0, kind: input, shape index: {}]   ;;  %s7650_s1 = inlined_call_operand.vmem [shape: f32[288,32], index: 1, kind: input, shape index: {}]   ;;  %s7651_s2 = inlined_call_operand.vmem [shape: f32[1,32], index: 2, kind: input, shape index: {}]   ;;  %s7652_s3 = inlined_call_operand.vmem [shape: f32[288,32], index: 3, kind: input, shape index: {}]   ;;  %s7653_s4 = inlined_call_operand.vmem [shape: f32[1,32], index: 4, kind: input, shape index: {}]   ;;  %s7654_s5 = inlined_call_operand.hbm [shape: f32[2,16,16,32], index: 5, kind: output, shape index: {}]  }
   0x1   :  { %12 = vsyncpa [#allocation4 + $0x1], 0  ;;  %s5186_s18 = smov 0   ;;  %s5188_s19 = smov 0  }
   0x2   :  { %s5190_s20 = smov 0   ;;  %s5192_s21 = smov 0  }
   0x3 LB: > { %s5207_s22 = sadd.s32 4294967295, %s5148_s21   ;;  %s3984_s23 = sadd.s32 4294967294, %s5148_s21   ;;  %s5148_s21 = sphi %s5192_s21, %s7765_s21   ;;  %s5144_s20 = sphi %s5190_s20, %s7764_s20   ;;  %s5140_s19 = sphi %s5188_s19, %s7763_s19   ;;  %s5136_s18 = sphi %s5186_s18, %s7762_s18  }
   0x4   : > { %s5211_s24 = sadd.s32 1, %s5148_s21   ;;  %s135_s25 = sadd.s32 1, %s5144_s20 }
   0x5   : > { %s132_s26 = ssub.s32 %s5148_s21, %s5211_s24  ;;  %p145_p0 = scmp.ne.s32.totalorder %s5144_s20, %s5140_s19 }
   0x6   : > { %p133_p1 = scmp.eq.s32.totalorder %s132_s26, 0  ;;  %p146_p2 = scmp.eq.s32.totalorder %s5207_s22, 1 }
   0x7   : > { %p151_p3 = scmp.ne.s32.totalorder %s5140_s19, %s5136_s18  ;;  %p152_p4 = scmp.eq.s32.totalorder %s3984_s23, 1 }
   0x8   : > { %s5222_s27 = scalar_select %p133_p1, %s5144_s20, %s135_s25  }
   0x9   : > { %p5224_p5 = por %p146_p2, %p145_p0  ;;  %p5228_p6 = por %p152_p4, %p151_p3 }
   0xa   : > { %p3987_p7 = scmp.ge.s32.totalorder %s5148_s21, 1  ;;  %p190_p8 = scmp.lt.s32.totalorder %s5148_s21, 3 }
   0xc   : > { %p191_p9 = pnand %p3987_p7, %p190_p8 }
   0xe   : > { %194 = sbr.rel (%p191_p9) target bundleno = 1101 (0x44d), region = 40 }
  0x13   : > { %vm255_vm0 = vcmask 261120   ;;  %p218_p10 = scmp.lt.s32.totalorder %s5207_s22, 1  ;;  %v5150_v0 = vmov 0.0   ;;  %s5151_s10 = smov 32   ;;  %vm264_vm1 = vcmask 253952   ;;  %vm1488_vm2 = vcmask 785408  }
  0x14   : > { %256 = vst.msk [vmem:[#allocation2] sm:$0xff] %vm255_vm0, %v5150_v0  ;;  %s5152_s11 = smov 64   ;;  %s5153_s12 = smov 96   ;;  %vm1455_vm3 = vcmask 523264  }
  0x15   : > { %257 = vst.msk [vmem:[#allocation2 + $0x8] sm:$0xff] %vm255_vm0, %v5150_v0  ;;  %s219_s30 = scalar_select %p218_p10, %s5207_s22, 1 }
  0x16   : > { %258 = vst.msk [vmem:[#allocation2 + $0x10] sm:$0xff] %vm255_vm0, %v5150_v0  ;;  %s215_s26 = sand.u32 1, %s5140_s19   ;;  %s5106_s25 = scalar_lea.hbm %s7654_s5, 512 }
  0x17   : > { %260 = vst.msk [vmem:[#allocation2 + $0x198] sm:$0xff] %vm255_vm0, %v5150_v0  ;;  %s4060_s6 = sshll.u32 %s219_s30, 8 }
  0x18   : > { %261 = vst.msk [vmem:[#allocation2 + $0x1a0] sm:$0xff] %vm255_vm0, %v5150_v0  ;;  %s5249_s9 = scalar_lea.vmem %s7649_s0, %s4060_s6  ;;  %s4061_s6 = sshll.u32 %s5207_s22, 8 }
  0x19   : > { %262 = vst.msk [vmem:[#allocation2 + $0x1a8] sm:$0xff] %vm255_vm0, %v5150_v0  ;;  %v5254_v1 = vld [vmem:[%s5249_s9 + $0x30] sm:$0xff]  ;;  %v5257_v2 = vld [vmem:[%s5249_s9 + $0x38] sm:$0xff]  ;;  %v5270_v5 = vld [vmem:[%s5249_s9] sm:$0xff]  ;;  %s3907_s22 = scalar_lea.sflag [#allocation4], %s215_s26 }
  0x1a   : > { %7692 = vst [vmem:[#allocation6_spill] sm:$0xff] %v5254_v1  ;;  %v5260_v3 = vld [vmem:[%s5249_s9 + $0x10] sm:$0xff]  ;;  %v5265_v4 = vld [vmem:[%s5249_s9 + $0x18] sm:$0xff]  ;;  %v5275_v7 = vld [vmem:[%s5249_s9 + $0x8] sm:$0xff] }
  0x1b   : > { %7693 = vst [vmem:[#allocation7_spill] sm:$0xff] %v5257_v2  ;;  %v5280_v9 = vld [vmem:[%s5249_s9 + $0x40] sm:$0xff]  ;;  %v5285_v11 = vld [vmem:[%s5249_s9 + $0x48] sm:$0xff]  ;;  %v5301_v15 = vld [vmem:[%s5249_s9 + $0x50] sm:$0xff] }
  0x1c   : > { %7694 = vst [vmem:[#allocation8_spill] sm:$0xff] %v5260_v3  ;;  %v398_v6 = vld [vmem:[#allocation2 + $0x1] sm:$0xff]  ;;  %v5306_v17 = vld [vmem:[%s5249_s9 + $0x58] sm:$0xff]  ;;  %v5311_v20 = vld [vmem:[%s5249_s9 + $0x70] sm:$0xff] }
  0x1d   : > { %303 = vst.msk [vmem:[#allocation2 + $0x61] sm:$0xff] %vm255_vm0, %v5254_v1  ;;  %v399_v8 = vld [vmem:[#allocation2 + $0x9] sm:$0xff]  ;;  %v5290_v12 = vld [vmem:[%s5249_s9 + $0x20] sm:$0xff]  ;;  %v5316_v22 = vld [vmem:[%s5249_s9 + $0x78] sm:$0xff] }
  0x1e   : > { %7695 = vst [vmem:[#allocation9_spill] sm:$0xff] %v5265_v4  ;;  %v4131_v10 = vpack.i.bf16 %v399_v8, %v398_v6  ;;  %v5296_v13 = vld [vmem:[%s5249_s9 + $0x28] sm:$0xff]  ;;  %v5322_v25 = vld [vmem:[%s5249_s9 + $0x60] sm:$0xff]  ;;  %v5354_v40 = vld [vmem:[%s5249_s9 + $0x90] sm:$0xff] }
  0x1f   : > { %304 = vst.msk [vmem:[#allocation2 + $0x69] sm:$0xff] %vm255_vm0, %v5257_v2  ;;  %v5327_v27 = vld [vmem:[%s5249_s9 + $0x68] sm:$0xff]  ;;  %v5333_v30 = vld [vmem:[%s5249_s9 + $0x80] sm:$0xff]  ;;  %v5359_v42 = vld [vmem:[%s5249_s9 + $0x98] sm:$0xff] }
  0x20   : > { %7696 = vst [vmem:[#allocation10_spill] sm:$0xff] %v5270_v5  ;;  %4132 = vrot.lane.b32.xlu0 %v4131_v10, %s5151_s10  ;;  %v5338_v32 = vld [vmem:[%s5249_s9 + $0x88] sm:$0xff]  ;;  %v5344_v35 = vld [vmem:[%s5249_s9 + $0xa0] sm:$0xff]  ;;  %v5365_v44 = vld [vmem:[%s5249_s9 + $0xb0] sm:$0xff] }
  0x21   : > { %299 = vst.msk [vmem:[#allocation2 + $0x31] sm:$0xff] %vm255_vm0, %v5260_v3  ;;  %v5349_v37 = vld [vmem:[%s5249_s9 + $0xa8] sm:$0xff]  ;;  %v5370_v47 = vld [vmem:[%s5249_s9 + $0xb8] sm:$0xff]  ;;  %v5376_v48 = vld [vmem:[%s5249_s9 + $0xd0] sm:$0xff] }
  0x22   : > { %7697 = vst [vmem:[#allocation11_spill] sm:$0xff] %v5275_v7  ;;  %v5381_v51 = vld [vmem:[%s5249_s9 + $0xd8] sm:$0xff]  ;;  %v5387_v53 = vld [vmem:[%s5249_s9 + $0xc0] sm:$0xff]  ;;  %v5392_v56 = vld [vmem:[%s5249_s9 + $0xc8] sm:$0xff] }
  0x23   : > { %300 = vst.msk [vmem:[#allocation2 + $0x39] sm:$0xff] %vm255_vm0, %v5265_v4  ;;  %v5397_v58 = vld [vmem:[%s5249_s9 + $0xe0] sm:$0xff]  ;;  %v5402_v59 = vld [vmem:[%s5249_s9 + $0xe8] sm:$0xff] }
  0x24   : > { %7698 = vst [vmem:[#allocation12_spill] sm:$0xff] %v5280_v9  ;;  %v406_v14 = vld [vmem:[#allocation2 + $0x61] sm:$0xff] }
  0x25   : > { %297 = vst.msk [vmem:[#allocation2 + $0x19] sm:$0xff] %vm255_vm0, %v5270_v5  ;;  %v366_v1 = vld [vmem:[#allocation2] sm:$0xff] }
  0x26   : > { %7699 = vst [vmem:[#allocation13_spill] sm:$0xff] %v5285_v11  ;;  %v407_v16 = vld [vmem:[#allocation2 + $0x69] sm:$0xff] }
  0x27   : > { %298 = vst.msk [vmem:[#allocation2 + $0x21] sm:$0xff] %vm255_vm0, %v5275_v7  ;;  %v4151_v18 = vpack.i.bf16 %v407_v16, %v406_v14 }
  0x28   : > { %7700 = vst [vmem:[#allocation14_spill] sm:$0xff] %v5290_v12  ;;  %v402_v19 = vld [vmem:[#allocation2 + $0x31] sm:$0xff] }
  0x29   : > { %305 = vst.msk [vmem:[#allocation2 + $0x79] sm:$0xff] %vm255_vm0, %v5280_v9  ;;  %4152 = vrot.lane.b32.xlu2 %v4151_v18, %s5151_s10 }
  0x2a   : > { %7701 = vst [vmem:[#allocation15_spill] sm:$0xff] %v5296_v13  ;;  %v403_v21 = vld [vmem:[#allocation2 + $0x39] sm:$0xff] }
  0x2b   : > { %306 = vst.msk [vmem:[#allocation2 + $0x81] sm:$0xff] %vm255_vm0, %v5285_v11  ;;  %v4141_v23 = vpack.i.bf16 %v403_v21, %v402_v19 }
  0x2c   : > { %7702 = vst [vmem:[#allocation16_spill] sm:$0xff] %v5301_v15  ;;  %v400_v24 = vld [vmem:[#allocation2 + $0x19] sm:$0xff] }
  0x2d   : > { %301 = vst.msk [vmem:[#allocation2 + $0x49] sm:$0xff] %vm255_vm0, %v5290_v12  ;;  %4142 = vrot.lane.b32.xlu1 %v4141_v23, %s5151_s10 }
  0x2e   : > { %7703 = vst [vmem:[#allocation17_spill] sm:$0xff] %v5306_v17  ;;  %v401_v26 = vld [vmem:[#allocation2 + $0x21] sm:$0xff] }
  0x2f   : > { %302 = vst.msk [vmem:[#allocation2 + $0x51] sm:$0xff] %vm255_vm0, %v5296_v13  ;;  %v4136_v28 = vpack.i.bf16 %v401_v26, %v400_v24 }
  0x30   : > { %7704 = vst [vmem:[#allocation18_spill] sm:$0xff] %v5311_v20  ;;  %v408_v29 = vld [vmem:[#allocation2 + $0x79] sm:$0xff] }
  0x31   : > { %307 = vst.msk [vmem:[#allocation2 + $0x91] sm:$0xff] %vm255_vm0, %v5301_v15  ;;  %4137 = vrot.lane.b32.xlu0 %v4136_v28, %s5151_s10 }
  0x32   : > { %7705 = vst [vmem:[#allocation19_spill] sm:$0xff] %v5316_v22  ;;  %v409_v31 = vld [vmem:[#allocation2 + $0x81] sm:$0xff] }
  0x33   : > { %308 = vst.msk [vmem:[#allocation2 + $0x99] sm:$0xff] %vm255_vm0, %v5306_v17  ;;  %v4156_v33 = vpack.i.bf16 %v409_v31, %v408_v29 }
  0x34   : > { %7706 = vst [vmem:[#allocation20_spill] sm:$0xff] %v5322_v25  ;;  %v404_v34 = vld [vmem:[#allocation2 + $0x49] sm:$0xff] }
  0x35   : > { %311 = vst.msk [vmem:[#allocation2 + $0xc1] sm:$0xff] %vm255_vm0, %v5311_v20  ;;  %4157 = vrot.lane.b32.xlu2 %v4156_v33, %s5151_s10  ;;  %v344_v20 = vld [vmem:[%s7650_s1 + $0x78] sm:$0xff] }
  0x36   : > { %7707 = vst [vmem:[#allocation21_spill] sm:$0xff] %v5327_v27  ;;  %v405_v36 = vld [vmem:[#allocation2 + $0x51] sm:$0xff]  ;;  %1716 = vmatpush.msra.mxu0 %v344_v20  ;;  %4062 = vmatpush.msra.mxu1 %v344_v20 }
  0x37   : > { %312 = vst.msk [vmem:[#allocation2 + $0xc9] sm:$0xff] %vm255_vm0, %v5316_v22  ;;  %v4146_v38 = vpack.i.bf16 %v405_v36, %v404_v34  ;;  %v432_v34 = vld [vmem:[#allocation2 + $0x1a] sm:$0xff] }
  0x38   : > { %7708 = vst [vmem:[#allocation22_spill] sm:$0xff] %v5333_v30  ;;  %v410_v39 = vld [vmem:[#allocation2 + $0x91] sm:$0xff] }
  0x39   : > { %309 = vst.msk [vmem:[#allocation2 + $0xa9] sm:$0xff] %vm255_vm0, %v5322_v25  ;;  %4147 = vrot.lane.b32.xlu1 %v4146_v38, %s5151_s10  ;;  %v430_v38 = vld [vmem:[#allocation2 + $0x2] sm:$0xff] }
  0x3a   : > { %7709 = vst [vmem:[#allocation23_spill] sm:$0xff] %v5338_v32  ;;  %v411_v41 = vld [vmem:[#allocation2 + $0x99] sm:$0xff] }
  0x3b   : > { %310 = vst.msk [vmem:[#allocation2 + $0xb1] sm:$0xff] %vm255_vm0, %v5327_v27  ;;  %v4161_v43 = vpack.i.bf16 %v411_v41, %v410_v39  ;;  %v431_v39 = vld [vmem:[#allocation2 + $0xa] sm:$0xff] }
  0x3c   : > { %7710 = vst [vmem:[#allocation24_spill] sm:$0xff] %v5344_v35  ;;  %v414_v45 = vld [vmem:[#allocation2 + $0xc1] sm:$0xff] }
  0x3d   : > { %313 = vst.msk [vmem:[#allocation2 + $0xd9] sm:$0xff] %vm255_vm0, %v5333_v30  ;;  %4162 = vrot.lane.b32.xlu0 %v4161_v43, %s5151_s10  ;;  %v4211_v43 = vpack.i.bf16 %v431_v39, %v430_v38 }
  0x3e   : > { %7711 = vst [vmem:[#allocation25_spill] sm:$0xff] %v5349_v37  ;;  %v415_v46 = vld [vmem:[#allocation2 + $0xc9] sm:$0xff] }
  0x3f   : > { %314 = vst.msk [vmem:[#allocation2 + $0xe1] sm:$0xff] %vm255_vm0, %v5338_v32  ;;  %v4171_v52 = vpack.i.bf16 %v415_v46, %v414_v45  ;;  %v434_v45 = vld [vmem:[#allocation2 + $0x32] sm:$0xff] }
  0x40   : > { %7712 = vst [vmem:[#allocation26_spill] sm:$0xff] %v5354_v40  ;;  %v412_v49 = vld [vmem:[#allocation2 + $0xa9] sm:$0xff] }
  0x41   : > { %317 = vst.msk [vmem:[#allocation2 + $0x109] sm:$0xff] %vm255_vm0, %v5344_v35  ;;  %4172 = vrot.lane.b32.xlu2 %v4171_v52, %s5151_s10 }
  0x42   : > { %7713 = vst [vmem:[#allocation27_spill] sm:$0xff] %v5359_v42  ;;  %v413_v50 = vld [vmem:[#allocation2 + $0xb1] sm:$0xff] }
  0x43   : > { %318 = vst.msk [vmem:[#allocation2 + $0x111] sm:$0xff] %vm255_vm0, %v5349_v37  ;;  %v4166_v57 = vpack.i.bf16 %v413_v50, %v412_v49  ;;  %v436_v49 = vld [vmem:[#allocation2 + $0x4a] sm:$0xff]  ;;  %v438_v50 = vld [vmem:[#allocation2 + $0x62] sm:$0xff] }
  0x44   : > { %7714 = vst [vmem:[#allocation28_spill] sm:$0xff] %v5365_v44  ;;  %v416_v54 = vld [vmem:[#allocation2 + $0xd9] sm:$0xff] }
  0x45   : > { %315 = vst.msk [vmem:[#allocation2 + $0xf1] sm:$0xff] %vm255_vm0, %v5354_v40  ;;  %4167 = vrot.lane.b32.xlu1 %v4166_v57, %s5151_s10 }
  0x46   : > { %7715 = vst [vmem:[#allocation29_spill] sm:$0xff] %v5370_v47  ;;  %v417_v55 = vld [vmem:[#allocation2 + $0xe1] sm:$0xff] }
  0x47   : > { %316 = vst.msk [vmem:[#allocation2 + $0xf9] sm:$0xff] %vm255_vm0, %v5359_v42  ;;  %v4176_v60 = vpack.i.bf16 %v417_v55, %v416_v54 }
  0x48   : > { %7716 = vst [vmem:[#allocation30_spill] sm:$0xff] %v5376_v48  ;;  %v420_v61 = vld [vmem:[#allocation2 + $0x109] sm:$0xff] }
  0x49   : > { %319 = vst.msk [vmem:[#allocation2 + $0x121] sm:$0xff] %vm255_vm0, %v5365_v44  ;;  %4177 = vrot.lane.b32.xlu0 %v4176_v60, %s5151_s10 }
  0x4a   : > { %7717 = vst [vmem:[#allocation31_spill] sm:$0xff] %v5381_v51  ;;  %v421_v62 = vld [vmem:[#allocation2 + $0x111] sm:$0xff] }
  0x4b   : > { %320 = vst.msk [vmem:[#allocation2 + $0x129] sm:$0xff] %vm255_vm0, %v5370_v47  ;;  %v4186_v8 = vpack.i.bf16 %v421_v62, %v420_v61  ;;  %v440_v61 = vld [vmem:[#allocation2 + $0x7a] sm:$0xff] }
  0x4c   : > { %7718 = vst [vmem:[#allocation32_spill] sm:$0xff] %v5387_v53  ;;  %v418_v63 = vld [vmem:[#allocation2 + $0xf1] sm:$0xff] }
  0x4d   : > { %323 = vst.msk [vmem:[#allocation2 + $0x151] sm:$0xff] %vm255_vm0, %v5376_v48  ;;  %4187 = vrot.lane.b32.xlu2 %v4186_v8, %s5151_s10 }
  0x4e   : > { %7719 = vst [vmem:[#allocation33_spill] sm:$0xff] %v5392_v56  ;;  %v419_v6 = vld [vmem:[#allocation2 + $0xf9] sm:$0xff] }
  0x4f   : > { %324 = vst.msk [vmem:[#allocation2 + $0x159] sm:$0xff] %vm255_vm0, %v5381_v51  ;;  %v4181_v16 = vpack.i.bf16 %v419_v6, %v418_v63  ;;  %v444_v63 = vld [vmem:[#allocation2 + $0xaa] sm:$0xff]  ;;  %v481_v48 = vld [vmem:[#allocation2 + $0xf8] sm:$0xff] }
  0x50   : > { %7720 = vst [vmem:[#allocation34_spill] sm:$0xff] %v5397_v58  ;;  %v422_v10 = vld [vmem:[#allocation2 + $0x121] sm:$0xff] }
  0x51   : > { %321 = vst.msk [vmem:[#allocation2 + $0x139] sm:$0xff] %vm255_vm0, %v5387_v53  ;;  %4182 = vrot.lane.b32.xlu1 %v4181_v16, %s5151_s10  ;;  %v483_v53 = vld [vmem:[#allocation2 + $0x110] sm:$0xff] }
  0x52   : > { %7721 = vst [vmem:[#allocation35_spill] sm:$0xff] %v5402_v59  ;;  %v423_v14 = vld [vmem:[#allocation2 + $0x129] sm:$0xff] }
  0x53   : > { %322 = vst.msk [vmem:[#allocation2 + $0x141] sm:$0xff] %vm255_vm0, %v5392_v56  ;;  %v4191_v18 = vpack.i.bf16 %v423_v14, %v422_v10  ;;  %v442_v10 = vld [vmem:[#allocation2 + $0x92] sm:$0xff]  ;;  %v485_v35 = vld [vmem:[#allocation2 + $0x128] sm:$0xff] }
  0x54   : > { %325 = vst.msk [vmem:[#allocation2 + $0x169] sm:$0xff] %vm255_vm0, %v5397_v58  ;;  %v426_v19 = vld [vmem:[#allocation2 + $0x151] sm:$0xff]  ;;  %v5597_v58 = vld [vmem:[#allocation2 + $0xc8] sm:$0xff] }
  0x55   : > { %326 = vst.msk [vmem:[#allocation2 + $0x171] sm:$0xff] %vm255_vm0, %v5402_v59  ;;  %4192 = vrot.lane.b32.xlu0 %v4191_v18, %s5151_s10 }
  0x56   : > { %281 = vst.msk [vmem:[#allocation2 + $0x29] sm:$0x1] %vm264_vm1, %v5150_v0  ;;  %v427_v21 = vld [vmem:[#allocation2 + $0x159] sm:$0xff] }
  0x57   : > { %265 = vst.msk [vmem:[#allocation2 + $0x18] sm:$0x1] %vm264_vm1, %v5150_v0  ;;  %v4201_v26 = vpack.i.bf16 %v427_v21, %v426_v19  ;;  %v446_v19 = vld [vmem:[#allocation2 + $0xc2] sm:$0xff]  ;;  %v489_v22 = vld [vmem:[#allocation2 + $0x158] sm:$0xff] }
  0x58   : > { %266 = vst.msk [vmem:[#allocation2 + $0x30] sm:$0x1] %vm264_vm1, %v5150_v0  ;;  %v424_v23 = vld [vmem:[#allocation2 + $0x139] sm:$0xff] }
  0x59   : > { %267 = vst.msk [vmem:[#allocation2 + $0x48] sm:$0x1] %vm264_vm1, %v5150_v0  ;;  %4202 = vrot.lane.b32.xlu2 %v4201_v26, %s5151_s10  ;;  %v448_v26 = vld [vmem:[#allocation2 + $0xda] sm:$0xff] }
  0x5a   : > { %268 = vst.msk [vmem:[#allocation2 + $0x60] sm:$0x1] %vm264_vm1, %v5150_v0  ;;  %v425_v24 = vld [vmem:[#allocation2 + $0x141] sm:$0xff] }
  0x5b   : > { %269 = vst.msk [vmem:[#allocation2 + $0x78] sm:$0x1] %vm264_vm1, %v5150_v0  ;;  %v428_v28 = vld [vmem:[#allocation2 + $0x169] sm:$0xff]  ;;  %v4196_v31 = vpack.i.bf16 %v425_v24, %v424_v23  ;;  %v487_v44 = vld [vmem:[#allocation2 + $0x140] sm:$0xff] }
  0x5c   : > { %270 = vst.msk [vmem:[#allocation2 + $0x90] sm:$0x1] %vm264_vm1, %v5150_v0  ;;  %v429_v29 = vld [vmem:[#allocation2 + $0x171] sm:$0xff] }
  0x5d   : > { %271 = vst.msk [vmem:[#allocation2 + $0xa8] sm:$0x1] %vm264_vm1, %v5150_v0  ;;  %v4206_v33 = vpack.i.bf16 %v429_v29, %v428_v28  ;;  %v433_v36 = vld [vmem:[#allocation2 + $0x22] sm:$0xff]  ;;  %4197 = vrot.lane.b32.xlu1 %v4196_v31, %s5151_s10  ;;  %v491_v27 = vld [vmem:[#allocation2 + $0x170] sm:$0xff] }
  0x5e   : > { %272 = vst.msk [vmem:[#allocation2 + $0xc0] sm:$0x1] %vm264_vm1, %v5150_v0  ;;  %v5453_v41 = vpack.i.bf16 %v433_v36, %v432_v34  ;;  %v456_v36 = vld [vmem:[#allocation2 + $0x13a] sm:$0xff] }
  0x5f   : > { %273 = vst.msk [vmem:[#allocation2 + $0xd8] sm:$0x1] %vm264_vm1, %v5150_v0  ;;  %4207 = vrot.lane.b32.xlu0 %v4206_v33, %s5151_s10  ;;  %v452_v33 = vld [vmem:[#allocation2 + $0x10a] sm:$0xff] }
  0x60   : > { %274 = vst.msk [vmem:[#allocation2 + $0xf0] sm:$0x1] %vm264_vm1, %v5150_v0 }
  0x61   : > { %275 = vst.msk [vmem:[#allocation2 + $0x108] sm:$0x1] %vm264_vm1, %v5150_v0  ;;  %4217 = vrot.lane.b32.xlu2 %v5453_v41, %s5152_s11 }
  0x62   : > { %276 = vst.msk [vmem:[#allocation2 + $0x120] sm:$0x1] %vm264_vm1, %v5150_v0 }
  0x63   : > { %277 = vst.msk [vmem:[#allocation2 + $0x138] sm:$0x1] %vm264_vm1, %v5150_v0 }
  0x64   : > { %278 = vst.msk [vmem:[#allocation2 + $0x150] sm:$0x1] %vm264_vm1, %v5150_v0 }
  0x65   : > { %279 = vst.msk [vmem:[#allocation2 + $0x168] sm:$0x1] %vm264_vm1, %v5150_v0  ;;  %4212 = vrot.lane.b32.xlu1 %v4211_v43, %s5152_s11  ;;  %v454_v43 = vld [vmem:[#allocation2 + $0x122] sm:$0xff] }
  0x66   : > { %280 = vst.msk [vmem:[#allocation2 + $0x180] sm:$0x1] %vm264_vm1, %v5150_v0  ;;  %v5595_v59 = vld [vmem:[#allocation2 + $0xc0] sm:$0xff] }
  0x67   : > { %282 = vst.msk [vmem:[#allocation2 + $0x41] sm:$0x1] %vm264_vm1, %v5150_v0  ;;  %v480_v51 = vld [vmem:[#allocation2 + $0xf0] sm:$0xff] }
  0x68   : > { %283 = vst.msk [vmem:[#allocation2 + $0x59] sm:$0x1] %vm264_vm1, %v5150_v0  ;;  %v482_v56 = vld [vmem:[#allocation2 + $0x108] sm:$0xff] }
  0x69   : > { %284 = vst.msk [vmem:[#allocation2 + $0x71] sm:$0x1] %vm264_vm1, %v5150_v0 }
  0x6a   : > { %285 = vst.msk [vmem:[#allocation2 + $0x89] sm:$0x1] %vm264_vm1, %v5150_v0  ;;  %v486_v47 = vld [vmem:[#allocation2 + $0x138] sm:$0xff] }
  0x6b   : > { %286 = vst.msk [vmem:[#allocation2 + $0xa1] sm:$0x1] %vm264_vm1, %v5150_v0  ;;  %v5629_v42 = vpack.i.bf16 %v487_v44, %v486_v47  ;;  %v488_v30 = vld [vmem:[#allocation2 + $0x150] sm:$0xff] }
  0x6c   : > { %287 = vst.msk [vmem:[#allocation2 + $0xb9] sm:$0x1] %vm264_vm1, %v5150_v0 }
  0x6d   : > { %288 = vst.msk [vmem:[#allocation2 + $0xd1] sm:$0x1] %vm264_vm1, %v5150_v0 }
  0x6e   : > { %289 = vst.msk [vmem:[#allocation2 + $0xe9] sm:$0x1] %vm264_vm1, %v5150_v0  ;;  %v435_v46 = vld [vmem:[#allocation2 + $0x3a] sm:$0xff] }
  0x6f   : > { %290 = vst.msk [vmem:[#allocation2 + $0x101] sm:$0x1] %vm264_vm1, %v5150_v0  ;;  %v5476_v52 = vpack.i.bf16 %v435_v46, %v434_v45  ;;  %v437_v54 = vld [vmem:[#allocation2 + $0x52] sm:$0xff] }
  0x70   : > { %291 = vst.msk [vmem:[#allocation2 + $0x119] sm:$0x1] %vm264_vm1, %v5150_v0  ;;  %v439_v55 = vld [vmem:[#allocation2 + $0x6a] sm:$0xff]  ;;  %v5484_v57 = vpack.i.bf16 %v437_v54, %v436_v49 }
  0x71   : > { %292 = vst.msk [vmem:[#allocation2 + $0x131] sm:$0x1] %vm264_vm1, %v5150_v0  ;;  %4222 = vrot.lane.b32.xlu0 %v5476_v52, %s5152_s11  ;;  %v5486_v60 = vpack.i.bf16 %v439_v55, %v438_v50  ;;  %v441_v62 = vld [vmem:[#allocation2 + $0x82] sm:$0xff]  ;;  %v458_v50 = vld [vmem:[#allocation2 + $0x152] sm:$0xff] }
  0x72   : > { %293 = vst.msk [vmem:[#allocation2 + $0x149] sm:$0x1] %vm264_vm1, %v5150_v0  ;;  %4227 = vrot.lane.b32.xlu1 %v5484_v57, %s5152_s11  ;;  %v5500_v8 = vpack.i.bf16 %v441_v62, %v440_v61  ;;  %v443_v14 = vld [vmem:[#allocation2 + $0x9a] sm:$0xff] }
  0x73   : > { %294 = vst.msk [vmem:[#allocation2 + $0x161] sm:$0x1] %vm264_vm1, %v5150_v0  ;;  %4232 = vrot.lane.b32.xlu2 %v5486_v60, %s5152_s11  ;;  %v445_v6 = vld [vmem:[#allocation2 + $0xb2] sm:$0xff]  ;;  %v5506_v18 = vpack.i.bf16 %v443_v14, %v442_v10  ;;  %v5536_v61 = vld [vmem:[#allocation2 + $0x20] sm:$0xff] }
  0x74   : > { %295 = vst.msk [vmem:[#allocation2 + $0x179] sm:$0x1] %vm264_vm1, %v5150_v0  ;;  %v5502_v16 = vpack.i.bf16 %v445_v6, %v444_v63  ;;  %v447_v21 = vld [vmem:[#allocation2 + $0xca] sm:$0xff]  ;;  %v5534_v55 = vld [vmem:[#allocation2 + $0x18] sm:$0xff] }
  0x75   : > { %296 = vst.msk [vmem:[#allocation2 + $0x191] sm:$0x1] %vm264_vm1, %v5150_v0  ;;  %v450_v0 = vld [vmem:[#allocation2 + $0xf2] sm:$0xff]  ;;  %v5512_v24 = vpack.i.bf16 %v447_v21, %v446_v19  ;;  %v449_v28 = vld [vmem:[#allocation2 + $0xe2] sm:$0xff]  ;;  %v460_v63 = vld [vmem:[#allocation2 + $0x16a] sm:$0xff]  ;;  %v4291_v10 = vpack.i.bf16 %v5536_v61, %v5534_v55 }
  0x76   : > { %v451_v23 = vld [vmem:[#allocation2 + $0xfa] sm:$0xff]  ;;  %v5518_v31 = vpack.i.bf16 %v449_v28, %v448_v26  ;;  %v5548_v19 = vld [vmem:[#allocation2 + $0x30] sm:$0xff] }
  0x77   : > { %v5514_v29 = vpack.i.bf16 %v451_v23, %v450_v0  ;;  %v453_v34 = vld [vmem:[#allocation2 + $0x112] sm:$0xff]  ;;  %v468_v0 = vld [vmem:[#allocation2 + $0x60] sm:$0xff]  ;;  %v469_v23 = vld [vmem:[#allocation2 + $0x68] sm:$0xff] }
  0x78   : > { %v5524_v39 = vpack.i.bf16 %v453_v34, %v452_v33  ;;  %v455_v45 = vld [vmem:[#allocation2 + $0x12a] sm:$0xff]  ;;  %v5550_v21 = vld [vmem:[#allocation2 + $0x38] sm:$0xff] }
  0x79   : > { %4237 = vrot.lane.b32.xlu0 %v5500_v8, %s5152_s11  ;;  %v457_v38 = vld [vmem:[#allocation2 + $0x142] sm:$0xff]  ;;  %v5530_v49 = vpack.i.bf16 %v455_v45, %v454_v43  ;;  %v5554_v26 = vld [vmem:[%s5249_s9 + $0xf0] sm:$0xff]  ;;  %v5560_v28 = vpack.i.bf16 %v5550_v21, %v5548_v19  ;;  %v5563_v33 = vld [vmem:[%s5249_s9 + $0xf8] sm:$0xff]  ;;  %s3918_s9 = scalar_lea.hbm %s7654_s5, %s4061_s6 }
  0x7a   : > { %4242 = vrot.lane.b32.xlu1 %v5506_v18, %s5152_s11  ;;  %v5526_v46 = vpack.i.bf16 %v457_v38, %v456_v36  ;;  %v459_v54 = vld [vmem:[#allocation2 + $0x15a] sm:$0xff]  ;;  %7722 = vst [vmem:[#allocation36_spill] sm:$0xff] %v5554_v26  ;;  %v5567_v34 = vld [vmem:[#allocation2 + $0x48] sm:$0xff]  ;;  %v5569_v36 = vld [vmem:[#allocation2 + $0x50] sm:$0xff]  ;;  %v5573_v38 = vpack.i.bf16 %v469_v23, %v468_v0  ;;  %s3921_s14 = sshll.u32 %s3918_s9, 4  ;;  %s3922_s14 = int_to_ptr.hbm [resolvable:$true] %s3921_s14 }
  0x7b   : > { %4247 = vrot.lane.b32.xlu2 %v5502_v16, %s5152_s11  ;;  %v5540_v62 = vpack.i.bf16 %v459_v54, %v458_v50  ;;  %v461_v6 = vld [vmem:[#allocation2 + $0x172] sm:$0xff]  ;;  %7723 = vst [vmem:[#allocation37_spill] sm:$0xff] %v5563_v33  ;;  %v5579_v43 = vpack.i.bf16 %v5569_v36, %v5567_v34  ;;  %v471_v50 = vld [vmem:[#allocation2 + $0x80] sm:$0xff]  ;;  %v474_v54 = vld [vmem:[#allocation2 + $0xa8] sm:$0xff]  ;;  %s5100_s15 = sshra.s32 %s3922_s14, 4  ;;  %s5101_s15 = int_to_ptr.hbm [resolvable:$true] %s5100_s15 }
  0x7c   : > { %v5546_v14 = vpack.i.bf16 %v461_v6, %v460_v63  ;;  %327 = vst.msk [vmem:[#allocation2 + $0x181] sm:$0xff] %vm255_vm0, %v5554_v26  ;;  %v470_v45 = vld [vmem:[#allocation2 + $0x78] sm:$0xff]  ;;  %v475_v63 = vld [vmem:[#allocation2 + $0xb0] sm:$0xff]  ;;  %s5102_s16 = scalar_lea.hbm %s5101_s15, 256  ;;  %p5107_p0 = scmp.lt.s32.totalorder %s5101_s15, %s7654_s5 }
  0x7d   : > { %328 = vst.msk [vmem:[#allocation2 + $0x189] sm:$0xff] %vm255_vm0, %v5563_v33  ;;  %v472_v0 = vld [vmem:[#allocation2 + $0x90] sm:$0xff]  ;;  %v473_v23 = vld [vmem:[#allocation2 + $0x98] sm:$0xff]  ;;  %v5589_v33 = vpack.i.bf16 %v475_v63, %v474_v54  ;;  %v5611_v63 = vld [vmem:[#allocation2 + $0xe0] sm:$0xff]  ;;  %p5103_p11 = scmp.ne.s32.totalorder %s5101_s15, %s5102_s16  ;;  %p5108_p1 = scmp.lt.s32.totalorder %s5106_s25, %s5102_s16 }
  0x7e   : > { %v5593_v26 = vpack.i.bf16 %v473_v23, %v472_v0  ;;  %v5609_v54 = vld [vmem:[#allocation2 + $0xd8] sm:$0xff]  ;;  %v5613_v0 = vpack.i.bf16 %v481_v48, %v480_v51  ;;  %v5627_v48 = vpack.i.bf16 %v483_v53, %v482_v56  ;;  %v484_v51 = vld [vmem:[#allocation2 + $0x120] sm:$0xff]  ;;  %v343_v56 = vld [vmem:[%s7650_s1 + $0x70] sm:$0xff] }
  0x7f   : > { %v5619_v23 = vpack.i.bf16 %v5611_v63, %v5609_v54  ;;  %v5635_v32 = vpack.i.bf16 %v485_v35, %v484_v51  ;;  %v5646_v35 = vpack.i.bf16 %v489_v22, %v488_v30  ;;  %v490_v51 = vld [vmem:[#allocation2 + $0x168] sm:$0xff]  ;;  %1717 = vmatpush.msra.mxu0 %v343_v56  ;;  %4063 = vmatpush.msra.mxu1 %v343_v56  ;;  %v341_v30 = vld [vmem:[%s7650_s1 + $0x60] sm:$0xff]  ;;  %p5104_p12 = pnand %p5103_p11, %p5224_p5  ;;  %p5109_p2 = por %p5108_p1, %p5107_p0 }
  0x80   : > { %v5659_v15 = vpack.i.bf16 %v491_v27, %v490_v51  ;;  %v342_v22 = vld [vmem:[%s7650_s1 + $0x68] sm:$0xff] }
  0x81   : > { %4252 = vrot.lane.b32.xlu0 %v5512_v24, %s5152_s11  ;;  %1718 = vmatpush.msra.mxu0 %v342_v22  ;;  %p5105_p13 = pneg %p5104_p12 }
  0x82   : > { %4257 = vrot.lane.b32.xlu1 %v5518_v31, %s5152_s11  ;;  %4064 = vmatpush.msra.mxu1 %v342_v22  ;;  %v338_v22 = vld [vmem:[%s7650_s1 + $0x48] sm:$0xff] }
  0x83   : > { %4262 = vrot.lane.b32.xlu2 %v5514_v29, %s5152_s11  ;;  %v5585_v6 = vpop.permute.xlu2 %4152  ;;  %v492_v53 = vld [vmem:[#allocation2 + $0x180] sm:$0xff]  ;;  %1719 = vmatpush.msra.mxu0 %v341_v30  ;;  %p5110_p3 = pnand %p5109_p2, %p5105_p13 }
  0x84   : > { %v493_v44 = vld [vmem:[#allocation2 + $0x188] sm:$0xff]  ;;  %4065 = vmatpush.msra.mxu1 %v341_v30  ;;  %v337_v30 = vld [vmem:[%s7650_s1 + $0x40] sm:$0xff] }
  0x85   : > { %v5653_v17 = vpack.i.bf16 %v493_v44, %v492_v53  ;;  %v340_v53 = vld [vmem:[%s7650_s1 + $0x58] sm:$0xff]  ;;  %v339_v44 = vld [vmem:[%s7650_s1 + $0x50] sm:$0xff] }
  0x86   : > { %1720 = vmatpush.msra.mxu0 %v340_v53  ;;  %4066 = vmatpush.msra.mxu1 %v340_v53 }
  0x88   : > { %1721 = vmatpush.msra.mxu0 %v339_v44  ;;  %4067 = vmatpush.msra.mxu1 %v339_v44  ;;  %v335_v44 = vld [vmem:[%s7650_s1 + $0x30] sm:$0xff] }
  0x89   : > { %4267 = vrot.lane.b32.xlu0 %v5524_v39, %s5152_s11 }
  0x8a   : > { %4272 = vrot.lane.b32.xlu1 %v5530_v49, %s5152_s11  ;;  %1722 = vmatpush.msra.mxu0 %v338_v22 }
  0x8b   : > { %4277 = vrot.lane.b32.xlu2 %v5526_v46, %s5152_s11  ;;  %4068 = vmatpush.msra.mxu1 %v338_v22 }
  0x8c   : > { %1723 = vmatpush.msra.mxu0 %v337_v30 }
  0x8d   : > { %4069 = vmatpush.msra.mxu1 %v337_v30  ;;  %v333_v30 = vld [vmem:[%s7650_s1 + $0x20] sm:$0xff] }
  0x91   : > { %4282 = vrot.lane.b32.xlu0 %v5540_v62, %s5152_s11 }
  0x92   : > { %4287 = vrot.lane.b32.xlu1 %v5546_v14, %s5152_s11  ;;  %v5631_v40 = vpop.permute.xlu0 %4132 }
  0x93   : > { %4292 = vrot.lane.b32.xlu2 %v4291_v10, %s5153_s12  ;;  %v5587_v10 = vpack.i.bf16 %v471_v50, %v470_v45  ;;  %v5603_v45 = vpop.permute.xlu2 %4157  ;;  %v5607_v50 = vpack.i.bf16 %v5597_v58, %v5595_v59  ;;  %v4134_v9 = vunpack.i.l.bf16 %v5631_v40 }
  0x99   : > { %4297 = vrot.lane.b32.xlu0 %v5560_v28, %s5153_s12 }
  0x9a   : > { %4302 = vrot.lane.b32.xlu1 %v5579_v43, %s5153_s12 }
  0x9b   : > { %4307 = vrot.lane.b32.xlu2 %v5573_v38, %s5153_s12  ;;  %v5625_v37 = vpop.permute.xlu2 %4172 }
  0x9f   : > { %v5651_v25 = vpop.permute.xlu1 %4142 }
  0xa1   : > { %4312 = vrot.lane.b32.xlu0 %v5587_v10, %s5153_s12 }
  0xa2   : > { %4317 = vrot.lane.b32.xlu1 %v5593_v26, %s5153_s12 }
  0xa3   : > { %4322 = vrot.lane.b32.xlu2 %v5589_v33, %s5153_s12  ;;  %v5657_v20 = vpop.permute.xlu0 %4137 }
  0xa7   : > { %v5644_v47 = vpop.permute.xlu2 %4187 }
  0xa9   : > { %4327 = vrot.lane.b32.xlu0 %v5607_v50, %s5153_s12 }
  0xaa   : > { %4332 = vrot.lane.b32.xlu1 %v5619_v23, %s5153_s12 }
  0xab   : > { %4337 = vrot.lane.b32.xlu2 %v5613_v0, %s5153_s12  ;;  %v5679_v56 = vpop.permute.xlu1 %4147 }
  0xaf   : > { %v5683_v51 = vpop.permute.xlu0 %4162 }
  0xb1   : > { %4342 = vrot.lane.b32.xlu0 %v5627_v48, %s5153_s12 }
  0xb2   : > { %4347 = vrot.lane.b32.xlu1 %v5635_v32, %s5153_s12 }
  0xb3   : > { %4352 = vrot.lane.b32.xlu2 %v5629_v42, %s5153_s12  ;;  %v5674_v27 = vpop.permute.xlu2 %4202 }
  0xb9   : > { %4357 = vrot.lane.b32.xlu0 %v5646_v35, %s5153_s12 }
  0xba   : > { %4362 = vrot.lane.b32.xlu1 %v5659_v15, %s5153_s12 }
  0xbb   : > { %4367 = vrot.lane.b32.xlu2 %v5653_v17, %s5153_s12  ;;  %v5698_v53 = vpop.permute.xlu2 %4217  ;;  %v5707_v22 = vpop.permute.xlu0 %4177 }
  0xc1   : > { %4372 = vrot.lane.b32.xlu0 %v5453_v41, %s5151_s10  ;;  %v336_v41 = vld [vmem:[%s7650_s1 + $0x38] sm:$0xff] }
  0xc2   : > { %4377 = vrot.lane.b32.xlu1 %v5476_v52, %s5151_s10  ;;  %1724 = vmatpush.msra.mxu0 %v336_v41  ;;  %v334_v52 = vld [vmem:[%s7650_s1 + $0x28] sm:$0xff] }
  0xc3   : > { %4382 = vrot.lane.b32.xlu2 %v5484_v57, %s5151_s10  ;;  %4070 = vmatpush.msra.mxu1 %v336_v41  ;;  %v5703_v57 = vpop.permute.xlu1 %4167 }
  0xc4   : > { %1725 = vmatpush.msra.mxu0 %v335_v44 }
  0xc5   : > { %4071 = vmatpush.msra.mxu1 %v335_v44  ;;  %v331_v44 = vld [vmem:[%s7650_s1 + $0x10] sm:$0xff] }
  0xc6   : > { %1726 = vmatpush.msra.mxu0 %v334_v52 }
  0xc7   : > { %4072 = vmatpush.msra.mxu1 %v334_v52  ;;  %v5731_v52 = vpop.permute.xlu0 %4192 }
  0xc8   : > { %1727 = vmatpush.msra.mxu0 %v333_v30 }
  0xc9   : > { %4387 = vrot.lane.b32.xlu0 %v5486_v60, %s5151_s10  ;;  %v332_v60 = vld [vmem:[%s7650_s1 + $0x18] sm:$0xff]  ;;  %4073 = vmatpush.msra.mxu1 %v333_v30  ;;  %v329_v30 = vld [vmem:[%s7650_s1] sm:$0xff] }
  0xca   : > { %4392 = vrot.lane.b32.xlu1 %v5500_v8, %s5151_s10  ;;  %1728 = vmatpush.msra.mxu0 %v332_v60  ;;  %v330_v8 = vld [vmem:[%s7650_s1 + $0x8] sm:$0xff] }
  0xcb   : > { %4397 = vrot.lane.b32.xlu2 %v5506_v18, %s5151_s10  ;;  %4074 = vmatpush.msra.mxu1 %v332_v60  ;;  %v5727_v18 = vpop.permute.xlu1 %4182 }
  0xcc   : > { %1729 = vmatpush.msra.mxu0 %v331_v44 }
  0xcd   : > { %v5722_v41 = vpop.permute.xlu2 %4232  ;;  %4075 = vmatpush.msra.mxu1 %v331_v44 }
  0xce   : > { %1730 = vmatpush.msra.mxu0 %v330_v8 }
  0xcf   : > { %4076 = vmatpush.msra.mxu1 %v330_v8 }
  0xd0   : > { %1731 = vmatpush.msra.mxu0 %v329_v30 }
  0xd1   : > { %4402 = vrot.lane.b32.xlu0 %v5502_v16, %s5151_s10  ;;  %4077 = vmatpush.msra.mxu1 %v329_v30  ;;  %v5749_v44 = vpop.permute.xlu0 %4207  ;;  %v557_v30 = vld [vmem:[#allocation2 + $0x18a] sm:$0xff] }
  0xd2   : > { %4407 = vrot.lane.b32.xlu1 %v5512_v24, %s5151_s10  ;;  %7724 = vst [vmem:[#allocation38_spill] sm:$0xff] %v5749_v44  ;;  %v556_v24 = vld [vmem:[#allocation2 + $0x182] sm:$0xff] }
  0xd3   : > { %4412 = vrot.lane.b32.xlu2 %v5518_v31, %s5151_s10  ;;  %v5745_v60 = vpop.permute.xlu1 %4197 }
  0xd5   : > { %v5743_v16 = vpop.permute.xlu2 %4247 }
  0xd9   : > { %4417 = vrot.lane.b32.xlu0 %v5514_v29, %s5151_s10 }
  0xda   : > { %4422 = vrot.lane.b32.xlu1 %v5524_v39, %s5151_s10 }
  0xdb   : > { %4427 = vrot.lane.b32.xlu2 %v5530_v49, %s5151_s10  ;;  %v4213_v8 = vpop.permute.xlu1 %4212  ;;  %v4446_v49 = vpack.i.bf16 %v557_v30, %v556_v24  ;;  %v1423_v24 = vsel %vm255_vm0, %v366_v1, %v4134_v9  ;;  %v367_v1 = vld [vmem:[#allocation2 + $0x8] sm:$0xff] }
  0xdc   : > { %v4215_v12 = vunpack.i.h.bf16 %v4213_v8 }
  0xdd   : > { %v5755_v31 = vpop.permute.xlu2 %4262 }
  0xe1   : > { %4432 = vrot.lane.b32.xlu0 %v5526_v46, %s5151_s10  ;;  %v4214_v46 = vunpack.i.l.bf16 %v4213_v8 }
  0xe2   : > { %4437 = vrot.lane.b32.xlu1 %v5540_v62, %s5151_s10 }
  0xe3   : > { %v5759_v11 = vpop.permute.xlu0 %4222  ;;  %4442 = vrot.lane.b32.xlu2 %v5546_v14, %s5151_s10 }
  0xe4   : > { %v5767_v39 = vpop.permute.xlu1 %4227 }
  0xe5   : > { %v5765_v29 = vpop.permute.xlu2 %4277 }
  0xe9   : > { %4447 = vrot.lane.b32.xlu0 %v4446_v49, %s5151_s10  ;;  %v1456_v49 = vsel %vm1455_vm3, %v1423_v24, %v4214_v46 }
  0xea   : > { %4452 = vrot.lane.b32.xlu1 %v5560_v28, %s5152_s11 }
  0xeb   : > { %v5771_v2 = vpop.permute.xlu0 %4237  ;;  %4457 = vrot.lane.b32.xlu2 %v5579_v43, %s5152_s11  ;;  %v4135_v43 = vunpack.i.h.bf16 %v5631_v40 }
  0xec   : > { %v5778_v30 = vpop.permute.xlu1 %4242 }
  0xed   : > { %v4293_v62 = vpop.permute.xlu2 %4292 }
  0xee   : > { %v4294_v14 = vunpack.i.l.bf16 %v4293_v62  ;;  %v4295_v9 = vunpack.i.h.bf16 %v4293_v62 }
  0xf0   : > { %v1489_v13 = vsel %vm1488_vm2, %v1456_v49, %v4294_v14  ;;  %v1424_v14 = vsel %vm255_vm0, %v367_v1, %v4135_v43  ;;  %v591_v49 = vld [vmem:[#allocation2 + $0x31] sm:$0xff]  ;;  %v592_v43 = vld [vmem:[#allocation2 + $0x39] sm:$0xff] }
  0xf1   : > { %4462 = vrot.lane.b32.xlu0 %v5573_v38, %s5152_s11  ;;  %1732 = vmatmul.f32.vlgmr.msra.gmra.mxu0 %v1489_v13  ;;  %v1457_v13 = vsel %vm1455_vm3, %v1424_v14, %v4215_v12  ;;  %v359_v1 = vld [vmem:[%s7650_s1 + $0xf0] sm:$0xff] }
  0xf2   : > { %4467 = vrot.lane.b32.xlu1 %v5587_v10, %s5152_s11  ;;  %v1490_v40 = vsel %vm1488_vm2, %v1457_v13, %v4295_v9  ;;  %v590_v13 = vld [vmem:[#allocation2 + $0x1a0] sm:$0xff] }
  0xf3   : > { %v5785_v28 = vpop.permute.xlu0 %4252  ;;  %4472 = vrot.lane.b32.xlu2 %v5593_v26, %s5152_s11 }
  0xf4   : > { %v5794_v24 = vpop.permute.xlu1 %4257 }
  0xf5   : > { %v5791_v46 = vpop.permute.xlu2 %4307 }
  0xf9   : > { %4477 = vrot.lane.b32.xlu0 %v5589_v33, %s5152_s11  ;;  %1735 = vmatmul.f32.gmra.mxu0 %v1490_v40  ;;  %v360_v33 = vld [vmem:[%s7650_s1 + $0xf8] sm:$0xff] }
  0xfa   : > { %4482 = vrot.lane.b32.xlu1 %v5607_v50, %s5152_s11  ;;  %1829 = vmatpush.msrb.mxu1 %v360_v33  ;;  %v4531_v33 = vpack.i.bf16 %v592_v43, %v591_v49  ;;  %v595_v43 = vld [vmem:[#allocation2 + $0x61] sm:$0xff] }
  0xfb   : > { %v5800_v26 = vpop.permute.xlu0 %4267  ;;  %4487 = vrot.lane.b32.xlu2 %v5619_v23, %s5152_s11  ;;  %v4139_v23 = vunpack.i.l.bf16 %v5657_v20 }
  0xfc   : > { %v5808_v10 = vpop.permute.xlu1 %4272  ;;  %1830 = vmatpush.msrb.mxu1 %v359_v1  ;;  %v593_v1 = vld [vmem:[#allocation2 + $0x49] sm:$0xff] }
  0xfd   : > { %v5806_v38 = vpop.permute.xlu2 %4322 }
 0x101   : > { %4492 = vrot.lane.b32.xlu0 %v5613_v0, %s5152_s11  ;;  %v4219_v0 = vunpack.i.l.bf16 %v5698_v53 }
 0x102   : > { %4497 = vrot.lane.b32.xlu1 %v5627_v48, %s5152_s11 }
 0x103   : > { %v5812_v12 = vpop.permute.xlu0 %4282  ;;  %4502 = vrot.lane.b32.xlu2 %v5635_v32, %s5152_s11  ;;  %v1425_v32 = vsel %vm255_vm0, %v5534_v55, %v4139_v23  ;;  %v4140_v55 = vunpack.i.h.bf16 %v5657_v20  ;;  %v4220_v23 = vunpack.i.h.bf16 %v5698_v53  ;;  %v594_v20 = vld [vmem:[#allocation2 + $0x51] sm:$0xff]  ;;  %v358_v53 = vld [vmem:[%s7650_s1 + $0xe8] sm:$0xff] }
 0x104   : > { %v5824_v8 = vpop.permute.xlu1 %4287  ;;  %v1458_v9 = vsel %vm1455_vm3, %v1425_v32, %v4219_v0  ;;  %1831 = vmatpush.msrb.mxu1 %v358_v53 }
 0x105   : > { %v5821_v50 = vpop.permute.xlu2 %4337  ;;  %7725 = vst [vmem:[#allocation39_spill] sm:$0xff] %v5824_v8  ;;  %v1426_v32 = vsel %vm255_vm0, %v5536_v61, %v4140_v55  ;;  %v4536_v61 = vpack.i.bf16 %v594_v20, %v593_v1  ;;  %v596_v55 = vld [vmem:[#allocation2 + $0x69] sm:$0xff]  ;;  %v4174_v20 = vunpack.i.l.bf16 %v5625_v37  ;;  %v4145_v8 = vunpack.i.h.bf16 %v5651_v25 }
 0x109   : > { %4507 = vrot.lane.b32.xlu0 %v5629_v42, %s5152_s11 }
 0x10a   : > { %4512 = vrot.lane.b32.xlu1 %v5646_v35, %s5152_s11 }
 0x10b   : > { %v4298_v62 = vpop.permute.xlu0 %4297  ;;  %4517 = vrot.lane.b32.xlu2 %v5659_v15, %s5152_s11  ;;  %v589_v15 = vld [vmem:[#allocation2 + $0x198] sm:$0xff] }
 0x10c   : > { %v4299_v48 = vunpack.i.l.bf16 %v4298_v62  ;;  %v5843_v40 = vpop.permute.xlu1 %4302  ;;  %v4526_v35 = vpack.i.bf16 %v590_v13, %v589_v15  ;;  %v4300_v0 = vunpack.i.h.bf16 %v4298_v62  ;;  %v4144_v13 = vunpack.i.l.bf16 %v5651_v25 }
 0x10d   : > { %v5839_v42 = vpop.permute.xlu2 %4352  ;;  %v4175_v25 = vunpack.i.h.bf16 %v5625_v37 }
 0x10e   : > { %v1491_v14 = vsel %vm1488_vm2, %v1458_v9, %v4299_v48  ;;  %v5853_v48 = vld [vmem:[#allocation2 + $0x79] sm:$0xff]  ;;  %v5855_v9 = vld [vmem:[#allocation2 + $0x81] sm:$0xff]  ;;  %v1427_v53 = vsel %vm255_vm0, %v5548_v19, %v4144_v13  ;;  %v5891_v19 = vld [vmem:[#allocation2 + $0xa9] sm:$0xff] }
 0x10f   : > { %1738 = vmatmul.f32.gmra.mxu0 %v1491_v14  ;;  %v4546_v15 = vpack.i.bf16 %v5855_v9, %v5853_v48  ;;  %v602_v13 = vld [vmem:[#allocation2 + $0xb1] sm:$0xff] }
 0x111   : > { %4522 = vrot.lane.b32.xlu0 %v5653_v17, %s5152_s11  ;;  %v1459_v17 = vsel %vm1455_vm3, %v1426_v32, %v4220_v23  ;;  %v4541_v23 = vpack.i.bf16 %v596_v55, %v595_v43  ;;  %v5873_v32 = vld [vmem:[#allocation2 + $0x91] sm:$0xff]  ;;  %v4254_v43 = vunpack.i.l.bf16 %v5785_v28 }
 0x112   : > { %4527 = vrot.lane.b32.xlu1 %v4526_v35, %s5152_s11  ;;  %v1492_v49 = vsel %vm1488_vm2, %v1459_v17, %v4300_v0  ;;  %v4304_v35 = vunpack.i.l.bf16 %v5843_v40  ;;  %v600_v0 = vld [vmem:[#allocation2 + $0x99] sm:$0xff]  ;;  %v603_v17 = vld [vmem:[#allocation2 + $0xc1] sm:$0xff] }
 0x113   : > { %v5850_v4 = vpop.permute.xlu0 %4312  ;;  %4532 = vrot.lane.b32.xlu2 %v4531_v33, %s5153_s12  ;;  %v4224_v33 = vunpack.i.l.bf16 %v5759_v11 }
 0x114   : > { %v5865_v14 = vpop.permute.xlu1 %4317 }
 0x115   : > { %v5862_v62 = vpop.permute.xlu2 %4367  ;;  %v1460_v55 = vsel %vm1455_vm3, %v1427_v53, %v4224_v33  ;;  %v4225_v33 = vunpack.i.h.bf16 %v5759_v11  ;;  %v4305_v53 = vunpack.i.h.bf16 %v5843_v40  ;;  %v1428_v11 = vsel %vm255_vm0, %v5550_v21, %v4145_v8  ;;  %v356_v40 = vld [vmem:[%s7650_s1 + $0xd8] sm:$0xff] }
 0x116   : > { %7726 = vst [vmem:[#allocation40_spill] sm:$0xff] %v5862_v62  ;;  %v1493_v7 = vsel %vm1488_vm2, %v1460_v55, %v4304_v35  ;;  %v4556_v35 = vpack.i.bf16 %v602_v13, %v5891_v19  ;;  %v607_v21 = vld [vmem:[#allocation2 + $0xf1] sm:$0xff]  ;;  %v608_v8 = vld [vmem:[#allocation2 + $0xf9] sm:$0xff] }
 0x117   : > { %1741 = vmatmul.f32.gmra.mxu0 %v1492_v49  ;;  %v604_v49 = vld [vmem:[#allocation2 + $0xc9] sm:$0xff] }
 0x118   : > { %v4561_v62 = vpack.i.bf16 %v604_v49, %v603_v17  ;;  %v606_v17 = vld [vmem:[#allocation2 + $0xe1] sm:$0xff] }
 0x119   : > { %4537 = vrot.lane.b32.xlu0 %v4536_v61, %s5153_s12  ;;  %v357_v61 = vld [vmem:[%s7650_s1 + $0xe0] sm:$0xff] }
 0x11a   : > { %4542 = vrot.lane.b32.xlu1 %v4541_v23, %s5153_s12  ;;  %1832 = vmatpush.msrb.mxu1 %v357_v61  ;;  %v1439_v23 = vsel %vm255_vm0, %v5595_v59, %v4174_v20  ;;  %v605_v61 = vld [vmem:[#allocation2 + $0xd9] sm:$0xff]  ;;  %v609_v59 = vld [vmem:[#allocation2 + $0x109] sm:$0xff]  ;;  %v610_v20 = vld [vmem:[#allocation2 + $0x111] sm:$0xff] }
 0x11b   : > { %v5875_v1 = vpop.permute.xlu0 %4327  ;;  %4547 = vrot.lane.b32.xlu2 %v4546_v15, %s5153_s12  ;;  %v4551_v15 = vpack.i.bf16 %v600_v0, %v5873_v32  ;;  %v1472_v0 = vsel %vm1455_vm3, %v1439_v23, %v4254_v43  ;;  %v1461_v43 = vsel %vm1455_vm3, %v1428_v11, %v4225_v33  ;;  %v4576_v23 = vpack.i.bf16 %v610_v20, %v609_v59  ;;  %v615_v59 = vld [vmem:[#allocation2 + $0x151] sm:$0xff]  ;;  %v616_v20 = vld [vmem:[#allocation2 + $0x159] sm:$0xff] }
 0x11c   : > { %v4333_v5 = vpop.permute.xlu1 %4332  ;;  %1833 = vmatpush.msrb.mxu1 %v356_v40  ;;  %v4229_v33 = vunpack.i.l.bf16 %v5767_v39  ;;  %v355_v40 = vld [vmem:[%s7650_s1 + $0xd0] sm:$0xff] }
 0x11d   : > { %v5887_v3 = vpop.permute.xlu2 %4382  ;;  %v4334_v44 = vunpack.i.l.bf16 %v4333_v5  ;;  %v4335_v37 = vunpack.i.h.bf16 %v4333_v5  ;;  %v4571_v5 = vpack.i.bf16 %v608_v8, %v607_v21  ;;  %v613_v21 = vld [vmem:[#allocation2 + $0x139] sm:$0xff]  ;;  %v614_v8 = vld [vmem:[#allocation2 + $0x141] sm:$0xff] }
 0x11e   : > { %1834 = vmatpush.msrb.mxu1 %v355_v40 }
 0x11f   : > { %1744 = vmatmul.f32.gmra.mxu0 %v1493_v7  ;;  %v1505_v7 = vsel %vm1488_vm2, %v1472_v0, %v4334_v44  ;;  %v4255_v44 = vunpack.i.h.bf16 %v5785_v28  ;;  %v4149_v0 = vunpack.i.l.bf16 %v5679_v56  ;;  %v1440_v28 = vsel %vm255_vm0, %v5597_v58, %v4175_v25 }
 0x120   : > { %1780 = vmatmul.f32.vlgmr.msra.gmra.mxu1 %v1505_v7  ;;  %v4179_v58 = vunpack.i.l.bf16 %v5707_v22 }
 0x121   : > { %4552 = vrot.lane.b32.xlu0 %v4551_v15, %s5153_s12  ;;  %v1494_v15 = vsel %vm1488_vm2, %v1461_v43, %v4305_v53  ;;  %v4309_v53 = vunpack.i.l.bf16 %v5791_v46  ;;  %v1429_v25 = vsel %vm255_vm0, %v5567_v34, %v4149_v0  ;;  %v4591_v0 = vpack.i.bf16 %v616_v20, %v615_v59 }
 0x122   : > { %4557 = vrot.lane.b32.xlu1 %v4556_v35, %s5153_s12  ;;  %v1473_v35 = vsel %vm1455_vm3, %v1440_v28, %v4255_v44  ;;  %v4259_v44 = vunpack.i.l.bf16 %v5794_v24  ;;  %v1462_v43 = vsel %vm1455_vm3, %v1429_v25, %v4229_v33  ;;  %v4150_v28 = vunpack.i.h.bf16 %v5679_v56  ;;  %v618_v25 = vld [vmem:[#allocation2 + $0x171] sm:$0xff] }
 0x123   : > { %v5902_v49 = vpop.permute.xlu0 %4342  ;;  %4562 = vrot.lane.b32.xlu2 %v4561_v62, %s5153_s12  ;;  %v4566_v62 = vpack.i.bf16 %v606_v17, %v605_v61  ;;  %v1506_v7 = vsel %vm1488_vm2, %v1473_v35, %v4335_v37  ;;  %v611_v61 = vld [vmem:[#allocation2 + $0x121] sm:$0xff]  ;;  %v612_v17 = vld [vmem:[#allocation2 + $0x129] sm:$0xff]  ;;  %v1495_v34 = vsel %vm1488_vm2, %v1462_v43, %v4309_v53  ;;  %v1441_v35 = vsel %vm255_vm0, %v5609_v54, %v4179_v58 }
 0x124   : > { %v5917_v13 = vpop.permute.xlu1 %4347  ;;  %v4581_v37 = vpack.i.bf16 %v612_v17, %v611_v61  ;;  %v4230_v33 = vunpack.i.h.bf16 %v5767_v39  ;;  %v4310_v53 = vunpack.i.h.bf16 %v5791_v46  ;;  %v617_v17 = vld [vmem:[#allocation2 + $0x169] sm:$0xff]  ;;  %v4180_v54 = vunpack.i.h.bf16 %v5707_v22  ;;  %v621_v39 = vld [vmem:[#allocation2 + $0x199] sm:$0xff]  ;;  %v622_v58 = vld [vmem:[#allocation2 + $0x1a1] sm:$0xff] }
 0x125   : > { %v5914_v55 = vpop.permute.xlu2 %4397  ;;  %v1430_v56 = vsel %vm255_vm0, %v5569_v36, %v4150_v28  ;;  %v354_v46 = vld [vmem:[%s7650_s1 + $0xc8] sm:$0xff]  ;;  %v4260_v59 = vunpack.i.h.bf16 %v5794_v24  ;;  %v4596_v43 = vpack.i.bf16 %v618_v25, %v617_v17  ;;  %v4340_v22 = vunpack.i.h.bf16 %v5821_v50 }
 0x126   : > { %v1463_v20 = vsel %vm1455_vm3, %v1430_v56, %v4230_v33  ;;  %1835 = vmatpush.msrb.mxu1 %v354_v46  ;;  %v4154_v24 = vunpack.i.l.bf16 %v5585_v6  ;;  %v4314_v33 = vunpack.i.l.bf16 %v5850_v4  ;;  %v4264_v17 = vunpack.i.l.bf16 %v5755_v31  ;;  %v386_v56 = vld [vmem:[#allocation2 + $0xf0] sm:$0xff] }
 0x127   : > { %1747 = vmatmul.f32.gmra.mxu0 %v1494_v15  ;;  %v4339_v15 = vunpack.i.l.bf16 %v5821_v50  ;;  %v1496_v36 = vsel %vm1488_vm2, %v1463_v20, %v4310_v53  ;;  %v4184_v53 = vunpack.i.l.bf16 %v5727_v18 }
 0x128   : > { %1783 = vmatmul.f32.gmra.mxu1 %v1506_v7  ;;  %v4586_v7 = vpack.i.bf16 %v614_v8, %v613_v21  ;;  %v4606_v21 = vpack.i.bf16 %v622_v58, %v621_v39  ;;  %v1442_v8 = vsel %vm255_vm0, %v5611_v63, %v4180_v54  ;;  %v4344_v39 = vunpack.i.l.bf16 %v5902_v49 }
 0x129   : > { %4567 = vrot.lane.b32.xlu0 %v4566_v62, %s5153_s12  ;;  %v1475_v28 = vsel %vm1455_vm3, %v1442_v8, %v4260_v59  ;;  %v4155_v59 = vunpack.i.h.bf16 %v5585_v6  ;;  %v1443_v20 = vsel %vm255_vm0, %v386_v56, %v4184_v53  ;;  %v352_v6 = vld [vmem:[%s7650_s1 + $0xb8] sm:$0xff]  ;;  %v4239_v53 = vunpack.i.l.bf16 %v5771_v2 }
 0x12a   : > { %4572 = vrot.lane.b32.xlu1 %v4571_v5, %s5153_s12  ;;  %v1474_v5 = vsel %vm1455_vm3, %v1441_v35, %v4259_v44  ;;  %v374_v35 = vld [vmem:[#allocation2 + $0x60] sm:$0xff] }
 0x12b   : > { %v5927_v11 = vpop.permute.xlu0 %4357  ;;  %4577 = vrot.lane.b32.xlu2 %v4576_v23, %s5153_s12  ;;  %v1507_v61 = vsel %vm1488_vm2, %v1474_v5, %v4339_v15  ;;  %v620_v15 = vld [vmem:[#allocation2 + $0x189] sm:$0xff]  ;;  %v1508_v5 = vsel %vm1488_vm2, %v1475_v28, %v4340_v22  ;;  %v1431_v63 = vsel %vm255_vm0, %v374_v35, %v4154_v24  ;;  %v1476_v22 = vsel %vm1455_vm3, %v1443_v20, %v4264_v17 }
 0x12c   : > { %v5943_v23 = vpop.permute.xlu1 %4362  ;;  %v4185_v24 = vunpack.i.h.bf16 %v5727_v18 }
 0x12d   : > { %v5939_v62 = vpop.permute.xlu2 %4412 }
 0x12f   : > { %1750 = vmatmul.f32.gmra.mxu0 %v1495_v34 }
 0x130   : > { %1786 = vmatmul.f32.gmra.mxu1 %v1507_v61  ;;  %v353_v61 = vld [vmem:[%s7650_s1 + $0xc0] sm:$0xff] }
 0x131   : > { %4582 = vrot.lane.b32.xlu0 %v4581_v37, %s5153_s12  ;;  %v619_v37 = vld [vmem:[#allocation2 + $0x181] sm:$0xff]  ;;  %1836 = vmatpush.msrb.mxu1 %v353_v61  ;;  %v4319_v61 = vunpack.i.l.bf16 %v5865_v14 }
 0x132   : > { %4587 = vrot.lane.b32.xlu1 %v4586_v7, %s5153_s12  ;;  %v4601_v50 = vpack.i.bf16 %v620_v15, %v619_v37  ;;  %v4315_v37 = vunpack.i.h.bf16 %v5850_v4  ;;  %v1509_v15 = vsel %vm1488_vm2, %v1476_v22, %v4344_v39  ;;  %v387_v4 = vld [vmem:[#allocation2 + $0xf8] sm:$0xff]  ;;  %v351_v39 = vld [vmem:[%s7650_s1 + $0xb0] sm:$0xff]  ;;  %v4349_v22 = vunpack.i.l.bf16 %v5917_v13 }
 0x133   : > { %v5953_v40 = vpop.permute.xlu0 %4372  ;;  %4592 = vrot.lane.b32.xlu2 %v4591_v0, %s5153_s12  ;;  %v4234_v0 = vunpack.i.l.bf16 %v5722_v41  ;;  %1837 = vmatpush.msrb.mxu1 %v352_v6 }
 0x134   : > { %v5969_v34 = vpop.permute.xlu1 %4377 }
 0x135   : > { %v5965_v44 = vpop.permute.xlu2 %4427  ;;  %v1464_v25 = vsel %vm1455_vm3, %v1431_v63, %v4234_v0  ;;  %v376_v63 = vld [vmem:[#allocation2 + $0x78] sm:$0xff]  ;;  %1838 = vmatpush.msrb.mxu1 %v351_v39 }
 0x136   : > { %v1497_v58 = vsel %vm1488_vm2, %v1464_v25, %v4314_v33  ;;  %v4159_v33 = vunpack.i.l.bf16 %v5603_v45 }
 0x137   : > { %1753 = vmatmul.f32.gmra.mxu0 %v1496_v36  ;;  %v375_v36 = vld [vmem:[#allocation2 + $0x68] sm:$0xff] }
 0x138   : > { %1789 = vmatmul.f32.gmra.mxu1 %v1508_v5  ;;  %v1432_v8 = vsel %vm255_vm0, %v375_v36, %v4155_v59  ;;  %v1444_v5 = vsel %vm255_vm0, %v387_v4, %v4185_v24  ;;  %v1433_v56 = vsel %vm255_vm0, %v376_v63, %v4159_v33  ;;  %v377_v4 = vld [vmem:[#allocation2 + $0x80] sm:$0xff] }
 0x139   : > { %4597 = vrot.lane.b32.xlu0 %v4596_v43, %s5153_s12  ;;  %v4235_v43 = vunpack.i.h.bf16 %v5722_v41  ;;  %v4265_v41 = vunpack.i.h.bf16 %v5755_v31  ;;  %v1466_v59 = vsel %vm1455_vm3, %v1433_v56, %v4239_v53 }
 0x13a   : > { %4602 = vrot.lane.b32.xlu1 %v4601_v50, %s5153_s12  ;;  %v4345_v50 = vunpack.i.h.bf16 %v5902_v49  ;;  %v4189_v49 = vunpack.i.l.bf16 %v5644_v47  ;;  %v1499_v36 = vsel %vm1488_vm2, %v1466_v59, %v4319_v61  ;;  %v4164_v59 = vunpack.i.l.bf16 %v5683_v51 }
 0x13b   : > { %v5979_v7 = vpop.permute.xlu0 %4387  ;;  %4607 = vrot.lane.b32.xlu2 %v4606_v21, %s5153_s12  ;;  %v1465_v0 = vsel %vm1455_vm3, %v1432_v8, %v4235_v43  ;;  %v1477_v31 = vsel %vm1455_vm3, %v1444_v5, %v4265_v41  ;;  %v388_v43 = vld [vmem:[#allocation2 + $0x108] sm:$0xff]  ;;  %v4240_v8 = vunpack.i.h.bf16 %v5771_v2 }
 0x13c   : > { %v5994_v46 = vpop.permute.xlu1 %4392  ;;  %v1498_v35 = vsel %vm1488_vm2, %v1465_v0, %v4315_v37  ;;  %v1510_v17 = vsel %vm1488_vm2, %v1477_v31, %v4345_v50  ;;  %v1445_v24 = vsel %vm255_vm0, %v388_v43, %v4189_v49  ;;  %v4320_v50 = vunpack.i.h.bf16 %v5865_v14  ;;  %v389_v14 = vld [vmem:[#allocation2 + $0x110] sm:$0xff] }
 0x13d   : > { %v5990_v54 = vpop.permute.xlu2 %4442  ;;  %v4395_v6 = vunpack.i.h.bf16 %v5994_v46  ;;  %v4394_v41 = vunpack.i.l.bf16 %v5994_v46  ;;  %v350_v46 = vld [vmem:[%s7650_s1 + $0xa8] sm:$0xff]  ;;  %v4270_v31 = vunpack.i.h.bf16 %v5800_v26 }
 0x13e   : > { %1839 = vmatpush.msrb.mxu1 %v350_v46  ;;  %v4354_v46 = vunpack.i.l.bf16 %v5839_v42 }
 0x13f   : > { %1756 = vmatmul.f32.gmra.mxu0 %v1497_v58  ;;  %v4269_v58 = vunpack.i.l.bf16 %v5800_v26  ;;  %v1529_v61 = vsel %vm255_vm0, %v5853_v48, %v4394_v41  ;;  %v4194_v41 = vunpack.i.l.bf16 %v5731_v52 }
 0x140   : > { %1792 = vmatmul.f32.gmra.mxu1 %v1509_v15  ;;  %v4160_v15 = vunpack.i.h.bf16 %v5603_v45  ;;  %v4190_v45 = vunpack.i.h.bf16 %v5644_v47  ;;  %v4350_v47 = vunpack.i.h.bf16 %v5917_v13 }
 0x141   : > { %v1478_v0 = vsel %vm1455_vm3, %v1445_v24, %v4269_v58 }
 0x142   : > { %v1511_v5 = vsel %vm1488_vm2, %v1478_v0, %v4349_v22  ;;  %v1434_v2 = vsel %vm255_vm0, %v377_v4, %v4160_v15  ;;  %v1446_v48 = vsel %vm255_vm0, %v389_v14, %v4190_v45  ;;  %v378_v22 = vld [vmem:[#allocation2 + $0x90] sm:$0xff]  ;;  %v508_v4 = vld [vmem:[#allocation2 + $0xc1] sm:$0xff] }
 0x143   : > { %v6002_v21 = vpop.permute.xlu0 %4402  ;;  %v1467_v63 = vsel %vm1455_vm3, %v1434_v2, %v4240_v8  ;;  %v1479_v43 = vsel %vm1455_vm3, %v1446_v48, %v4270_v31  ;;  %v1435_v0 = vsel %vm255_vm0, %v378_v22, %v4164_v59 }
 0x144   : > { %v6015_v18 = vpop.permute.xlu1 %4407  ;;  %v1500_v49 = vsel %vm1488_vm2, %v1467_v63, %v4320_v50  ;;  %v1512_v8 = vsel %vm1488_vm2, %v1479_v43, %v4350_v47  ;;  %v509_v50 = vld [vmem:[#allocation2 + $0xc9] sm:$0xff] }
 0x145   : > { %v6011_v28 = vpop.permute.xlu2 %4457  ;;  %v4410_v13 = vunpack.i.h.bf16 %v6015_v18 }
 0x147   : > { %1759 = vmatmul.f32.gmra.mxu0 %v1498_v35  ;;  %v1536_v2 = vsel %vm255_vm0, %v509_v50, %v4410_v13  ;;  %v379_v13 = vld [vmem:[#allocation2 + $0x98] sm:$0xff]  ;;  %v4355_v50 = vunpack.i.h.bf16 %v5839_v42 }
 0x148   : > { %1795 = vmatmul.f32.gmra.mxu1 %v1510_v17  ;;  %v1530_v17 = vsel %vm255_vm0, %v5855_v9, %v4395_v6  ;;  %v4244_v9 = vunpack.i.l.bf16 %v5778_v30 }
 0x14b   : > { %v6023_v25 = vpop.permute.xlu0 %4417 }
 0x14c   : > { %v6034_v37 = vpop.permute.xlu1 %4422 }
 0x14d   : > { %v4473_v20 = vpop.permute.xlu2 %4472  ;;  %v4425_v59 = vunpack.i.h.bf16 %v6034_v37  ;;  %v4424_v48 = vunpack.i.l.bf16 %v6034_v37  ;;  %v348_v37 = vld [vmem:[%s7650_s1 + $0x98] sm:$0xff] }
 0x14e   : > { %v4475_v35 = vunpack.i.h.bf16 %v4473_v20  ;;  %v4474_v33 = vunpack.i.l.bf16 %v4473_v20  ;;  %v4409_v20 = vunpack.i.l.bf16 %v6015_v18  ;;  %v349_v18 = vld [vmem:[%s7650_s1 + $0xa0] sm:$0xff] }
 0x14f   : > { %1762 = vmatmul.f32.gmra.mxu0 %v1499_v36  ;;  %v4324_v36 = vunpack.i.l.bf16 %v5806_v38  ;;  %1840 = vmatpush.msrb.mxu1 %v349_v18 }
 0x150   : > { %1798 = vmatmul.f32.gmra.mxu1 %v1511_v5  ;;  %v6060_v39 = vsel %vm1455_vm3, %v1529_v61, %v4474_v33  ;;  %v6063_v26 = vsel %vm1455_vm3, %v1530_v17, %v4475_v35  ;;  %v4274_v35 = vunpack.i.l.bf16 %v5808_v10  ;;  %v1468_v33 = vsel %vm1455_vm3, %v1435_v0, %v4244_v9  ;;  %v390_v5 = vld [vmem:[#allocation2 + $0x120] sm:$0xff]  ;;  %v391_v0 = vld [vmem:[#allocation2 + $0x128] sm:$0xff] }
 0x151   : > { %v1535_v45 = vsel %vm255_vm0, %v508_v4, %v4409_v20  ;;  %v1501_v31 = vsel %vm1488_vm2, %v1468_v33, %v4324_v36  ;;  %v4165_v17 = vunpack.i.h.bf16 %v5683_v51  ;;  %v4325_v20 = vunpack.i.h.bf16 %v5806_v38  ;;  %1841 = vmatpush.msrb.mxu1 %v348_v37  ;;  %v392_v37 = vld [vmem:[#allocation2 + $0x138] sm:$0xff] }
 0x152   : > { %v4195_v51 = vunpack.i.h.bf16 %v5731_v52  ;;  %v4169_v52 = vunpack.i.l.bf16 %v5703_v57  ;;  %v4249_v33 = vunpack.i.l.bf16 %v5743_v16 }
 0x153   : > { %v6044_v53 = vpop.permute.xlu0 %4432 }
 0x154   : > { %v6065_v58 = vpop.permute.xlu1 %4437  ;;  %v1448_v42 = vsel %vm255_vm0, %v391_v0, %v4195_v51  ;;  %v4405_v0 = vunpack.i.h.bf16 %v6002_v21 }
 0x155   : > { %v4488_v56 = vpop.permute.xlu2 %4487 }
 0x156   : > { %v4490_v15 = vunpack.i.h.bf16 %v4488_v56  ;;  %v4489_v24 = vunpack.i.l.bf16 %v4488_v56  ;;  %v4245_v56 = vunpack.i.h.bf16 %v5778_v30  ;;  %v1436_v30 = vsel %vm255_vm0, %v379_v13, %v4165_v17 }
 0x157   : > { %1765 = vmatmul.f32.gmra.mxu0 %v1500_v49  ;;  %v1447_v49 = vsel %vm255_vm0, %v390_v5, %v4194_v41  ;;  %v4275_v41 = vunpack.i.h.bf16 %v5808_v10  ;;  %v380_v10 = vld [vmem:[#allocation2 + $0xa8] sm:$0xff]  ;;  %v4440_v17 = vunpack.i.h.bf16 %v6065_v58 }
 0x158   : > { %1801 = vmatmul.f32.gmra.mxu1 %v1512_v8  ;;  %v6089_v63 = vsel %vm1455_vm3, %v1535_v45, %v4489_v24  ;;  %v6092_v14 = vsel %vm1455_vm3, %v1536_v2, %v4490_v15  ;;  %v1480_v9 = vsel %vm1455_vm3, %v1447_v49, %v4274_v35  ;;  %v514_v24 = vld [vmem:[#allocation2 + $0x109] sm:$0xff]  ;;  %v515_v8 = vld [vmem:[#allocation2 + $0x111] sm:$0xff]  ;;  %v1469_v38 = vsel %vm1455_vm3, %v1436_v30, %v4245_v56  ;;  %v505_v56 = vld [vmem:[#allocation2 + $0x99] sm:$0xff] }
 0x159   : > { %v1513_v43 = vsel %vm1488_vm2, %v1480_v9, %v4354_v46  ;;  %v1541_v18 = vsel %vm255_vm0, %v514_v24, %v4424_v48  ;;  %v1542_v4 = vsel %vm255_vm0, %v515_v8, %v4425_v59  ;;  %v1502_v35 = vsel %vm1488_vm2, %v1469_v38, %v4325_v20  ;;  %v521_v38 = vld [vmem:[#allocation2 + $0x159] sm:$0xff] }
 0x15a   : > { %v4400_v46 = vunpack.i.h.bf16 %v5914_v55  ;;  %v1481_v49 = vsel %vm1455_vm3, %v1448_v42, %v4275_v41  ;;  %v4199_v59 = vunpack.i.l.bf16 %v5745_v60  ;;  %v4329_v48 = vunpack.i.l.bf16 %v5875_v1  ;;  %v520_v41 = vld [vmem:[#allocation2 + $0x151] sm:$0xff] }
 0x15b   : > { %v6075_v6 = vpop.permute.xlu0 %4447  ;;  %v1514_v13 = vsel %vm1488_vm2, %v1481_v49, %v4355_v50  ;;  %v1437_v20 = vsel %vm255_vm0, %v380_v10, %v4169_v52  ;;  %v1548_v50 = vsel %vm255_vm0, %v521_v38, %v4440_v17  ;;  %v4250_v49 = vunpack.i.h.bf16 %v5743_v16 }
 0x15c   : > { %v6094_v61 = vpop.permute.xlu1 %4452  ;;  %v1532_v8 = vsel %vm255_vm0, %v505_v56, %v4400_v46  ;;  %v4170_v46 = vunpack.i.h.bf16 %v5703_v57  ;;  %v1449_v42 = vsel %vm255_vm0, %v392_v37, %v4199_v59  ;;  %v4414_v57 = vunpack.i.l.bf16 %v5939_v62 }
 0x15d   : > { %v4503_v47 = vpop.permute.xlu2 %4502  ;;  %v4280_v37 = vunpack.i.h.bf16 %v5765_v29  ;;  %v4420_v38 = vunpack.i.h.bf16 %v6023_v25 }
 0x15e   : > { %v4505_v22 = vunpack.i.h.bf16 %v4503_v47  ;;  %v4504_v36 = vunpack.i.l.bf16 %v4503_v47  ;;  %v4439_v47 = vunpack.i.l.bf16 %v6065_v58  ;;  %v1470_v58 = vsel %vm1455_vm3, %v1437_v20, %v4249_v33 }
 0x15f   : > { %1768 = vmatmul.f32.gmra.mxu0 %v1501_v31  ;;  %v4399_v31 = vunpack.i.l.bf16 %v5914_v55  ;;  %v4279_v55 = vunpack.i.l.bf16 %v5765_v29  ;;  %v4415_v20 = vunpack.i.h.bf16 %v5939_v62 }
 0x160   : > { %1804 = vmatmul.f32.gmra.mxu1 %v1513_v43  ;;  %v6122_v45 = vsel %vm1455_vm3, %v1541_v18, %v4504_v36  ;;  %v6125_v2 = vsel %vm1455_vm3, %v1542_v4, %v4505_v22  ;;  %v4404_v18 = vunpack.i.l.bf16 %v6002_v21  ;;  %v347_v4 = vld [vmem:[%s7650_s1 + $0x90] sm:$0xff]  ;;  %v1547_v52 = vsel %vm255_vm0, %v520_v41, %v4439_v47  ;;  %v393_v41 = vld [vmem:[#allocation2 + $0x140] sm:$0xff] }
 0x161   : > { %v1531_v24 = vsel %vm255_vm0, %v5873_v32, %v4399_v31  ;;  %v1503_v32 = vsel %vm1488_vm2, %v1470_v58, %v4329_v48  ;;  %1842 = vmatpush.msrb.mxu1 %v347_v4  ;;  %v507_v21 = vld [vmem:[#allocation2 + $0xb1] sm:$0xff] }
 0x162   : > { %v1533_v59 = vsel %vm255_vm0, %v5891_v19, %v4404_v18  ;;  %v346_v18 = vld [vmem:[%s7650_s1 + $0x88] sm:$0xff] }
 0x163   : > { %v6104_v15 = vpop.permute.xlu0 %4462  ;;  %1843 = vmatpush.msrb.mxu1 %v346_v18 }
 0x164   : > { %v6119_v5 = vpop.permute.xlu1 %4467 }
 0x165   : > { %v4518_v9 = vpop.permute.xlu2 %4517 }
 0x166   : > { %v4520_v43 = vunpack.i.h.bf16 %v4518_v9  ;;  %v4519_v22 = vunpack.i.l.bf16 %v4518_v9  ;;  %v1482_v9 = vsel %vm1455_vm3, %v1449_v42, %v4279_v55  ;;  %v510_v55 = vld [vmem:[#allocation2 + $0xd9] sm:$0xff] }
 0x167   : > { %1771 = vmatmul.f32.gmra.mxu0 %v1502_v35  ;;  %v4359_v35 = vunpack.i.l.bf16 %v5927_v11 }
 0x168   : > { %1807 = vmatmul.f32.gmra.mxu1 %v1514_v13  ;;  %v6160_v17 = vsel %vm1455_vm3, %v1547_v52, %v4519_v22  ;;  %v6163_v47 = vsel %vm1455_vm3, %v1548_v50, %v4520_v43  ;;  %v381_v13 = vld [vmem:[#allocation2 + $0xb0] sm:$0xff]  ;;  %v1534_v22 = vsel %vm255_vm0, %v507_v21, %v4405_v0  ;;  %v4419_v0 = vunpack.i.l.bf16 %v6023_v25 }
 0x169   : > { %v1515_v43 = vsel %vm1488_vm2, %v1482_v9, %v4359_v35  ;;  %v1438_v19 = vsel %vm255_vm0, %v381_v13, %v4170_v46  ;;  %v4360_v52 = vunpack.i.h.bf16 %v5927_v11  ;;  %v512_v25 = vld [vmem:[#allocation2 + $0xf1] sm:$0xff] }
 0x16a   : > { %v364_v11 = vld [vmem:[%s7650_s1 + $0x118] sm:$0xff]  ;;  %v1539_v9 = vsel %vm255_vm0, %v512_v25, %v4419_v0  ;;  %v4364_v0 = vunpack.i.l.bf16 %v5943_v23 }
 0x16b   : > { %v4478_v36 = vpop.permute.xlu0 %4477  ;;  %1954 = vmatpush.msra.mxu2 %v364_v11  ;;  %4078 = vmatpush.msra.mxu3 %v364_v11 }
 0x16c   : > { %v4480_v51 = vunpack.i.h.bf16 %v4478_v36  ;;  %v4479_v30 = vunpack.i.l.bf16 %v4478_v36  ;;  %v4483_v31 = vpop.permute.xlu1 %4482  ;;  %v4330_v36 = vunpack.i.h.bf16 %v5875_v1 }
 0x16d   : > { %v4485_v56 = vunpack.i.h.bf16 %v4483_v31  ;;  %v4484_v48 = vunpack.i.l.bf16 %v4483_v31 }
 0x16e   : > { %v6152_v33 = vsel %vm1455_vm3, %v1531_v24, %v4479_v30  ;;  %v6155_v10 = vsel %vm1455_vm3, %v1532_v8, %v4480_v51  ;;  %v511_v51 = vld [vmem:[#allocation2 + $0xe1] sm:$0xff]  ;;  %v4200_v30 = vunpack.i.h.bf16 %v5745_v60  ;;  %v1471_v8 = vsel %vm1455_vm3, %v1438_v19, %v4250_v49  ;;  %v363_v19 = vld [vmem:[%s7650_s1 + $0x110] sm:$0xff] }
 0x16f   : > { %1774 = vmatmul.f32.gmra.mxu0 %v1503_v32  ;;  %v6175_v16 = vsel %vm1455_vm3, %v1533_v59, %v4484_v48  ;;  %v6178_v58 = vsel %vm1455_vm3, %v1534_v22, %v4485_v56  ;;  %v1537_v60 = vsel %vm255_vm0, %v510_v55, %v4414_v57  ;;  %v1538_v4 = vsel %vm255_vm0, %v511_v51, %v4415_v20  ;;  %v513_v32 = vld [vmem:[#allocation2 + $0xf9] sm:$0xff]  ;;  %v516_v22 = vld [vmem:[#allocation2 + $0x121] sm:$0xff] }
 0x170   : > { %1810 = vmatmul.f32.gmra.mxu1 %v1515_v43  ;;  %v1504_v29 = vsel %vm1488_vm2, %v1471_v8, %v4330_v36  ;;  %v1450_v46 = vsel %vm255_vm0, %v393_v41, %v4200_v30  ;;  %v4430_v56 = vunpack.i.h.bf16 %v5965_v44  ;;  %v4429_v48 = vunpack.i.l.bf16 %v5965_v44  ;;  %v517_v36 = vld [vmem:[#allocation2 + $0x129] sm:$0xff]  ;;  %1955 = vmatpush.msra.mxu2 %v363_v19 }
 0x171   : > { %v1483_v49 = vsel %vm1455_vm3, %v1450_v46, %v4280_v37  ;;  %v1540_v13 = vsel %vm255_vm0, %v513_v32, %v4420_v38  ;;  %v4204_v43 = vunpack.i.l.bf16 %v5674_v27  ;;  %v4284_v44 = vunpack.i.l.bf16 %v5812_v12  ;;  %v362_v8 = vld [vmem:[%s7650_s1 + $0x108] sm:$0xff]  ;;  %4079 = vmatpush.msra.mxu3 %v363_v19  ;;  %v623_v32 = vld [vmem:[#allocation2 + $0x32] sm:$0xff] }
 0x172   : > { %v1516_v20 = vsel %vm1488_vm2, %v1483_v49, %v4360_v52  ;;  %v4435_v37 = vunpack.i.h.bf16 %v6044_v53  ;;  %v1543_v41 = vsel %vm255_vm0, %v516_v22, %v4429_v48  ;;  %v1544_v38 = vsel %vm255_vm0, %v517_v36, %v4430_v56  ;;  %v519_v52 = vld [vmem:[#allocation2 + $0x141] sm:$0xff]  ;;  %1956 = vmatpush.msra.mxu2 %v362_v8  ;;  %v523_v22 = vld [vmem:[#allocation2 + $0x171] sm:$0xff] }
 0x173   : > { %v4493_v62 = vpop.permute.xlu0 %4492  ;;  %4080 = vmatpush.msra.mxu3 %v362_v8  ;;  %v4444_v49 = vunpack.i.l.bf16 %v5990_v54  ;;  %v525_v8 = vld [vmem:[#allocation2 + $0x189] sm:$0xff] }
 0x174   : > { %v4495_v24 = vunpack.i.h.bf16 %v4493_v62  ;;  %v4494_v1 = vunpack.i.l.bf16 %v4493_v62  ;;  %v4498_v21 = vpop.permute.xlu1 %4497  ;;  %v394_v62 = vld [vmem:[#allocation2 + $0x150] sm:$0xff]  ;;  %v1546_v56 = vsel %vm255_vm0, %v519_v52, %v4435_v37 }
 0x175   : > { %v4500_v31 = vunpack.i.h.bf16 %v4498_v21  ;;  %v4499_v42 = vunpack.i.l.bf16 %v4498_v21  ;;  %v1451_v25 = vsel %vm255_vm0, %v394_v62, %v4204_v43  ;;  %v4285_v43 = vunpack.i.h.bf16 %v5812_v12  ;;  %v395_v62 = vld [vmem:[#allocation2 + $0x158] sm:$0xff]  ;;  %v524_v12 = vld [vmem:[#allocation2 + $0x181] sm:$0xff] }
 0x176   : > { %v6194_v50 = vsel %vm1455_vm3, %v1537_v60, %v4494_v1  ;;  %v6197_v35 = vsel %vm1455_vm3, %v1538_v4, %v4495_v24  ;;  %v4434_v24 = vunpack.i.l.bf16 %v6044_v53  ;;  %v345_v1 = vld [vmem:[%s7650_s1 + $0x80] sm:$0xff] }
 0x177   : > { %1777 = vmatmul.f32.gmra.mxu0 %v1504_v29  ;;  %v6210_v57 = vsel %vm1455_vm3, %v1539_v9, %v4499_v42  ;;  %v6213_v59 = vsel %vm1455_vm3, %v1540_v13, %v4500_v31  ;;  %1844 = vmatpush.msrb.mxu1 %v345_v1  ;;  %v361_v53 = vld [vmem:[%s7650_s1 + $0x100] sm:$0xff]  ;;  %v1484_v31 = vsel %vm1455_vm3, %v1451_v25, %v4284_v44  ;;  %v4445_v42 = vunpack.i.h.bf16 %v5990_v54 }
 0x178   : > { %1813 = vmatmul.f32.gmra.mxu1 %v1516_v20  ;;  %v518_v4 = vld [vmem:[#allocation2 + $0x139] sm:$0xff]  ;;  %1957 = vmatpush.msra.mxu2 %v361_v53  ;;  %v1517_v48 = vsel %vm1488_vm2, %v1484_v31, %v4364_v0  ;;  %v522_v20 = vld [vmem:[#allocation2 + $0x169] sm:$0xff]  ;;  %v4205_v54 = vunpack.i.h.bf16 %v5674_v27 }
 0x179   : > { %4081 = vmatpush.msra.mxu3 %v361_v53  ;;  %v1545_v11 = vsel %vm255_vm0, %v518_v4, %v4434_v24  ;;  %3991 = vmatmul.msk.f32.vlgmr.msra.gmra.mxu2 %vm255_vm0, %v623_v32  ;;  %v1549_v19 = vsel %vm255_vm0, %v522_v20, %v4444_v49  ;;  %v1550_v37 = vsel %vm255_vm0, %v523_v22, %v4445_v42  ;;  %v4365_v24 = vunpack.i.h.bf16 %v5943_v23  ;;  %v7728_v31 = vld [vmem:[#allocation39_spill] sm:$0xff]  ;;  %v396_v49 = vld [vmem:[#allocation2 + $0x168] sm:$0xff] }
 0x17a   : > { %v4289_v42 = vunpack.i.l.bf16 %v7728_v31 }
 0x17b   : > { %v4508_v55 = vpop.permute.xlu0 %4507 }
 0x17c   : > { %v4510_v51 = vunpack.i.h.bf16 %v4508_v55  ;;  %v4509_v30 = vunpack.i.l.bf16 %v4508_v55  ;;  %v4513_v29 = vpop.permute.xlu1 %4512 }
 0x17d   : > { %v4515_v21 = vunpack.i.h.bf16 %v4513_v29  ;;  %v4514_v46 = vunpack.i.l.bf16 %v4513_v29 }
 0x17e   : > { %v6235_v18 = vsel %vm1455_vm3, %v1543_v41, %v4509_v30  ;;  %v6238_v60 = vsel %vm1455_vm3, %v1544_v38, %v4510_v51  ;;  %v4450_v51 = vunpack.i.h.bf16 %v6075_v6  ;;  %v4449_v30 = vunpack.i.l.bf16 %v6075_v6  ;;  %v624_v38 = vld [vmem:[#allocation2 + $0x3a] sm:$0xff] }
 0x17f   : > { %v6249_v9 = vsel %vm1455_vm3, %v1545_v11, %v4514_v46  ;;  %v6252_v13 = vsel %vm1455_vm3, %v1546_v56, %v4515_v21  ;;  %v1452_v6 = vsel %vm255_vm0, %v395_v62, %v4205_v54  ;;  %v7727_v21 = vld [vmem:[#allocation38_spill] sm:$0xff]  ;;  %v7729_v11 = vld [vmem:[#allocation40_spill] sm:$0xff] }
 0x180   : > { %1816 = vmatmul.f32.gmra.mxu1 %v1517_v48  ;;  %v1485_v4 = vsel %vm1455_vm3, %v1452_v6, %v4285_v43  ;;  %v1551_v52 = vsel %vm255_vm0, %v524_v12, %v4449_v30  ;;  %v1552_v23 = vsel %vm255_vm0, %v525_v8, %v4450_v51  ;;  %v4209_v46 = vunpack.i.l.bf16 %v7727_v21  ;;  %v625_v48 = vld [vmem:[#allocation2 + $0x4a] sm:$0xff]  ;;  %v626_v51 = vld [vmem:[#allocation2 + $0x52] sm:$0xff] }
 0x181   : > { %v1518_v29 = vsel %vm1488_vm2, %v1485_v4, %v4365_v24  ;;  %3992 = vmatmul.msk.f32.gmra.mxu2 %vm255_vm0, %v624_v38  ;;  %v4369_v56 = vunpack.i.l.bf16 %v7729_v11  ;;  %v4210_v54 = vunpack.i.h.bf16 %v7727_v21  ;;  %v4290_v43 = vunpack.i.h.bf16 %v7728_v31  ;;  %v494_v8 = vld [vmem:[#allocation2 + $0x19] sm:$0xff]  ;;  %v627_v38 = vld [vmem:[#allocation2 + $0x62] sm:$0xff] }
 0x182   : > { %v1453_v20 = vsel %vm255_vm0, %v396_v49, %v4209_v46  ;;  %v4374_v24 = vunpack.i.l.bf16 %v5953_v40  ;;  %v4454_v12 = vunpack.i.l.bf16 %v6094_v61  ;;  %v628_v46 = vld [vmem:[#allocation2 + $0x6a] sm:$0xff] }
 0x183   : > { %v4523_v36 = vpop.permute.xlu0 %4522  ;;  %v1486_v22 = vsel %vm1455_vm3, %v1453_v20, %v4289_v42  ;;  %v5078_v20 = vld [vmem:[#allocation2 + $0x31] sm:$0xff] }
 0x184   : > { %v4525_v55 = vunpack.i.h.bf16 %v4523_v36  ;;  %v4524_v44 = vunpack.i.l.bf16 %v4523_v36  ;;  %v4528_v41 = vpop.permute.xlu1 %4527  ;;  %v1519_v36 = vsel %vm1488_vm2, %v1486_v22, %v4369_v56 }
 0x185   : > { %v4530_v0 = vunpack.i.h.bf16 %v4528_v41  ;;  %v4529_v53 = vunpack.i.l.bf16 %v4528_v41 }
 0x186   : > { %v6262_v1 = vsel %vm1455_vm3, %v1549_v19, %v4524_v44  ;;  %v6265_v27 = vsel %vm1455_vm3, %v1550_v37, %v4525_v55  ;;  %v397_v55 = vld [vmem:[#allocation2 + $0x170] sm:$0xff]  ;;  %v4370_v44 = vunpack.i.h.bf16 %v7729_v11  ;;  %v4533_v37 = vpop.permute.xlu2 %4532  ;;  %v4379_v11 = vunpack.i.l.bf16 %v5969_v34 }
 0x187   : > { %v6274_v25 = vsel %vm1455_vm3, %v1551_v52, %v4529_v53  ;;  %v6277_v32 = vsel %vm1455_vm3, %v1552_v23, %v4530_v0  ;;  %v1454_v30 = vsel %vm255_vm0, %v397_v55, %v4210_v54  ;;  %v4534_v41 = vunpack.i.l.bf16 %v4533_v37 }
 0x188   : > { %1819 = vmatmul.f32.gmra.mxu1 %v1518_v29  ;;  %v1487_v62 = vsel %vm1455_vm3, %v1454_v30, %v4290_v43  ;;  %v1521_v53 = vsel %vm255_vm0, %v494_v8, %v4374_v24  ;;  %v4375_v52 = vunpack.i.h.bf16 %v5953_v40  ;;  %v4455_v23 = vunpack.i.h.bf16 %v6094_v61  ;;  %v495_v29 = vld [vmem:[#allocation2 + $0x21] sm:$0xff] }
 0x189   : > { %3993 = vmatmul.msk.f32.gmra.mxu2 %vm255_vm0, %v625_v48  ;;  %v1520_v19 = vsel %vm1488_vm2, %v1487_v62, %v4370_v44  ;;  %v1553_v6 = vsel %vm1455_vm3, %v1521_v53, %v4454_v12  ;;  %v4535_v21 = vunpack.i.h.bf16 %v4533_v37  ;;  %v4459_v40 = vunpack.i.l.bf16 %v6011_v28  ;;  %v5079_v62 = vld [vmem:[#allocation2 + $0x39] sm:$0xff]  ;;  %v630_v37 = vld [vmem:[#allocation2 + $0x82] sm:$0xff] }
 0x18a   : > { %v1585_v4 = vsel %vm1488_vm2, %v1553_v6, %v4534_v41  ;;  %v1522_v42 = vsel %vm255_vm0, %v495_v29, %v4375_v52  ;;  %v1523_v22 = vsel %vm255_vm0, %v5078_v20, %v4379_v11  ;;  %v4380_v55 = vunpack.i.h.bf16 %v5969_v34  ;;  %v631_v53 = vld [vmem:[#allocation2 + $0x92] sm:$0xff] }
 0x18b   : > { %v1554_v49 = vsel %vm1455_vm3, %v1522_v42, %v4455_v23  ;;  %v4538_v48 = vpop.permute.xlu0 %4537  ;;  %v1555_v43 = vsel %vm1455_vm3, %v1523_v22, %v4459_v40  ;;  %v4384_v41 = vunpack.i.l.bf16 %v5887_v3  ;;  %v4389_v22 = vunpack.i.l.bf16 %v5979_v7 }
 0x18c   : > { %v1586_v56 = vsel %vm1488_vm2, %v1554_v49, %v4535_v21  ;;  %v4539_v61 = vunpack.i.l.bf16 %v4538_v48  ;;  %v4540_v30 = vunpack.i.h.bf16 %v4538_v48  ;;  %v4543_v34 = vpop.permute.xlu1 %4542  ;;  %v4385_v21 = vunpack.i.h.bf16 %v5887_v3  ;;  %v632_v49 = vld [vmem:[#allocation2 + $0x9a] sm:$0xff] }
 0x18d   : > { %v4545_v42 = vunpack.i.h.bf16 %v4543_v34  ;;  %v4469_v3 = vunpack.i.l.bf16 %v6119_v5 }
 0x18e   : > { %v1587_v44 = vsel %vm1488_vm2, %v1555_v43, %v4539_v61  ;;  %v4548_v20 = vpop.permute.xlu2 %4547 }
 0x190   : > { %1822 = vmatmul.f32.gmra.mxu1 %v1519_v36  ;;  %v629_v36 = vld [vmem:[#allocation2 + $0x7a] sm:$0xff] }
 0x191   : > { %3994 = vmatmul.msk.f32.gmra.mxu2 %vm255_vm0, %v626_v51  ;;  %v4460_v51 = vunpack.i.h.bf16 %v6011_v28  ;;  %v4544_v28 = vunpack.i.l.bf16 %v4543_v34  ;;  %v5083_v34 = vld [vmem:[#allocation2 + $0x69] sm:$0xff] }
 0x198   : > { %1825 = vmatmul.f32.gmra.mxu1 %v1520_v19  ;;  %v1524_v19 = vsel %vm255_vm0, %v5079_v62, %v4380_v55  ;;  %v5082_v55 = vld [vmem:[#allocation2 + $0x61] sm:$0xff]  ;;  %v4390_v62 = vunpack.i.h.bf16 %v5979_v7 }
 0x199   : > { %3995 = vmatmul.msk.f32.gmra.mxu2 %vm255_vm0, %v627_v38  ;;  %v1556_v12 = vsel %vm1455_vm3, %v1524_v19, %v4460_v51  ;;  %v4464_v38 = vunpack.i.l.bf16 %v6104_v15  ;;  %v4470_v19 = vunpack.i.h.bf16 %v6119_v5 }
 0x19a   : > { %v1588_v8 = vsel %vm1488_vm2, %v1556_v12, %v4540_v30  ;;  %v634_v12 = vld [vmem:[#allocation2 + $0xb2] sm:$0xff] }
 0x19d   : > { %v6295_v0 = vpop.f32.mrf.mxu1 }
 0x1a0   : > { %1845 = vmatmul.f32.vlgmr.msrb.gmra.mxu1 %v1585_v4  ;;  %v5080_v4 = vld [vmem:[#allocation2 + $0x49] sm:$0xff] }
 0x1a1   : > { %3996 = vmatmul.msk.f32.gmra.mxu2 %vm255_vm0, %v628_v46  ;;  %v1525_v52 = vsel %vm255_vm0, %v5080_v4, %v4384_v41  ;;  %v4465_v46 = vunpack.i.h.bf16 %v6104_v15  ;;  %v4549_v15 = vunpack.i.l.bf16 %v4548_v20  ;;  %v1528_v41 = vsel %vm255_vm0, %v5083_v34, %v4390_v62 }
 0x1a2   : > { %v1557_v23 = vsel %vm1455_vm3, %v1525_v52, %v4464_v38  ;;  %v1560_v38 = vsel %vm1455_vm3, %v1528_v41, %v4470_v19  ;;  %v635_v52 = vld [vmem:[#allocation2 + $0xc2] sm:$0xff]  ;;  %v641_v41 = vld [vmem:[#allocation2 + $0x10a] sm:$0xff] }
 0x1a3   : > { %v1589_v29 = vsel %vm1488_vm2, %v1557_v23, %v4544_v28  ;;  %4009 = vmatmul.msk.f32.vlgmr.msra.gmra.mxu3 %vm255_vm0, %v641_v41 }
 0x1a5   : > { %v6303_v31 = vpop.f32.mrf.mxu1 }
 0x1a8   : > { %1848 = vmatmul.f32.gmra.mxu1 %v1586_v56  ;;  %v5081_v56 = vld [vmem:[#allocation2 + $0x51] sm:$0xff] }
 0x1a9   : > { %3997 = vmatmul.msk.f32.gmra.mxu2 %vm255_vm0, %v629_v36  ;;  %v1526_v48 = vsel %vm255_vm0, %v5081_v56, %v4385_v21  ;;  %v633_v36 = vld [vmem:[#allocation2 + $0xaa] sm:$0xff]  ;;  %v637_v56 = vld [vmem:[#allocation2 + $0xda] sm:$0xff] }
 0x1aa   : > { %v1558_v40 = vsel %vm1455_vm3, %v1526_v48, %v4465_v46 }
 0x1ab   : > { %v1590_v61 = vsel %vm1488_vm2, %v1558_v40, %v4545_v42  ;;  %v4558_v42 = vpop.permute.xlu1 %4557 }
 0x1ac   : > { %v4560_v40 = vunpack.i.h.bf16 %v4558_v42 }
 0x1ad   : > { %v6312_v54 = vpop.f32.mrf.mxu1 }
 0x1b0   : > { %1851 = vmatmul.f32.gmra.mxu1 %v1587_v44  ;;  %v1527_v44 = vsel %vm255_vm0, %v5082_v55, %v4389_v22  ;;  %v4563_v22 = vpop.permute.xlu2 %4562 }
 0x1b1   : > { %3998 = vmatmul.msk.f32.gmra.mxu2 %vm255_vm0, %v630_v37  ;;  %v1559_v51 = vsel %vm1455_vm3, %v1527_v44, %v4469_v3  ;;  %v4550_v37 = vunpack.i.h.bf16 %v4548_v20  ;;  %v4564_v3 = vunpack.i.l.bf16 %v4563_v22 }
 0x1b2   : > { %v1591_v30 = vsel %vm1488_vm2, %v1559_v51, %v4549_v15  ;;  %v1733_v15 = vpop.f32.mrf.mxu0  ;;  %v4565_v51 = vunpack.i.h.bf16 %v4563_v22 }
 0x1b3   : > { %v1592_v28 = vsel %vm1488_vm2, %v1560_v38, %v4550_v37 }
 0x1b4   : > { %v1598_v19 = vsel %vm1488_vm2, %v6178_v58, %v4565_v51  ;;  %v6416_v51 = vld [vmem:[%s7652_s3 + $0x118] sm:$0xff] }
 0x1b5   : > { %v6320_v24 = vpop.f32.mrf.mxu1  ;;  %3741 = vmatpush.msrb.mxu0 %v6416_v51 }
 0x1b8   : > { %1854 = vmatmul.f32.gmra.mxu1 %v1588_v8 }
 0x1b9   : > { %3999 = vmatmul.msk.f32.gmra.mxu2 %vm255_vm0, %v631_v53  ;;  %v4553_v53 = vpop.permute.xlu0 %4552 }
 0x1ba   : > { %v4554_v4 = vunpack.i.l.bf16 %v4553_v53  ;;  %v4555_v23 = vunpack.i.h.bf16 %v4553_v53  ;;  %v2221_v53 = vld [vmem:[#allocation2 + $0xa] sm:$0xff] }
 0x1bc   : > { %v1593_v5 = vsel %vm1488_vm2, %v6060_v39, %v4554_v4  ;;  %v1594_v46 = vsel %vm1488_vm2, %v6063_v26, %v4555_v23  ;;  %v1596_v26 = vsel %vm1488_vm2, %v6155_v10, %v4560_v40  ;;  %v1736_v10 = vpop.f32.mrf.mxu0  ;;  %v642_v23 = vld [vmem:[#allocation2 + $0x112] sm:$0xff] }
 0x1bd   : > { %v6327_v6 = vpop.f32.mrf.mxu1  ;;  %4010 = vmatmul.msk.f32.gmra.mxu3 %vm255_vm0, %v642_v23 }
 0x1c0   : > { %1857 = vmatmul.f32.gmra.mxu1 %v1589_v29  ;;  %v636_v29 = vld [vmem:[#allocation2 + $0xca] sm:$0xff] }
 0x1c1   : > { %4000 = vmatmul.msk.f32.gmra.mxu2 %vm255_vm0, %v632_v49  ;;  %v4559_v49 = vunpack.i.l.bf16 %v4558_v42  ;;  %v4568_v37 = vpop.permute.xlu0 %4567 }
 0x1c2   : > { %v4569_v34 = vunpack.i.l.bf16 %v4568_v37 }
 0x1c3   : > { %v1595_v39 = vsel %vm1488_vm2, %v6152_v33, %v4559_v49  ;;  %v1597_v33 = vsel %vm1488_vm2, %v6175_v16, %v4564_v3  ;;  %v2189_v49 = vld [vmem:[#allocation2 + $0x9] sm:$0xff] }
 0x1c4   : > { %v1739_v38 = vpop.f32.mrf.mxu0  ;;  %v1599_v4 = vsel %vm1488_vm2, %v6089_v63, %v4569_v34 }
 0x1c5   : > { %v6335_v11 = vpop.f32.mrf.mxu1 }
 0x1c8   : > { %1860 = vmatmul.f32.gmra.mxu1 %v1590_v61  ;;  %v638_v61 = vld [vmem:[#allocation2 + $0xe2] sm:$0xff] }
 0x1c9   : > { %4001 = vmatmul.msk.f32.gmra.mxu2 %vm255_vm0, %v633_v36  ;;  %v639_v36 = vld [vmem:[#allocation2 + $0xf2] sm:$0xff] }
 0x1cc   : > { %v1742_v40 = vpop.f32.mrf.mxu0 }
 0x1cd   : > { %v6343_v43 = vpop.f32.mrf.mxu1 }
 0x1d0   : > { %1863 = vmatmul.f32.gmra.mxu1 %v1591_v30  ;;  %v640_v30 = vld [vmem:[#allocation2 + $0xfa] sm:$0xff] }
 0x1d1   : > { %4002 = vmatmul.msk.f32.gmra.mxu2 %vm255_vm0, %v634_v12 }
 0x1d4   : > { %v6429_v34 = vpop.f32.mrf.mxu0 }
 0x1d5   : > { %v6351_v8 = vpop.f32.mrf.mxu1 }
 0x1d8   : > { %1866 = vmatmul.f32.gmra.mxu1 %v1592_v28  ;;  %v2220_v28 = vld [vmem:[#allocation2 + $0x2] sm:$0xff] }
 0x1d9   : > { %4003 = vmatmul.msk.f32.gmra.mxu2 %vm255_vm0, %v635_v52  ;;  %v4616_v52 = vpack.i.bf16 %v2221_v53, %v2220_v28 }
 0x1db   : > { %4617 = vrot.lane.b32.xlu1 %v4616_v52, %s5152_s11  ;;  %v644_v52 = vld [vmem:[#allocation2 + $0x12a] sm:$0xff] }
 0x1dd   : > { %v6357_v7 = vpop.f32.mrf.mxu1 }
 0x1e0   : > { %1869 = vmatmul.f32.gmra.mxu1 %v1593_v5  ;;  %v4570_v5 = vunpack.i.h.bf16 %v4568_v37  ;;  %v6427_v37 = vld [vmem:[%s7652_s3 + $0x110] sm:$0xff] }
 0x1e1   : > { %4004 = vmatmul.msk.f32.gmra.mxu2 %vm255_vm0, %v636_v29  ;;  %v2150_v29 = vld [vmem:[%s7652_s3 + $0xf8] sm:$0xff]  ;;  %3742 = vmatpush.msrb.mxu0 %v6427_v37 }
 0x1e2   : > { %3616 = vmatpush.msrb.mxu2 %v2150_v29 }
 0x1e5   : > { %v6362_v21 = vpop.f32.mrf.mxu1 }
 0x1e8   : > { %1872 = vmatmul.f32.gmra.mxu1 %v1594_v46  ;;  %v2188_v46 = vld [vmem:[#allocation2 + $0x1] sm:$0xff] }
 0x1e9   : > { %4005 = vmatmul.msk.f32.gmra.mxu2 %vm255_vm0, %v637_v56  ;;  %v4611_v63 = vpack.i.bf16 %v2189_v49, %v2188_v46  ;;  %v1600_v56 = vsel %vm1488_vm2, %v6092_v14, %v4570_v5 }
 0x1eb   : > { %4612 = vrot.lane.b32.xlu0 %v4611_v63, %s5151_s10 }
 0x1ed   : > { %v6367_v48 = vpop.f32.mrf.mxu1 }
 0x1f0   : > { %1875 = vmatmul.f32.gmra.mxu1 %v1595_v39  ;;  %v6406_v39 = vld [vmem:[%s7651_s2] ss:$0 sm:$0xff] }
 0x1f1   : > { %4006 = vmatmul.msk.f32.gmra.mxu2 %vm255_vm0, %v638_v61  ;;  %v4573_v61 = vpop.permute.xlu1 %4572  ;;  %v1734_v3 = vadd.f32 %v6406_v39, %v1733_v15 }
 0x1f2   : > { %v4574_v22 = vunpack.i.l.bf16 %v4573_v61  ;;  %v4575_v28 = vunpack.i.h.bf16 %v4573_v61  ;;  %v6452_v61 = vpop.f32.mrf.mxu0 }
 0x1f4   : > { %v1602_v29 = vsel %vm1488_vm2, %v6197_v35, %v4575_v28 }
 0x1f5   : > { %v6372_v20 = vpop.f32.mrf.mxu1 }
 0x1f8   : > { %1878 = vmatmul.f32.gmra.mxu1 %v1596_v26 }
 0x1f9   : > { %4007 = vmatmul.msk.f32.gmra.mxu2 %vm255_vm0, %v639_v36  ;;  %v643_v36 = vld [vmem:[#allocation2 + $0x122] sm:$0xff] }
 0x1fa   : > { %4011 = vmatmul.msk.f32.gmra.mxu3 %vm255_vm0, %v643_v36 }
 0x1fc   : > { %v1959_v44 = vpop.f32.mrf.mxu2 }
 0x1fd   : > { %v6377_v55 = vpop.f32.mrf.mxu1 }
 0x200   : > { %1881 = vmatmul.f32.gmra.mxu1 %v1597_v33 }
 0x201   : > { %4008 = vmatmul.msk.f32.gmra.mxu2 %vm255_vm0, %v640_v30  ;;  %v2149_v30 = vld [vmem:[%s7652_s3 + $0xf0] sm:$0xff] }
 0x202   : > { %3617 = vmatpush.msrb.mxu2 %v2149_v30  ;;  %4012 = vmatmul.msk.f32.gmra.mxu3 %vm255_vm0, %v644_v52 }
 0x204   : > { %v1962_v12 = vpop.f32.mrf.mxu2 }
 0x205   : > { %v6382_v62 = vpop.f32.mrf.mxu1 }
 0x208   : > { %1884 = vmatmul.f32.gmra.mxu1 %v1598_v19  ;;  %v1601_v19 = vsel %vm1488_vm2, %v6194_v50, %v4574_v22  ;;  %v6437_v50 = vld [vmem:[%s7652_s3 + $0x108] sm:$0xff] }
 0x209   : > { %3743 = vmatpush.msrb.mxu0 %v6437_v50  ;;  %v2148_v22 = vld [vmem:[%s7652_s3 + $0xe8] sm:$0xff] }
 0x20a   : > { %3618 = vmatpush.msrb.mxu2 %v2148_v22 }
 0x20c   : > { %v6393_v58 = vpop.f32.mrf.mxu2 }
 0x20d   : > { %v6387_v16 = vpop.f32.mrf.mxu1 }
 0x210   : > { %1887 = vmatmul.f32.gmra.mxu1 %v1599_v4  ;;  %v6445_v4 = vld [vmem:[%s7652_s3 + $0x100] sm:$0xff] }
 0x211   : > { %3744 = vmatpush.msrb.mxu0 %v6445_v4 }
 0x214   : > { %v6409_v26 = vpop.f32.mrf.mxu2 }
 0x215   : > { %v6398_v42 = vpop.f32.mrf.mxu1 }
 0x218   : > { %1890 = vmatmul.f32.gmra.mxu1 %v1600_v56  ;;  %v1740_v56 = vadd.f32 %v6406_v39, %v1739_v38 }
 0x21c   : > { %v6432_v53 = vpop.f32.mrf.mxu2 }
 0x21d   : > { %v1846_v33 = vpop.f32.mrf.mxu1 }
 0x21e   : > { %v1847_v14 = vadd.f32 %v1846_v33, %v1734_v3  ;;  %v645_v3 = vld [vmem:[#allocation2 + $0x13a] sm:$0xff] }
 0x21f   : > { %4013 = vmatmul.msk.f32.gmra.mxu3 %vm255_vm0, %v645_v3 }
 0x220   : > { %v1960_v15 = vadd.f32 %v1959_v44, %v1847_v14  ;;  %1893 = vmatmul.f32.gmra.mxu1 %v1601_v19  ;;  %v1737_v44 = vadd.f32 %v6406_v39, %v1736_v10  ;;  %v4578_v10 = vpop.permute.xlu2 %4577 }
 0x221   : > { %v4579_v63 = vunpack.i.l.bf16 %v4578_v10  ;;  %v4580_v19 = vunpack.i.h.bf16 %v4578_v10  ;;  %v6475_v10 = vpop.f32.mrf.mxu0 }
 0x222   : > { %v2055_v41 = vmax.f32 %v1960_v15, 0.0 }
 0x224   : > { %2087 = vst.msk [vmem:[#allocation2 + $0x19] sm:$0xff] %vm255_vm0, %v2055_v41  ;;  %v6458_v33 = vpop.f32.mrf.mxu2 }
 0x225   : > { %v1849_v5 = vpop.f32.mrf.mxu1 }
 0x226   : > { %v1850_v23 = vadd.f32 %v1849_v5, %v1737_v44  ;;  %v1743_v44 = vadd.f32 %v6406_v39, %v1742_v40 }
 0x228   : > { %v1963_v46 = vadd.f32 %v1962_v12, %v1850_v23  ;;  %1896 = vmatmul.f32.gmra.mxu1 %v1602_v29  ;;  %v1603_v12 = vsel %vm1488_vm2, %v6210_v57, %v4579_v63  ;;  %v2134_v57 = vld [vmem:[%s7652_s3 + $0x78] sm:$0xff]  ;;  %v646_v29 = vld [vmem:[#allocation2 + $0x142] sm:$0xff] }
 0x229   : > { %3503 = vmatpush.msrb.mxu3 %v2134_v57 }
 0x22a   : > { %v2056_v49 = vmax.f32 %v1963_v46, 0.0  ;;  %v2133_v46 = vld [vmem:[%s7652_s3 + $0x70] sm:$0xff]  ;;  %4014 = vmatmul.msk.f32.gmra.mxu3 %vm255_vm0, %v646_v29 }
 0x22b   : > { %v6464_v30 = vld [vmem:[#allocation2 + $0x19] sm:$0xff]  ;;  %3504 = vmatpush.msrb.mxu3 %v2133_v46 }
 0x22c   : > { %2088 = vst.msk [vmem:[#allocation2 + $0x21] sm:$0xff] %vm255_vm0, %v2056_v49  ;;  %v1604_v49 = vsel %vm1488_vm2, %v6213_v59, %v4580_v19  ;;  %v6484_v63 = vpop.f32.mrf.mxu2  ;;  %v2146_v59 = vld [vmem:[%s7652_s3 + $0xd8] sm:$0xff] }
 0x22d   : > { %v1852_v36 = vpop.f32.mrf.mxu1  ;;  %v647_v19 = vld [vmem:[#allocation2 + $0x152] sm:$0xff] }
 0x22e   : > { %v1853_v35 = vadd.f32 %v1852_v36, %v1740_v56  ;;  %v4583_v56 = vpop.permute.xlu0 %4582 }
 0x22f   : > { %v4584_v36 = vunpack.i.l.bf16 %v4583_v56 }
 0x230   : > { %v1966_v38 = vadd.f32 %v6393_v58, %v1853_v35  ;;  %1899 = vmatmul.f32.gmra.mxu1 %v1603_v12  ;;  %v2147_v58 = vld [vmem:[%s7652_s3 + $0xe0] sm:$0xff]  ;;  %v2252_v35 = vld [vmem:[#allocation2 + $0x18] sm:$0xff] }
 0x231   : > { %3619 = vmatpush.msrb.mxu2 %v2147_v58 }
 0x232   : > { %v2057_v14 = vmax.f32 %v1966_v38, 0.0  ;;  %v1746_v38 = vadd.f32 %v6406_v39, %v6429_v34  ;;  %v1605_v34 = vsel %vm1488_vm2, %v6122_v45, %v4584_v36  ;;  %4015 = vmatmul.msk.f32.gmra.mxu3 %vm255_vm0, %v647_v19  ;;  %v4588_v36 = vpop.permute.xlu1 %4587 }
 0x233   : > { %v2222_v15 = vld [vmem:[#allocation2 + $0x1a] sm:$0xff]  ;;  %v2223_v41 = vld [vmem:[#allocation2 + $0x22] sm:$0xff]  ;;  %3620 = vmatpush.msrb.mxu2 %v2146_v59  ;;  %v4589_v59 = vunpack.i.l.bf16 %v4588_v36 }
 0x234   : > { %v2191_v28 = vld [vmem:[#allocation2 + $0x21] sm:$0xff]  ;;  %2089 = vst.msk [vmem:[#allocation2 + $0x31] sm:$0xff] %vm255_vm0, %v2057_v14  ;;  %v4626_v52 = vpack.i.bf16 %v2223_v41, %v2222_v15 }
 0x235   : > { %v4621_v5 = vpack.i.bf16 %v2191_v28, %v6464_v30  ;;  %v1855_v23 = vpop.f32.mrf.mxu1  ;;  %v2132_v41 = vld [vmem:[%s7652_s3 + $0x68] sm:$0xff]  ;;  %v1754_v28 = vpop.f32.mrf.mxu0 }
 0x236   : > { %v1856_v40 = vadd.f32 %v1855_v23, %v1743_v44  ;;  %4627 = vrot.lane.b32.xlu2 %v4626_v52, %s5152_s11  ;;  %3505 = vmatpush.msrb.mxu3 %v2132_v41 }
 0x237   : > { %4622 = vrot.lane.b32.xlu1 %v4621_v5, %s5151_s10  ;;  %v6503_v5 = vpop.f32.mrf.mxu2 }
 0x238   : > { %v1969_v22 = vadd.f32 %v6409_v26, %v1856_v40  ;;  %1902 = vmatmul.f32.gmra.mxu1 %v1604_v49  ;;  %v1749_v40 = vadd.f32 %v6406_v39, %v6452_v61  ;;  %v648_v49 = vld [vmem:[#allocation2 + $0x15a] sm:$0xff] }
 0x23a   : > { %v2058_v3 = vmax.f32 %v1969_v22, 0.0  ;;  %4016 = vmatmul.msk.f32.gmra.mxu3 %vm255_vm0, %v648_v49 }
 0x23b   : > { %v2380_v12 = vld [vmem:[#allocation2 + $0x31] sm:$0xff] }
 0x23c   : > { %2090 = vst.msk [vmem:[#allocation2 + $0x39] sm:$0xff] %vm255_vm0, %v2058_v3  ;;  %v4636_v14 = vpack.i.bf16 %v2380_v12, %v2252_v35  ;;  %v2254_v19 = vld [vmem:[#allocation2 + $0x30] sm:$0xff] }
 0x23d   : > { %v1858_v15 = vpop.f32.mrf.mxu1 }
 0x23e   : > { %v1859_v26 = vadd.f32 %v1858_v15, %v1746_v38  ;;  %4637 = vrot.lane.b32.xlu0 %v4636_v14, %s5153_s12 }
 0x23f   : > { %4632 = vrot.lane.b32.xlu1 %v4626_v52, %s5151_s10  ;;  %v4585_v52 = vunpack.i.h.bf16 %v4583_v56  ;;  %v2131_v56 = vld [vmem:[%s7652_s3 + $0x60] sm:$0xff]  ;;  %v6526_v41 = vpop.f32.mrf.mxu2 }
 0x240   : > { %v1972_v44 = vadd.f32 %v6432_v53, %v1859_v26  ;;  %1905 = vmatmul.f32.gmra.mxu1 %v1605_v34  ;;  %v2145_v53 = vld [vmem:[%s7652_s3 + $0xd0] sm:$0xff]  ;;  %3506 = vmatpush.msrb.mxu3 %v2131_v56  ;;  %v2253_v26 = vld [vmem:[#allocation2 + $0x20] sm:$0xff] }
 0x241   : > { %3621 = vmatpush.msrb.mxu2 %v2145_v53  ;;  %v1606_v61 = vsel %vm1488_vm2, %v6125_v2, %v4585_v52  ;;  %v1752_v2 = vadd.f32 %v6406_v39, %v6475_v10  ;;  %v649_v52 = vld [vmem:[#allocation2 + $0x16a] sm:$0xff]  ;;  %v4590_v53 = vunpack.i.h.bf16 %v4588_v36 }
 0x242   : > { %v2059_v57 = vmax.f32 %v1972_v44, 0.0  ;;  %v2130_v44 = vld [vmem:[%s7652_s3 + $0x58] sm:$0xff]  ;;  %4017 = vmatmul.msk.f32.gmra.mxu3 %vm255_vm0, %v649_v52 }
 0x243   : > { %v2412_v58 = vld [vmem:[#allocation2 + $0x32] sm:$0xff]  ;;  %v2225_v23 = vld [vmem:[#allocation2 + $0x3a] sm:$0xff]  ;;  %3507 = vmatpush.msrb.mxu3 %v2130_v44 }
 0x244   : > { %v2193_v29 = vld [vmem:[#allocation2 + $0x39] sm:$0xff]  ;;  %2091 = vst.msk [vmem:[#allocation2 + $0x49] sm:$0xff] %vm255_vm0, %v2059_v57  ;;  %4023 = vmatmul.msk.f32.vlgmr.msrb.gmra.mxu0 %vm255_vm0, %v2412_v58  ;;  %v6509_v45 = vpack.i.bf16 %v2225_v23, %v2412_v58  ;;  %v2144_v57 = vld [vmem:[%s7652_s3 + $0xc8] sm:$0xff] }
 0x245   : > { %v4641_v46 = vpack.i.bf16 %v2193_v29, %v2380_v12  ;;  %v1861_v22 = vpop.f32.mrf.mxu1  ;;  %v1757_v12 = vpop.f32.mrf.mxu0  ;;  %v6524_v14 = vld [vmem:[#allocation2 + $0x38] sm:$0xff]  ;;  %v4656_v34 = vpack.i.bf16 %v2193_v29, %v2253_v26  ;;  %3622 = vmatpush.msrb.mxu2 %v2144_v57 }
 0x246   : > { %v1862_v3 = vadd.f32 %v1861_v22, %v1749_v40  ;;  %4647 = vrot.lane.b32.xlu0 %v6509_v45, %s5152_s11  ;;  %v4651_v40 = vpack.i.bf16 %v6524_v14, %v2254_v19  ;;  %v4593_v26 = vpop.permute.xlu2 %4592  ;;  %v1758_v57 = vadd.f32 %v6406_v39, %v1757_v12 }
 0x247   : > { %4642 = vrot.lane.b32.xlu2 %v4641_v46, %s5151_s10  ;;  %v4594_v44 = vunpack.i.l.bf16 %v4593_v26 }
 0x248   : > { %v1975_v35 = vadd.f32 %v6458_v33, %v1862_v3  ;;  %1908 = vmatmul.f32.gmra.mxu1 %v1606_v61  ;;  %v1755_v3 = vadd.f32 %v6406_v39, %v1754_v28  ;;  %v2143_v28 = vld [vmem:[%s7652_s3 + $0xc0] sm:$0xff] }
 0x249   : > { %3623 = vmatpush.msrb.mxu2 %v2143_v28  ;;  %v2127_v28 = vld [vmem:[%s7652_s3 + $0x40] sm:$0xff] }
 0x24a   : > { %v2060_v38 = vmax.f32 %v1975_v35, 0.0 }
 0x24b   : > { %v2382_v15 = vld [vmem:[#allocation2 + $0x49] sm:$0xff] }
 0x24c   : > { %2092 = vst.msk [vmem:[#allocation2 + $0x51] sm:$0xff] %vm255_vm0, %v2060_v38  ;;  %4024 = vmatmul.msk.f32.gmra.mxu0 %vm255_vm0, %v2225_v23  ;;  %v4666_v33 = vpack.i.bf16 %v2382_v15, %v2254_v19  ;;  %v1607_v23 = vsel %vm1488_vm2, %v6235_v18, %v4589_v59  ;;  %v2129_v18 = vld [vmem:[%s7652_s3 + $0x50] sm:$0xff]  ;;  %v6552_v19 = vpop.f32.mrf.mxu2  ;;  %v2350_v52 = vld [vmem:[#allocation2 + $0x48] sm:$0xff] }
 0x24d   : > { %v1864_v58 = vpop.f32.mrf.mxu1  ;;  %v1760_v61 = vpop.f32.mrf.mxu0  ;;  %3508 = vmatpush.msrb.mxu3 %v2129_v18 }
 0x24e   : > { %v1865_v10 = vadd.f32 %v1864_v58, %v1752_v2  ;;  %4667 = vrot.lane.b32.xlu1 %v4666_v33, %s5153_s12  ;;  %4657 = vrot.lane.b32.xlu0 %v4656_v34, %s5153_s12 }
 0x24f   : > { %4652 = vrot.lane.b32.xlu2 %v4651_v40, %s5152_s11 }
 0x250   : > { %v1978_v29 = vadd.f32 %v6484_v63, %v1865_v10  ;;  %1911 = vmatmul.f32.gmra.mxu1 %v1607_v23  ;;  %v650_v63 = vld [vmem:[#allocation2 + $0x172] sm:$0xff]  ;;  %v651_v10 = vld [vmem:[#allocation2 + $0x182] sm:$0xff] }
 0x251   : > { %4018 = vmatmul.msk.f32.gmra.mxu3 %vm255_vm0, %v650_v63  ;;  %v1761_v63 = vadd.f32 %v6406_v39, %v1760_v61  ;;  %v2141_v61 = vld [vmem:[%s7652_s3 + $0xb0] sm:$0xff] }
 0x252   : > { %v2061_v46 = vmax.f32 %v1978_v29, 0.0 }
 0x253   : > { %v2414_v49 = vld [vmem:[#allocation2 + $0x4a] sm:$0xff]  ;;  %v2227_v22 = vld [vmem:[#allocation2 + $0x52] sm:$0xff] }
 0x254   : > { %v2195_v56 = vld [vmem:[#allocation2 + $0x51] sm:$0xff]  ;;  %2093 = vst.msk [vmem:[#allocation2 + $0x61] sm:$0xff] %vm255_vm0, %v2061_v46  ;;  %4025 = vmatmul.msk.f32.gmra.mxu0 %vm255_vm0, %v2414_v49  ;;  %v4676_v35 = vpack.i.bf16 %v2227_v22, %v2414_v49  ;;  %v1609_v46 = vsel %vm1488_vm2, %v6249_v9, %v4594_v44 }
 0x255   : > { %v4671_v38 = vpack.i.bf16 %v2195_v56, %v2382_v15  ;;  %v1867_v59 = vpop.f32.mrf.mxu1  ;;  %v1608_v15 = vsel %vm1488_vm2, %v6238_v60, %v4590_v53  ;;  %v6565_v33 = vld [vmem:[#allocation2 + $0x50] sm:$0xff]  ;;  %v4686_v60 = vpack.i.bf16 %v2195_v56, %v6524_v14  ;;  %v1763_v29 = vpop.f32.mrf.mxu0  ;;  %v2142_v14 = vld [vmem:[%s7652_s3 + $0xb8] sm:$0xff]  ;;  %v4595_v56 = vunpack.i.h.bf16 %v4593_v26 }
 0x256   : > { %v1868_v36 = vadd.f32 %v1867_v59, %v1755_v3  ;;  %4677 = vrot.lane.b32.xlu1 %v4676_v35, %s5152_s11  ;;  %v1989_v53 = vpop.f32.mrf.mxu2  ;;  %3624 = vmatpush.msrb.mxu2 %v2142_v14 }
 0x257   : > { %4672 = vrot.lane.b32.xlu0 %v4671_v38, %s5151_s10  ;;  %4662 = vrot.lane.b32.xlu2 %v6509_v45, %s5151_s10  ;;  %v4681_v45 = vpack.i.bf16 %v6565_v33, %v2350_v52  ;;  %v1610_v26 = vsel %vm1488_vm2, %v6252_v13, %v4595_v56 }
 0x258   : > { %v1981_v2 = vadd.f32 %v6503_v5, %v1868_v36  ;;  %1914 = vmatmul.f32.gmra.mxu1 %v1608_v15  ;;  %v2128_v5 = vld [vmem:[%s7652_s3 + $0x48] sm:$0xff]  ;;  %3625 = vmatpush.msrb.mxu2 %v2141_v61 }
 0x259   : > { %3509 = vmatpush.msrb.mxu3 %v2128_v5  ;;  %v2124_v61 = vld [vmem:[%s7652_s3 + $0x28] sm:$0xff] }
 0x25a   : > { %v2062_v34 = vmax.f32 %v1981_v2, 0.0  ;;  %4019 = vmatmul.msk.f32.gmra.mxu3 %vm255_vm0, %v651_v10  ;;  %v4598_v2 = vpop.permute.xlu0 %4597  ;;  %v653_v10 = vld [vmem:[#allocation2 + $0x19a] sm:$0xff] }
 0x25b   : > { %v2384_v58 = vld [vmem:[#allocation2 + $0x61] sm:$0xff]  ;;  %3510 = vmatpush.msrb.mxu3 %v2127_v28  ;;  %v4600_v56 = vunpack.i.h.bf16 %v4598_v2 }
 0x25c   : > { %2094 = vst.msk [vmem:[#allocation2 + $0x69] sm:$0xff] %vm255_vm0, %v2062_v34  ;;  %4026 = vmatmul.msk.f32.gmra.mxu0 %vm255_vm0, %v2227_v22  ;;  %v4696_v40 = vpack.i.bf16 %v2384_v58, %v2350_v52 }
 0x25d   : > { %v1870_v23 = vpop.f32.mrf.mxu1  ;;  %v1766_v34 = vpop.f32.mrf.mxu0 }
 0x25e   : > { %v1871_v12 = vadd.f32 %v1870_v23, %v1758_v57  ;;  %4687 = vrot.lane.b32.xlu1 %v4686_v60, %s5153_s12  ;;  %v2352_v60 = vld [vmem:[#allocation2 + $0x60] sm:$0xff] }
 0x25f   : > { %4682 = vrot.lane.b32.xlu0 %v4681_v45, %s5152_s11  ;;  %4697 = vrot.lane.b32.xlu2 %v4696_v40, %s5153_s12  ;;  %v1764_v40 = vadd.f32 %v6406_v39, %v1763_v29  ;;  %v2125_v29 = vld [vmem:[%s7652_s3 + $0x30] sm:$0xff] }
 0x260   : > { %v1984_v49 = vadd.f32 %v6526_v41, %v1871_v12  ;;  %1917 = vmatmul.f32.gmra.mxu1 %v1609_v46  ;;  %v652_v41 = vld [vmem:[#allocation2 + $0x18a] sm:$0xff] }
 0x262   : > { %v2063_v22 = vmax.f32 %v1984_v49, 0.0  ;;  %4020 = vmatmul.msk.f32.gmra.mxu3 %vm255_vm0, %v652_v41  ;;  %v654_v41 = vld [vmem:[#allocation2 + $0x1a2] sm:$0xff] }
 0x263   : > { %v2416_v3 = vld [vmem:[#allocation2 + $0x62] sm:$0xff]  ;;  %v2229_v18 = vld [vmem:[#allocation2 + $0x6a] sm:$0xff] }
 0x264   : > { %v2197_v38 = vld [vmem:[#allocation2 + $0x69] sm:$0xff]  ;;  %2095 = vst.msk [vmem:[#allocation2 + $0x79] sm:$0xff] %vm255_vm0, %v2063_v22  ;;  %4027 = vmatmul.msk.f32.gmra.mxu0 %vm255_vm0, %v2416_v3  ;;  %v4706_v9 = vpack.i.bf16 %v2229_v18, %v2416_v3 }
 0x265   : > { %v4701_v59 = vpack.i.bf16 %v2197_v38, %v2384_v58  ;;  %v1873_v36 = vpop.f32.mrf.mxu1  ;;  %v6601_v57 = vld [vmem:[#allocation2 + $0x68] sm:$0xff]  ;;  %v4599_v58 = vunpack.i.l.bf16 %v4598_v2  ;;  %v4716_v12 = vpack.i.bf16 %v2197_v38, %v6565_v33  ;;  %v1769_v33 = vpop.f32.mrf.mxu0 }
 0x266   : > { %v1874_v15 = vadd.f32 %v1873_v36, %v1761_v63  ;;  %v4711_v13 = vpack.i.bf16 %v6601_v57, %v2352_v60  ;;  %v4603_v2 = vpop.permute.xlu1 %4602 }
 0x267   : > { %4702 = vrot.lane.b32.xlu1 %v4701_v59, %s5151_s10  ;;  %4692 = vrot.lane.b32.xlu0 %v4676_v35, %s5151_s10  ;;  %v1992_v35 = vpop.f32.mrf.mxu2  ;;  %v1611_v46 = vsel %vm1488_vm2, %v6160_v17, %v4599_v58  ;;  %v1767_v59 = vadd.f32 %v6406_v39, %v1766_v34 }
 0x268   : > { %4707 = vrot.lane.b32.xlu2 %v4706_v9, %s5152_s11  ;;  %v1987_v44 = vadd.f32 %v6552_v19, %v1874_v15  ;;  %1920 = vmatmul.f32.gmra.mxu1 %v1610_v26  ;;  %v2126_v19 = vld [vmem:[%s7652_s3 + $0x38] sm:$0xff]  ;;  %v1612_v26 = vsel %vm1488_vm2, %v6163_v47, %v4600_v56 }
 0x269   : > { %3511 = vmatpush.msrb.mxu3 %v2126_v19 }
 0x26a   : > { %v2064_v52 = vmax.f32 %v1987_v44, 0.0  ;;  %4021 = vmatmul.msk.f32.gmra.mxu3 %vm255_vm0, %v653_v10 }
 0x26b   : > { %v2386_v45 = vld [vmem:[#allocation2 + $0x79] sm:$0xff]  ;;  %3512 = vmatpush.msrb.mxu3 %v2125_v29 }
 0x26c   : > { %2096 = vst.msk [vmem:[#allocation2 + $0x81] sm:$0xff] %vm255_vm0, %v2064_v52  ;;  %4028 = vmatmul.msk.f32.gmra.mxu0 %vm255_vm0, %v2229_v18  ;;  %v4726_v5 = vpack.i.bf16 %v2386_v45, %v2352_v60  ;;  %v2260_v58 = vld [vmem:[#allocation2 + $0x78] sm:$0xff] }
 0x26d   : > { %v1876_v23 = vpop.f32.mrf.mxu1  ;;  %3513 = vmatpush.msrb.mxu3 %v2124_v61 }
 0x26e   : > { %v1877_v14 = vadd.f32 %v1876_v23, %v1764_v40  ;;  %v1772_v40 = vpop.f32.mrf.mxu0 }
 0x26f   : > { %4712 = vrot.lane.b32.xlu1 %v4711_v13, %s5152_s11  ;;  %4727 = vrot.lane.b32.xlu0 %v4726_v5, %s5153_s12  ;;  %v1995_v63 = vpop.f32.mrf.mxu2  ;;  %v2123_v5 = vld [vmem:[%s7652_s3 + $0x20] sm:$0xff]  ;;  %v1773_v56 = vadd.f32 %v6406_v39, %v1772_v40 }
 0x270   : > { %4717 = vrot.lane.b32.xlu2 %v4716_v12, %s5153_s12  ;;  %v1990_v49 = vadd.f32 %v1989_v53, %v1877_v14  ;;  %1923 = vmatmul.f32.gmra.mxu1 %v1611_v46  ;;  %v2140_v53 = vld [vmem:[%s7652_s3 + $0xa8] sm:$0xff]  ;;  %v4605_v46 = vunpack.i.h.bf16 %v4603_v2 }
 0x271   : > { %3626 = vmatpush.msrb.mxu2 %v2140_v53  ;;  %3514 = vmatpush.msrb.mxu3 %v2123_v5 }
 0x272   : > { %v2065_v22 = vmax.f32 %v1990_v49, 0.0  ;;  %4022 = vmatmul.msk.f32.gmra.mxu3 %vm255_vm0, %v654_v41  ;;  %v1614_v53 = vsel %vm1488_vm2, %v6265_v27, %v4605_v46 }
 0x273   : > { %v2418_v3 = vld [vmem:[#allocation2 + $0x7a] sm:$0xff]  ;;  %v2231_v38 = vld [vmem:[#allocation2 + $0x82] sm:$0xff] }
 0x274   : > { %v2199_v18 = vld [vmem:[#allocation2 + $0x81] sm:$0xff]  ;;  %2097 = vst.msk [vmem:[#allocation2 + $0x91] sm:$0xff] %vm255_vm0, %v2065_v22  ;;  %4029 = vmatmul.msk.f32.gmra.mxu0 %vm255_vm0, %v2418_v3  ;;  %v4736_v28 = vpack.i.bf16 %v2231_v38, %v2418_v3 }
 0x275   : > { %v4731_v17 = vpack.i.bf16 %v2199_v18, %v2386_v45  ;;  %v1879_v36 = vpop.f32.mrf.mxu1  ;;  %v6635_v52 = vld [vmem:[#allocation2 + $0x80] sm:$0xff]  ;;  %v1770_v45 = vadd.f32 %v6406_v39, %v1769_v33  ;;  %v4746_v13 = vpack.i.bf16 %v2199_v18, %v6601_v57  ;;  %v2138_v18 = vld [vmem:[%s7652_s3 + $0x98] sm:$0xff] }
 0x276   : > { %v1880_v15 = vadd.f32 %v1879_v36, %v1767_v59  ;;  %v4741_v10 = vpack.i.bf16 %v6635_v52, %v2260_v58  ;;  %v4608_v36 = vpop.permute.xlu2 %4607 }
 0x277   : > { %4722 = vrot.lane.b32.xlu1 %v4706_v9, %s5151_s10  ;;  %4737 = vrot.lane.b32.xlu0 %v4736_v28, %s5152_s11  ;;  %v4604_v9 = vunpack.i.l.bf16 %v4603_v2  ;;  %v1998_v23 = vpop.f32.mrf.mxu2  ;;  %v4609_v2 = vunpack.i.l.bf16 %v4608_v36 }
 0x278   : > { %4732 = vrot.lane.b32.xlu2 %v4731_v17, %s5151_s10  ;;  %v1993_v34 = vadd.f32 %v1992_v35, %v1880_v15  ;;  %1926 = vmatmul.f32.gmra.mxu1 %v1612_v26  ;;  %v2139_v35 = vld [vmem:[%s7652_s3 + $0xa0] sm:$0xff]  ;;  %v1775_v17 = vpop.f32.mrf.mxu0 }
 0x279   : > { %3627 = vmatpush.msrb.mxu2 %v2139_v35  ;;  %v1613_v57 = vsel %vm1488_vm2, %v6262_v1, %v4604_v9  ;;  %v2122_v1 = vld [vmem:[%s7652_s3 + $0x18] sm:$0xff] }
 0x27a   : > { %v2066_v44 = vmax.f32 %v1993_v34, 0.0  ;;  %3515 = vmatpush.msrb.mxu3 %v2122_v1  ;;  %v1776_v34 = vadd.f32 %v6406_v39, %v1775_v17  ;;  %v2135_v1 = vld [vmem:[%s7652_s3 + $0x80] sm:$0xff] }
 0x27b   : > { %v2388_v60 = vld [vmem:[#allocation2 + $0x91] sm:$0xff]  ;;  %3628 = vmatpush.msrb.mxu2 %v2138_v18 }
 0x27c   : > { %2098 = vst.msk [vmem:[#allocation2 + $0x99] sm:$0xff] %vm255_vm0, %v2066_v44  ;;  %4030 = vmatmul.msk.f32.gmra.mxu0 %vm255_vm0, %v2231_v38  ;;  %v4756_v47 = vpack.i.bf16 %v2388_v60, %v2260_v58  ;;  %v2356_v44 = vld [vmem:[#allocation2 + $0x90] sm:$0xff] }
 0x27d   : > { %v1882_v19 = vpop.f32.mrf.mxu1 }
 0x27e   : > { %v1883_v12 = vadd.f32 %v1882_v19, %v1770_v45  ;;  %v2137_v45 = vld [vmem:[%s7652_s3 + $0x90] sm:$0xff] }
 0x27f   : > { %4757 = vrot.lane.b32.xlu1 %v4756_v47, %s5153_s12  ;;  %4747 = vrot.lane.b32.xlu0 %v4746_v13, %s5153_s12  ;;  %v2001_v41 = vpop.f32.mrf.mxu2 }
 0x280   : > { %4742 = vrot.lane.b32.xlu2 %v4741_v10, %s5152_s11  ;;  %v1996_v14 = vadd.f32 %v1995_v63, %v1883_v12  ;;  %1929 = vmatmul.f32.gmra.mxu1 %v1613_v57  ;;  %v1778_v35 = vpop.f32.mrf.mxu0  ;;  %v4610_v10 = vunpack.i.h.bf16 %v4608_v36 }
 0x281   : > { %3629 = vmatpush.msrb.mxu2 %v2137_v45 }
 0x282   : > { %v2067_v29 = vmax.f32 %v1996_v14, 0.0  ;;  %v6685_v14 = vpop.f32.mrf.mxu3  ;;  %v1616_v18 = vsel %vm1488_vm2, %v6277_v32, %v4610_v10  ;;  %v1782_v32 = vadd.f32 %v6406_v39, %v6295_v0 }
 0x283   : > { %v2420_v49 = vld [vmem:[#allocation2 + $0x92] sm:$0xff]  ;;  %v2233_v33 = vld [vmem:[#allocation2 + $0x9a] sm:$0xff] }
 0x284   : > { %v2201_v22 = vld [vmem:[#allocation2 + $0x99] sm:$0xff]  ;;  %2099 = vst.msk [vmem:[#allocation2 + $0xa9] sm:$0xff] %vm255_vm0, %v2067_v29  ;;  %4031 = vmatmul.msk.f32.gmra.mxu0 %vm255_vm0, %v2420_v49  ;;  %v4766_v3 = vpack.i.bf16 %v2233_v33, %v2420_v49  ;;  %v1779_v29 = vadd.f32 %v6406_v39, %v1778_v35 }
 0x285   : > { %v4761_v38 = vpack.i.bf16 %v2201_v22, %v2388_v60  ;;  %v1885_v63 = vpop.f32.mrf.mxu1  ;;  %v6667_v61 = vld [vmem:[#allocation2 + $0x98] sm:$0xff]  ;;  %v2121_v60 = vld [vmem:[%s7652_s3 + $0x10] sm:$0xff] }
 0x286   : > { %v1886_v59 = vadd.f32 %v1885_v63, %v1773_v56  ;;  %v4771_v27 = vpack.i.bf16 %v6667_v61, %v2356_v44  ;;  %3516 = vmatpush.msrb.mxu3 %v2121_v60  ;;  %v2136_v56 = vld [vmem:[%s7652_s3 + $0x88] sm:$0xff] }
 0x287   : > { %4767 = vrot.lane.b32.xlu1 %v4766_v3, %s5152_s11  ;;  %4762 = vrot.lane.b32.xlu0 %v4761_v38, %s5151_s10  ;;  %v2004_v5 = vpop.f32.mrf.mxu2 }
 0x288   : > { %4752 = vrot.lane.b32.xlu2 %v4736_v28, %s5151_s10  ;;  %v1999_v15 = vadd.f32 %v1998_v23, %v1886_v59  ;;  %1932 = vmatmul.f32.gmra.mxu1 %v1614_v53  ;;  %v4776_v28 = vpack.i.bf16 %v2201_v22, %v6635_v52  ;;  %v1615_v52 = vsel %vm1488_vm2, %v6274_v25, %v4609_v2  ;;  %v2120_v25 = vld [vmem:[%s7652_s3 + $0x8] sm:$0xff] }
 0x289   : > { %3517 = vmatpush.msrb.mxu3 %v2120_v25  ;;  %3630 = vmatpush.msrb.mxu2 %v2136_v56 }
 0x28a   : > { %v2068_v26 = vmax.f32 %v1999_v15, 0.0 }
 0x28b   : > { %v2390_v9 = vld [vmem:[#allocation2 + $0xa9] sm:$0xff]  ;;  %3631 = vmatpush.msrb.mxu2 %v2135_v1 }
 0x28c   : > { %2100 = vst.msk [vmem:[#allocation2 + $0xb1] sm:$0xff] %vm255_vm0, %v2068_v26  ;;  %4032 = vmatmul.msk.f32.gmra.mxu0 %vm255_vm0, %v2233_v33  ;;  %v4786_v58 = vpack.i.bf16 %v2390_v9, %v2356_v44  ;;  %v2119_v33 = vld [vmem:[%s7652_s3] sm:$0xff] }
 0x28d   : > { %v1888_v40 = vpop.f32.mrf.mxu1  ;;  %3518 = vmatpush.msrb.mxu3 %v2119_v33 }
 0x28e   : > { %v1889_v47 = vadd.f32 %v1888_v40, %v1776_v34 }
 0x28f   : > { %4777 = vrot.lane.b32.xlu1 %v4776_v28, %s5153_s12  ;;  %4772 = vrot.lane.b32.xlu0 %v4771_v27, %s5152_s11  ;;  %v2007_v36 = vpop.f32.mrf.mxu2 }
 0x290   : > { %4787 = vrot.lane.b32.xlu2 %v4786_v58, %s5153_s12  ;;  %v2002_v13 = vadd.f32 %v2001_v41, %v1889_v47  ;;  %1935 = vmatmul.f32.gmra.mxu1 %v1615_v52  ;;  %v6707_v63 = vpop.permute.xlu2 %4627  ;;  %v6736_v47 = vpop.permute.xlu0 %4612 }
 0x291   : > { %4082 = vmatpush.msra.mxu3 %v6416_v51  ;;  %v6716_v51 = vpop.f32.mrf.mxu3  ;;  %v4614_v10 = vunpack.i.l.bf16 %v6736_v47 }
 0x292   : > { %v2069_v19 = vmax.f32 %v2002_v13, 0.0 }
 0x293   : > { %v2422_v23 = vld [vmem:[#allocation2 + $0xaa] sm:$0xff]  ;;  %v2235_v57 = vld [vmem:[#allocation2 + $0xb2] sm:$0xff]  ;;  %4083 = vmatpush.msra.mxu3 %v6427_v37  ;;  %v6721_v37 = vpop.permute.xlu1 %4617 }
 0x294   : > { %v2203_v12 = vld [vmem:[#allocation2 + $0xb1] sm:$0xff]  ;;  %2101 = vst.msk [vmem:[#allocation2 + $0xc1] sm:$0xff] %vm255_vm0, %v2069_v19  ;;  %4033 = vmatmul.msk.f32.gmra.mxu0 %vm255_vm0, %v2422_v23  ;;  %v4796_v49 = vpack.i.bf16 %v2235_v57, %v2422_v23 }
 0x295   : > { %v4791_v46 = vpack.i.bf16 %v2203_v12, %v2390_v9  ;;  %v1891_v22 = vpop.f32.mrf.mxu1  ;;  %v2359_v17 = vld [vmem:[#allocation2 + $0xb0] sm:$0xff]  ;;  %v4806_v34 = vpack.i.bf16 %v2203_v12, %v6667_v61  ;;  %4084 = vmatpush.msra.mxu3 %v6437_v50  ;;  %v1785_v50 = vadd.f32 %v6406_v39, %v6303_v31 }
 0x296   : > { %v1892_v38 = vadd.f32 %v1891_v22, %v1779_v29  ;;  %v1788_v29 = vadd.f32 %v6406_v39, %v6312_v54  ;;  %v4619_v22 = vunpack.i.l.bf16 %v6721_v37 }
 0x297   : > { %4792 = vrot.lane.b32.xlu1 %v4791_v46, %s5151_s10  ;;  %4782 = vrot.lane.b32.xlu0 %v4766_v3, %s5151_s10  ;;  %v2358_v3 = vld [vmem:[#allocation2 + $0xa8] sm:$0xff]  ;;  %v2010_v40 = vpop.f32.mrf.mxu2 }
 0x298   : > { %4797 = vrot.lane.b32.xlu2 %v4796_v49, %s5152_s11  ;;  %v2005_v59 = vadd.f32 %v2004_v5, %v1892_v38  ;;  %1938 = vmatmul.f32.gmra.mxu1 %v1616_v18  ;;  %v4801_v15 = vpack.i.bf16 %v2359_v17, %v2358_v3 }
 0x299   : > { %4085 = vmatpush.msra.mxu3 %v6445_v4  ;;  %v6739_v52 = vpop.f32.mrf.mxu3 }
 0x29a   : > { %v2070_v53 = vmax.f32 %v2005_v59, 0.0 }
 0x29b   : > { %v2392_v41 = vld [vmem:[#allocation2 + $0xc1] sm:$0xff] }
 0x29c   : > { %2102 = vst.msk [vmem:[#allocation2 + $0xc9] sm:$0xff] %vm255_vm0, %v2070_v53  ;;  %4034 = vmatmul.msk.f32.gmra.mxu0 %vm255_vm0, %v2235_v57  ;;  %v4816_v26 = vpack.i.bf16 %v2392_v41, %v2358_v3  ;;  %v2266_v12 = vld [vmem:[#allocation2 + $0xc0] sm:$0xff] }
 0x29d   : > { %v1894_v2 = vpop.f32.mrf.mxu1 }
 0x29e   : > { %v1895_v44 = vadd.f32 %v1894_v2, %v1782_v32 }
 0x29f   : > { %4802 = vrot.lane.b32.xlu1 %v4801_v15, %s5152_s11  ;;  %4817 = vrot.lane.b32.xlu0 %v4816_v26, %s5153_s12  ;;  %v1791_v15 = vadd.f32 %v6406_v39, %v6320_v24 }
 0x2a0   : > { %4807 = vrot.lane.b32.xlu2 %v4806_v34, %s5153_s12  ;;  %v2008_v0 = vadd.f32 %v2007_v36, %v1895_v44 }
 0x2a1   : > { %v6725_v9 = vpop.permute.xlu2 %4642  ;;  %v6760_v3 = vpop.f32.mrf.mxu3 }
 0x2a2   : > { %v2071_v28 = vmax.f32 %v2008_v0, 0.0 }
 0x2a3   : > { %v6727_v61 = vld [vmem:[#allocation2 + $0xc2] sm:$0xff]  ;;  %v6746_v23 = vld [vmem:[#allocation2 + $0xca] sm:$0xff] }
 0x2a4   : > { %v2393_v27 = vld [vmem:[#allocation2 + $0xc9] sm:$0xff]  ;;  %2103 = vst.msk [vmem:[#allocation2 + $0xd9] sm:$0xff] %vm255_vm0, %v2071_v28  ;;  %4035 = vmatmul.msk.f32.gmra.mxu0 %vm255_vm0, %v6727_v61 }
 0x2a5   : > { %v4831_v58 = vpack.i.bf16 %v2393_v27, %v2359_v17  ;;  %v4821_v60 = vpack.i.bf16 %v2393_v27, %v2392_v41  ;;  %v1897_v45 = vpop.f32.mrf.mxu1  ;;  %v2361_v19 = vld [vmem:[#allocation2 + $0xc8] sm:$0xff] }
 0x2a6   : > { %v1898_v4 = vadd.f32 %v1897_v45, %v1785_v50  ;;  %v4826_v33 = vpack.i.bf16 %v2361_v19, %v2266_v12  ;;  %v4836_v50 = vpack.i.bf16 %v6746_v23, %v6727_v61 }
 0x2a7   : > { %4812 = vrot.lane.b32.xlu1 %v4796_v49, %s5151_s10  ;;  %4832 = vrot.lane.b32.xlu0 %v4831_v58, %s5153_s12  ;;  %v2156_v49 = vld [vmem:[#allocation2] sm:$0xff] }
 0x2a8   : > { %4822 = vrot.lane.b32.xlu2 %v4821_v60, %s5151_s10  ;;  %v2011_v31 = vadd.f32 %v2010_v40, %v1898_v4  ;;  %v3212_v38 = vsel %vm255_vm0, %v2156_v49, %v4614_v10  ;;  %v4615_v10 = vunpack.i.h.bf16 %v6736_v47 }
 0x2a9   : > { %v6741_v13 = vpop.permute.xlu1 %4622  ;;  %v6743_v35 = vpop.permute.xlu2 %4652  ;;  %v3244_v32 = vsel %vm1455_vm3, %v3212_v38, %v4619_v22  ;;  %v2285_v22 = vld [vmem:[#allocation2 + $0x21] sm:$0xff] }
 0x2aa   : > { %v2072_v5 = vmax.f32 %v2011_v31, 0.0  ;;  %v4654_v41 = vunpack.i.l.bf16 %v6743_v35 }
 0x2ab   : > { %v2394_v57 = vld [vmem:[#allocation2 + $0xd9] sm:$0xff] }
 0x2ac   : > { %2104 = vst.msk [vmem:[#allocation2 + $0xe1] sm:$0xff] %vm255_vm0, %v2072_v5  ;;  %4036 = vmatmul.msk.f32.gmra.mxu0 %vm255_vm0, %v6746_v23  ;;  %v4841_v46 = vpack.i.bf16 %v2394_v57, %v2266_v12 }
 0x2ad   : > { %v1900_v25 = vpop.f32.mrf.mxu1 }
 0x2ae   : > { %v1901_v56 = vadd.f32 %v1900_v25, %v1788_v29  ;;  %v4620_v25 = vunpack.i.h.bf16 %v6721_v37 }
 0x2af   : > { %4842 = vrot.lane.b32.xlu1 %v4841_v46, %s5153_s12  ;;  %v6795_v46 = vpop.f32.mrf.mxu3 }
 0x2b0   : > { %4827 = vrot.lane.b32.xlu2 %v4826_v33, %s5152_s11  ;;  %v2014_v54 = vadd.f32 %v6685_v14, %v1901_v56  ;;  %v4638_v1 = vpop.permute.xlu0 %4637 }
 0x2b1   : > { %v4633_v18 = vpop.permute.xlu1 %4632  ;;  %v4639_v17 = vunpack.i.l.bf16 %v4638_v1  ;;  %v6758_v53 = vpop.permute.xlu2 %4662  ;;  %v4640_v26 = vunpack.i.h.bf16 %v4638_v1 }
 0x2b2   : > { %v4634_v59 = vunpack.i.l.bf16 %v4633_v18  ;;  %v2073_v36 = vmax.f32 %v2014_v54, 0.0  ;;  %v4635_v12 = vunpack.i.h.bf16 %v4633_v18  ;;  %v4655_v54 = vunpack.i.h.bf16 %v6743_v35 }
 0x2b3   : > { %v3276_v2 = vsel %vm1488_vm2, %v3244_v32, %v4639_v17  ;;  %v6767_v14 = vld [vmem:[#allocation2 + $0xda] sm:$0xff]  ;;  %v6786_v4 = vld [vmem:[#allocation2 + $0xe2] sm:$0xff]  ;;  %v4624_v35 = vunpack.i.l.bf16 %v6741_v13 }
 0x2b4   : > { %v2395_v34 = vld [vmem:[#allocation2 + $0xe1] sm:$0xff]  ;;  %v3308_v44 = vsel %vm255_vm0, %v6464_v30, %v4634_v59  ;;  %2105 = vst.msk [vmem:[#allocation2 + $0xf1] sm:$0xff] %vm255_vm0, %v2073_v36  ;;  %3519 = vmatmul.f32.vlgmr.msrb.gmra.mxu3 %v3276_v2  ;;  %4037 = vmatmul.msk.f32.gmra.mxu0 %vm255_vm0, %v6767_v14  ;;  %v3309_v38 = vsel %vm255_vm0, %v2285_v22, %v4635_v12 }
 0x2b5   : > { %v4856_v0 = vpack.i.bf16 %v2395_v34, %v2361_v19  ;;  %v4846_v28 = vpack.i.bf16 %v2395_v34, %v2394_v57  ;;  %v3340_v27 = vsel %vm1455_vm3, %v3308_v44, %v4654_v41  ;;  %v1903_v24 = vpop.f32.mrf.mxu1  ;;  %v6788_v31 = vld [vmem:[#allocation2 + $0xe0] sm:$0xff]  ;;  %v1794_v19 = vadd.f32 %v6406_v39, %v6327_v6  ;;  %v2362_v57 = vld [vmem:[#allocation2 + $0xd8] sm:$0xff]  ;;  %v2157_v39 = vld [vmem:[#allocation2 + $0x8] sm:$0xff] }
 0x2b6   : > { %v3372_v58 = vsel %vm1488_vm2, %v3340_v27, %v4640_v26  ;;  %v1904_v60 = vadd.f32 %v1903_v24, %v1791_v15  ;;  %v4851_v49 = vpack.i.bf16 %v6788_v31, %v2362_v57  ;;  %v3213_v56 = vsel %vm255_vm0, %v2157_v39, %v4615_v10  ;;  %v6822_v26 = vld [vmem:[%s7651_s2] ss:$0 sm:$0xff] }
 0x2b7   : > { %4857 = vrot.lane.b32.xlu1 %v4856_v0, %s5153_s12  ;;  %4847 = vrot.lane.b32.xlu0 %v4846_v28, %s5151_s10  ;;  %v3245_v32 = vsel %vm1455_vm3, %v3213_v56, %v4620_v25  ;;  %v3341_v15 = vsel %vm1455_vm3, %v3309_v38, %v4655_v54  ;;  %v1800_v39 = vadd.f32 %v6822_v26, %v6343_v43 }
 0x2b8   : > { %4837 = vrot.lane.b32.xlu2 %v4836_v50, %s5151_s10  ;;  %3632 = vmatmul.f32.vlgmr.msrb.gmra.mxu2 %v3372_v58  ;;  %v2017_v30 = vadd.f32 %v6716_v51, %v1904_v60  ;;  %v6782_v45 = vpop.permute.xlu0 %4647  ;;  %v4861_v51 = vpack.i.bf16 %v6786_v4, %v6767_v14  ;;  %v6838_v58 = vpop.f32.mrf.mxu3 }
 0x2b9   : > { %v6784_v40 = vpop.permute.xlu2 %4697 }
 0x2ba   : > { %v2074_v5 = vmax.f32 %v2017_v30, 0.0  ;;  %v2158_v30 = vld [vmem:[#allocation2 + $0x18] sm:$0xff] }
 0x2bb   : > { %v6793_v29 = vld [vmem:[#allocation2 + $0xf0] sm:$0xff] }
 0x2bc   : > { %2106 = vst.msk [vmem:[#allocation2 + $0xf9] sm:$0xff] %vm255_vm0, %v2074_v5  ;;  %4038 = vmatmul.msk.f32.gmra.mxu0 %vm255_vm0, %v6786_v4  ;;  %v4866_v6 = vpack.i.bf16 %v6793_v29, %v6727_v61  ;;  %v2208_v41 = vld [vmem:[#allocation2 + $0xf1] sm:$0xff] }
 0x2bd   : > { %v1906_v47 = vpop.f32.mrf.mxu1  ;;  %v4871_v24 = vpack.i.bf16 %v2208_v41, %v2362_v57 }
 0x2be   : > { %v1907_v33 = vadd.f32 %v1906_v47, %v1794_v19  ;;  %v3214_v19 = vsel %vm255_vm0, %v2158_v30, %v4624_v35  ;;  %v4625_v47 = vunpack.i.h.bf16 %v6741_v13  ;;  %v4664_v13 = vunpack.i.l.bf16 %v6758_v53 }
 0x2bf   : > { %4862 = vrot.lane.b32.xlu1 %v4861_v51, %s5151_s10  ;;  %4852 = vrot.lane.b32.xlu0 %v4851_v49, %s5152_s11 }
 0x2c0   : > { %4867 = vrot.lane.b32.xlu2 %v4866_v6, %s5152_s11  ;;  %v2020_v61 = vadd.f32 %v6739_v52, %v1907_v33  ;;  %v6813_v18 = vpop.permute.xlu1 %4667  ;;  %v4658_v1 = vpop.permute.xlu0 %4657  ;;  %v1797_v52 = vadd.f32 %v6822_v26, %v6335_v11 }
 0x2c1   : > { %v4660_v37 = vunpack.i.h.bf16 %v4658_v1  ;;  %v4659_v59 = vunpack.i.l.bf16 %v4658_v1  ;;  %v4669_v5 = vunpack.i.l.bf16 %v6813_v18  ;;  %v2159_v1 = vld [vmem:[#allocation2 + $0x20] sm:$0xff] }
 0x2c2   : > { %v6815_v17 = vpop.permute.xlu2 %4707  ;;  %v2075_v36 = vmax.f32 %v2020_v61, 0.0 }
 0x2c3   : > { %v3277_v2 = vsel %vm1488_vm2, %v3245_v32, %v4659_v59  ;;  %v3373_v34 = vsel %vm1488_vm2, %v3341_v15, %v4660_v37  ;;  %v6829_v44 = vld [vmem:[#allocation2 + $0xf2] sm:$0xff]  ;;  %v6874_v37 = vpop.f32.mrf.mxu3  ;;  %v4644_v32 = vunpack.i.l.bf16 %v6725_v9 }
 0x2c4   : > { %v2209_v0 = vld [vmem:[#allocation2 + $0xf9] sm:$0xff]  ;;  %2107 = vst.msk [vmem:[#allocation2 + $0x109] sm:$0xff] %vm255_vm0, %v2075_v36  ;;  %3522 = vmatmul.f32.gmra.mxu3 %v3277_v2  ;;  %3635 = vmatmul.f32.gmra.mxu2 %v3373_v34  ;;  %v1803_v36 = vadd.f32 %v6822_v26, %v6351_v8  ;;  %v2286_v2 = vld [vmem:[#allocation2 + $0x31] sm:$0xff]  ;;  %v4670_v34 = vunpack.i.h.bf16 %v6813_v18  ;;  %v4649_v18 = vunpack.i.l.bf16 %v6782_v45 }
 0x2c5   : > { %v6831_v28 = vld [vmem:[#allocation2 + $0xf8] sm:$0xff]  ;;  %v4876_v27 = vpack.i.bf16 %v2209_v0, %v2208_v41  ;;  %4039 = vmatmul.msk.f32.gmra.mxu0 %vm255_vm0, %v6829_v44  ;;  %v1909_v50 = vpop.f32.mrf.mxu1  ;;  %v4886_v38 = vpack.i.bf16 %v2209_v0, %v6788_v31  ;;  %v4630_v31 = vunpack.i.h.bf16 %v6707_v63 }
 0x2c6   : > { %v4881_v11 = vpack.i.bf16 %v6831_v28, %v6746_v23  ;;  %v1910_v60 = vadd.f32 %v1909_v50, %v1797_v52  ;;  %v4629_v23 = vunpack.i.l.bf16 %v6707_v63  ;;  %v3310_v63 = vsel %vm255_vm0, %v2286_v2, %v4664_v13 }
 0x2c7   : > { %4877 = vrot.lane.b32.xlu1 %v4876_v27, %s5151_s10  ;;  %4872 = vrot.lane.b32.xlu0 %v4871_v24, %s5153_s12 }
 0x2c8   : > { %4882 = vrot.lane.b32.xlu2 %v4881_v11, %s5152_s11  ;;  %v2023_v10 = vadd.f32 %v6760_v3, %v1910_v60  ;;  %v6847_v12 = vpop.permute.xlu1 %4677  ;;  %v3246_v6 = vsel %vm1455_vm3, %v3214_v19, %v4629_v23  ;;  %v6861_v3 = vld [vmem:[#allocation2 + $0xfa] sm:$0xff] }
 0x2c9   : > { %v6849_v57 = vpop.permute.xlu0 %4672  ;;  %v3278_v25 = vsel %vm1488_vm2, %v3246_v6, %v4669_v5  ;;  %v4891_v60 = vpack.i.bf16 %v6861_v3, %v6829_v44  ;;  %v2160_v6 = vld [vmem:[#allocation2 + $0x30] sm:$0xff] }
 0x2ca   : > { %v6851_v51 = vpop.permute.xlu2 %4717  ;;  %v2076_v49 = vmax.f32 %v2023_v10, 0.0 }
 0x2cb   : > { %v6858_v33 = vld [vmem:[#allocation2 + $0x108] sm:$0xff] }
 0x2cc   : > { %v2398_v22 = vld [vmem:[#allocation2 + $0x109] sm:$0xff]  ;;  %2108 = vst.msk [vmem:[#allocation2 + $0x111] sm:$0xff] %vm255_vm0, %v2076_v49  ;;  %3525 = vmatmul.f32.gmra.mxu3 %v3278_v25  ;;  %v4896_v56 = vpack.i.bf16 %v6858_v33, %v6767_v14  ;;  %v3215_v14 = vsel %vm255_vm0, %v2159_v1, %v4625_v47  ;;  %v3216_v47 = vsel %vm255_vm0, %v2160_v6, %v4644_v32  ;;  %v6917_v1 = vpop.f32.mrf.mxu3 }
 0x2cd   : > { %v4901_v54 = vpack.i.bf16 %v2398_v22, %v6793_v29  ;;  %4040 = vmatmul.msk.f32.gmra.mxu0 %vm255_vm0, %v6861_v3  ;;  %v1912_v43 = vpop.f32.mrf.mxu1  ;;  %v3247_v27 = vsel %vm1455_vm3, %v3215_v14, %v4630_v31  ;;  %v1806_v31 = vadd.f32 %v6822_v26, %v6357_v7 }
 0x2ce   : > { %v1913_v61 = vadd.f32 %v1912_v43, %v1800_v39  ;;  %v4699_v39 = vunpack.i.l.bf16 %v6784_v40 }
 0x2cf   : > { %4897 = vrot.lane.b32.xlu1 %v4896_v56, %s5152_s11  ;;  %4887 = vrot.lane.b32.xlu0 %v4886_v38, %s5153_s12 }
 0x2d0   : > { %4902 = vrot.lane.b32.xlu2 %v4901_v54, %s5153_s12  ;;  %v2026_v29 = vadd.f32 %v6795_v46, %v1913_v61  ;;  %v4688_v59 = vpop.permute.xlu1 %4687  ;;  %v4665_v46 = vunpack.i.h.bf16 %v6758_v53  ;;  %v3248_v54 = vsel %vm1455_vm3, %v3216_v47, %v4649_v18 }
 0x2d1   : > { %v4683_v41 = vpop.permute.xlu0 %4682  ;;  %v4689_v15 = vunpack.i.l.bf16 %v4688_v59  ;;  %v4690_v25 = vunpack.i.h.bf16 %v4688_v59 }
 0x2d2   : > { %v4684_v52 = vunpack.i.l.bf16 %v4683_v41  ;;  %v6881_v35 = vpop.permute.xlu2 %4732  ;;  %v2077_v0 = vmax.f32 %v2026_v29, 0.0  ;;  %v4685_v23 = vunpack.i.h.bf16 %v4683_v41 }
 0x2d3   : > { %v3279_v24 = vsel %vm1488_vm2, %v3247_v27, %v4689_v15  ;;  %v6888_v11 = vld [vmem:[#allocation2 + $0x10a] sm:$0xff]  ;;  %v6925_v41 = vld [vmem:[#allocation2 + $0x112] sm:$0xff] }
 0x2d4   : > { %v3342_v8 = vsel %vm1455_vm3, %v3310_v63, %v4684_v52  ;;  %v6891_v50 = vld [vmem:[#allocation2 + $0x110] sm:$0xff]  ;;  %2109 = vst.msk [vmem:[#allocation2 + $0x121] sm:$0xff] %vm255_vm0, %v2077_v0  ;;  %3528 = vmatmul.f32.gmra.mxu3 %v3279_v24  ;;  %v4645_v52 = vunpack.i.h.bf16 %v6725_v9  ;;  %v2037_v6 = vpop.f32.mrf.mxu3 }
 0x2d5   : > { %v2211_v30 = vld [vmem:[#allocation2 + $0x111] sm:$0xff]  ;;  %v3374_v5 = vsel %vm1488_vm2, %v3342_v8, %v4670_v34  ;;  %v4911_v53 = vpack.i.bf16 %v6891_v50, %v6786_v4  ;;  %4041 = vmatmul.msk.f32.gmra.mxu0 %vm255_vm0, %v6888_v11  ;;  %v1915_v10 = vpop.f32.mrf.mxu1  ;;  %v2287_v4 = vld [vmem:[#allocation2 + $0x39] sm:$0xff]  ;;  %v4650_v34 = vunpack.i.h.bf16 %v6782_v45  ;;  %v1809_v45 = vadd.f32 %v6822_v26, %v6362_v21 }
 0x2d6   : > { %v4906_v19 = vpack.i.bf16 %v2211_v30, %v2398_v22  ;;  %3638 = vmatmul.f32.gmra.mxu2 %v3374_v5  ;;  %v1916_v49 = vadd.f32 %v1915_v10, %v1803_v36  ;;  %v3311_v43 = vsel %vm255_vm0, %v2287_v4, %v4665_v46  ;;  %v4916_v2 = vpack.i.bf16 %v2211_v30, %v6831_v28  ;;  %v2161_v46 = vld [vmem:[#allocation2 + $0x38] sm:$0xff] }
 0x2d7   : > { %4912 = vrot.lane.b32.xlu1 %v4911_v53, %s5152_s11  ;;  %4892 = vrot.lane.b32.xlu0 %v4891_v60, %s5151_s10  ;;  %v3343_v61 = vsel %vm1455_vm3, %v3311_v43, %v4685_v23  ;;  %v3217_v8 = vsel %vm255_vm0, %v2161_v46, %v4645_v52  ;;  %v2288_v60 = vld [vmem:[#allocation2 + $0x49] sm:$0xff]  ;;  %v4700_v30 = vunpack.i.h.bf16 %v6784_v40  ;;  %v4674_v53 = vunpack.i.l.bf16 %v6849_v57 }
 0x2d8   : > { %4907 = vrot.lane.b32.xlu2 %v4906_v19, %s5151_s10  ;;  %v2029_v22 = vadd.f32 %v6838_v58, %v1916_v49  ;;  %v3280_v58 = vsel %vm1488_vm2, %v3248_v54, %v4699_v39  ;;  %v3375_v36 = vsel %vm1488_vm2, %v3343_v61, %v4690_v25  ;;  %v3249_v5 = vsel %vm1455_vm3, %v3217_v8, %v4650_v34  ;;  %v2162_v43 = vld [vmem:[#allocation2 + $0x48] sm:$0xff]  ;;  %v2289_v61 = vld [vmem:[#allocation2 + $0x51] sm:$0xff] }
 0x2d9   : > { %v6908_v56 = vpop.permute.xlu1 %4702  ;;  %v6910_v38 = vpop.permute.xlu0 %4692 }
 0x2da   : > { %v6914_v13 = vpop.permute.xlu2 %4742  ;;  %v2078_v14 = vmax.f32 %v2029_v22, 0.0  ;;  %v4694_v0 = vunpack.i.l.bf16 %v6910_v38  ;;  %v4695_v19 = vunpack.i.h.bf16 %v6910_v38  ;;  %v4921_v22 = vpack.i.bf16 %v6925_v41, %v6888_v11 }
 0x2db   : > { %v2400_v29 = vld [vmem:[#allocation2 + $0x121] sm:$0xff]  ;;  %v4679_v38 = vunpack.i.l.bf16 %v6847_v12 }
 0x2dc   : > { %v6922_v59 = vld [vmem:[#allocation2 + $0x120] sm:$0xff]  ;;  %2110 = vst.msk [vmem:[#allocation2 + $0x129] sm:$0xff] %vm255_vm0, %v2078_v14  ;;  %3531 = vmatmul.f32.gmra.mxu3 %v3280_v58  ;;  %v4931_v32 = vpack.i.bf16 %v2400_v29, %v6858_v33  ;;  %v3218_v14 = vsel %vm255_vm0, %v2162_v43, %v4674_v53  ;;  %v2040_v8 = vpop.f32.mrf.mxu3 }
 0x2dd   : > { %v4926_v15 = vpack.i.bf16 %v6922_v59, %v6829_v44  ;;  %4042 = vmatmul.msk.f32.gmra.mxu0 %vm255_vm0, %v6925_v41  ;;  %v1918_v7 = vpop.f32.mrf.mxu1  ;;  %v4719_v44 = vunpack.i.l.bf16 %v6851_v51 }
 0x2de   : > { %3641 = vmatmul.f32.gmra.mxu2 %v3375_v36  ;;  %v1919_v27 = vadd.f32 %v1918_v7, %v1806_v31  ;;  %v3313_v31 = vsel %vm255_vm0, %v2289_v61, %v4695_v19 }
 0x2df   : > { %4932 = vrot.lane.b32.xlu1 %v4931_v32, %s5153_s12  ;;  %4927 = vrot.lane.b32.xlu0 %v4926_v15, %s5152_s11  ;;  %v3281_v23 = vsel %vm1488_vm2, %v3249_v5, %v4719_v44  ;;  %v4720_v15 = vunpack.i.h.bf16 %v6851_v51  ;;  %v4675_v44 = vunpack.i.h.bf16 %v6849_v57  ;;  %v4744_v5 = vunpack.i.l.bf16 %v6914_v13 }
 0x2e0   : > { %4917 = vrot.lane.b32.xlu2 %v4916_v2, %s5153_s12  ;;  %v2032_v9 = vadd.f32 %v6874_v37, %v1919_v27  ;;  %v3312_v37 = vsel %vm255_vm0, %v2288_v60, %v4694_v0  ;;  %v3250_v27 = vsel %vm1455_vm3, %v3218_v14, %v4679_v38  ;;  %v4680_v60 = vunpack.i.h.bf16 %v6847_v12 }
 0x2e1   : > { %v4713_v33 = vpop.permute.xlu1 %4712  ;;  %v6942_v63 = vpop.permute.xlu0 %4727 }
 0x2e2   : > { %v4714_v28 = vunpack.i.l.bf16 %v4713_v33  ;;  %v6946_v24 = vpop.permute.xlu2 %4752  ;;  %v2079_v18 = vmax.f32 %v2032_v9, 0.0  ;;  %v4715_v40 = vunpack.i.h.bf16 %v4713_v33 }
 0x2e3   : > { %v6955_v21 = vld [vmem:[#allocation2 + $0x122] sm:$0xff]  ;;  %v6981_v7 = vld [vmem:[#allocation2 + $0x12a] sm:$0xff] }
 0x2e4   : > { %v3344_v10 = vsel %vm1455_vm3, %v3312_v37, %v4714_v28  ;;  %v2401_v49 = vld [vmem:[#allocation2 + $0x129] sm:$0xff]  ;;  %2111 = vst.msk [vmem:[#allocation2 + $0x139] sm:$0xff] %vm255_vm0, %v2079_v18  ;;  %3534 = vmatmul.f32.gmra.mxu3 %v3281_v23  ;;  %v3345_v32 = vsel %vm1455_vm3, %v3313_v31, %v4715_v40  ;;  %v4951_v46 = vpack.i.bf16 %v6981_v7, %v6955_v21  ;;  %v2290_v28 = vld [vmem:[#allocation2 + $0x61] sm:$0xff] }
 0x2e5   : > { %v3376_v39 = vsel %vm1488_vm2, %v3344_v10, %v4700_v30  ;;  %v4946_v47 = vpack.i.bf16 %v2401_v49, %v6891_v50  ;;  %v4936_v4 = vpack.i.bf16 %v2401_v49, %v2400_v29  ;;  %4043 = vmatmul.msk.f32.gmra.mxu0 %vm255_vm0, %v6955_v21  ;;  %v1921_v25 = vpop.f32.mrf.mxu1  ;;  %v4729_v50 = vunpack.i.l.bf16 %v6942_v63  ;;  %v6983_v2 = vld [vmem:[#allocation2 + $0x128] sm:$0xff]  ;;  %v2163_v18 = vld [vmem:[#allocation2 + $0x50] sm:$0xff] }
 0x2e6   : > { %3644 = vmatmul.f32.gmra.mxu2 %v3376_v39  ;;  %v1922_v54 = vadd.f32 %v1921_v25, %v1809_v45  ;;  %v3377_v51 = vsel %vm1488_vm2, %v3345_v32, %v4720_v15  ;;  %v4941_v45 = vpack.i.bf16 %v6983_v2, %v6861_v3  ;;  %v1815_v40 = vadd.f32 %v6822_v26, %v6372_v20 }
 0x2e7   : > { %4947 = vrot.lane.b32.xlu1 %v4946_v47, %s5153_s12  ;;  %4937 = vrot.lane.b32.xlu0 %v4936_v4, %s5151_s10  ;;  %v3282_v9 = vsel %vm1488_vm2, %v3250_v27, %v4729_v50  ;;  %v4730_v39 = vunpack.i.h.bf16 %v6942_v63  ;;  %v4704_v25 = vunpack.i.l.bf16 %v6908_v56  ;;  %v4745_v27 = vunpack.i.h.bf16 %v6914_v13 }
 0x2e8   : > { %4922 = vrot.lane.b32.xlu2 %v4921_v22, %s5151_s10  ;;  %v2035_v58 = vadd.f32 %v6917_v1, %v1922_v54  ;;  %v1812_v1 = vadd.f32 %v6822_v26, %v6367_v48 }
 0x2e9   : > { %v6973_v29 = vpop.permute.xlu1 %4722  ;;  %v6975_v36 = vpop.permute.xlu0 %4737 }
 0x2ea   : > { %v6979_v52 = vpop.permute.xlu2 %4787  ;;  %v2080_v34 = vmax.f32 %v2035_v58, 0.0  ;;  %v4724_v0 = vunpack.i.l.bf16 %v6973_v29  ;;  %v2291_v58 = vld [vmem:[#allocation2 + $0x69] sm:$0xff] }
 0x2eb   : > { %v6992_v33 = vld [vmem:[#allocation2 + $0x138] sm:$0xff] }
 0x2ec   : > { %2112 = vst.msk [vmem:[#allocation2 + $0x141] sm:$0xff] %vm255_vm0, %v2080_v34  ;;  %3537 = vmatmul.f32.gmra.mxu3 %v3282_v9  ;;  %v4956_v48 = vpack.i.bf16 %v6992_v33, %v6888_v11  ;;  %v3314_v3 = vsel %vm255_vm0, %v2290_v28, %v4724_v0  ;;  %v3219_v11 = vsel %vm255_vm0, %v2163_v18, %v4675_v44  ;;  %v2214_v23 = vld [vmem:[#allocation2 + $0x139] sm:$0xff]  ;;  %v2043_v34 = vpop.f32.mrf.mxu3  ;;  %v4709_v0 = vunpack.i.l.bf16 %v6815_v17  ;;  %v7051_v28 = vpop.f32.mrf.mxu0 }
 0x2ed   : > { %4044 = vmatmul.msk.f32.gmra.mxu0 %vm255_vm0, %v6981_v7  ;;  %v1924_v57 = vpop.f32.mrf.mxu1  ;;  %v3346_v49 = vsel %vm1455_vm3, %v3314_v3, %v4744_v5  ;;  %v3251_v4 = vsel %vm1455_vm3, %v3219_v11, %v4680_v60  ;;  %v4961_v43 = vpack.i.bf16 %v2214_v23, %v6922_v59  ;;  %v2164_v59 = vld [vmem:[#allocation2 + $0x60] sm:$0xff]  ;;  %v4705_v60 = vunpack.i.h.bf16 %v6908_v56 }
 0x2ee   : > { %3647 = vmatmul.f32.gmra.mxu2 %v3377_v51  ;;  %v1925_v30 = vadd.f32 %v1924_v57, %v1812_v1  ;;  %v3378_v20 = vsel %vm1488_vm2, %v3346_v49, %v4730_v39  ;;  %v3220_v15 = vsel %vm255_vm0, %v2164_v59, %v4704_v25  ;;  %v1818_v57 = vadd.f32 %v6822_v26, %v6377_v55 }
 0x2ef   : > { %4952 = vrot.lane.b32.xlu1 %v4951_v46, %s5151_s10  ;;  %4942 = vrot.lane.b32.xlu0 %v4941_v45, %s5152_s11  ;;  %v3252_v45 = vsel %vm1455_vm3, %v3220_v15, %v4709_v0  ;;  %v4734_v39 = vunpack.i.l.bf16 %v6881_v35 }
 0x2f0   : > { %4957 = vrot.lane.b32.xlu2 %v4956_v48, %s5152_s11  ;;  %v2038_v37 = vadd.f32 %v2037_v6, %v1925_v30  ;;  %v4725_v6 = vunpack.i.h.bf16 %v6973_v29 }
 0x2f1   : > { %v7010_v53 = vpop.permute.xlu1 %4757  ;;  %v4748_v19 = vpop.permute.xlu0 %4747 }
 0x2f2   : > { %v4749_v12 = vunpack.i.l.bf16 %v4748_v19  ;;  %v7012_v10 = vpop.permute.xlu2 %4797  ;;  %v2081_v47 = vmax.f32 %v2038_v37, 0.0  ;;  %v4759_v29 = vunpack.i.l.bf16 %v7010_v53  ;;  %v4750_v32 = vunpack.i.h.bf16 %v4748_v19 }
 0x2f3   : > { %v7022_v38 = vld [vmem:[#allocation2 + $0x13a] sm:$0xff]  ;;  %v7059_v3 = vld [vmem:[#allocation2 + $0x142] sm:$0xff]  ;;  %v4754_v37 = vunpack.i.l.bf16 %v6946_v24 }
 0x2f4   : > { %v3283_v22 = vsel %vm1488_vm2, %v3251_v4, %v4749_v12  ;;  %v2215_v54 = vld [vmem:[#allocation2 + $0x141] sm:$0xff]  ;;  %2113 = vst.msk [vmem:[#allocation2 + $0x151] sm:$0xff] %vm255_vm0, %v2081_v47  ;;  %v3284_v13 = vsel %vm1488_vm2, %v3252_v45, %v4759_v29  ;;  %v4981_v59 = vpack.i.bf16 %v7059_v3, %v7022_v38  ;;  %v7095_v15 = vpop.f32.mrf.mxu0 }
 0x2f5   : > { %v7025_v61 = vld [vmem:[#allocation2 + $0x140] sm:$0xff]  ;;  %3540 = vmatmul.f32.gmra.mxu3 %v3283_v22  ;;  %v4966_v63 = vpack.i.bf16 %v2215_v54, %v2214_v23  ;;  %4045 = vmatmul.msk.f32.gmra.mxu0 %vm255_vm0, %v7022_v38  ;;  %v1927_v14 = vpop.f32.mrf.mxu1  ;;  %v4976_v55 = vpack.i.bf16 %v2215_v54, %v6983_v2  ;;  %v2165_v23 = vld [vmem:[#allocation2 + $0x68] sm:$0xff]  ;;  %v4710_v2 = vunpack.i.h.bf16 %v6815_v17  ;;  %v2046_v22 = vpop.f32.mrf.mxu3  ;;  %v4760_v54 = vunpack.i.h.bf16 %v7010_v53 }
 0x2f6   : > { %v4971_v50 = vpack.i.bf16 %v7025_v61, %v6925_v41  ;;  %3650 = vmatmul.f32.gmra.mxu2 %v3378_v20  ;;  %v1928_v31 = vadd.f32 %v1927_v14, %v1815_v40  ;;  %v3315_v41 = vsel %vm255_vm0, %v2291_v58, %v4725_v6  ;;  %v1821_v40 = vadd.f32 %v6822_v26, %v6382_v62  ;;  %v2292_v6 = vld [vmem:[#allocation2 + $0x79] sm:$0xff] }
 0x2f7   : > { %4967 = vrot.lane.b32.xlu1 %v4966_v63, %s5151_s10  ;;  %4962 = vrot.lane.b32.xlu0 %v4961_v43, %s5153_s12  ;;  %v3347_v48 = vsel %vm1455_vm3, %v3315_v41, %v4745_v27  ;;  %v3316_v17 = vsel %vm255_vm0, %v2292_v6, %v4754_v37  ;;  %v4755_v63 = vunpack.i.h.bf16 %v6946_v24  ;;  %v4739_v53 = vunpack.i.l.bf16 %v6975_v36  ;;  %v2166_v27 = vld [vmem:[#allocation2 + $0x78] sm:$0xff] }
 0x2f8   : > { %4972 = vrot.lane.b32.xlu2 %v4971_v50, %s5152_s11  ;;  %v2041_v1 = vadd.f32 %v2040_v8, %v1928_v31  ;;  %v3379_v8 = vsel %vm1488_vm2, %v3347_v48, %v4750_v32 }
 0x2f9   : > { %v7041_v44 = vpop.permute.xlu1 %4767  ;;  %v7043_v9 = vpop.permute.xlu0 %4762 }
 0x2fa   : > { %v7045_v51 = vpop.permute.xlu2 %4807  ;;  %v2082_v46 = vmax.f32 %v2041_v1, 0.0  ;;  %v4789_v1 = vunpack.i.l.bf16 %v6979_v52 }
 0x2fb   : > { %v7056_v30 = vld [vmem:[#allocation2 + $0x150] sm:$0xff] }
 0x2fc   : > { %v2404_v18 = vld [vmem:[#allocation2 + $0x151] sm:$0xff]  ;;  %2114 = vst.msk [vmem:[#allocation2 + $0x159] sm:$0xff] %vm255_vm0, %v2082_v46  ;;  %v4986_v5 = vpack.i.bf16 %v7056_v30, %v6955_v21  ;;  %v3221_v21 = vsel %vm255_vm0, %v2165_v23, %v4705_v60  ;;  %v2293_v46 = vld [vmem:[#allocation2 + $0x81] sm:$0xff] }
 0x2fd   : > { %3543 = vmatmul.f32.gmra.mxu3 %v3284_v13  ;;  %v4991_v11 = vpack.i.bf16 %v2404_v18, %v6992_v33  ;;  %4046 = vmatmul.msk.f32.gmra.mxu0 %vm255_vm0, %v7059_v3  ;;  %v1930_v56 = vpop.f32.mrf.mxu1  ;;  %v3253_v20 = vsel %vm1455_vm3, %v3221_v21, %v4710_v2  ;;  %v2049_v23 = vpop.f32.mrf.mxu3 }
 0x2fe   : > { %3653 = vmatmul.f32.gmra.mxu2 %v3379_v8  ;;  %v1931_v19 = vadd.f32 %v1930_v56, %v1818_v57  ;;  %v3317_v8 = vsel %vm255_vm0, %v2293_v46, %v4755_v63 }
 0x2ff   : > { %4987 = vrot.lane.b32.xlu1 %v4986_v5, %s5152_s11  ;;  %4977 = vrot.lane.b32.xlu0 %v4976_v55, %s5153_s12 }
 0x300   : > { %4992 = vrot.lane.b32.xlu2 %v4991_v11, %s5153_s12  ;;  %v2044_v33 = vadd.f32 %v2043_v34, %v1931_v19  ;;  %v1824_v11 = vadd.f32 %v6822_v26, %v6387_v16  ;;  %v4735_v16 = vunpack.i.h.bf16 %v6881_v35  ;;  %v4809_v35 = vunpack.i.l.bf16 %v7045_v51 }
 0x301   : > { %v4778_v12 = vpop.permute.xlu1 %4777  ;;  %v4773_v49 = vpop.permute.xlu0 %4772 }
 0x302   : > { %v4779_v47 = vunpack.i.l.bf16 %v4778_v12  ;;  %v4774_v4 = vunpack.i.l.bf16 %v4773_v49  ;;  %v7076_v25 = vpop.permute.xlu2 %4822  ;;  %v2083_v43 = vmax.f32 %v2044_v33, 0.0  ;;  %v4775_v41 = vunpack.i.h.bf16 %v4773_v49 }
 0x303   : > { %v7083_v62 = vld [vmem:[#allocation2 + $0x152] sm:$0xff]  ;;  %v4780_v45 = vunpack.i.h.bf16 %v4778_v12  ;;  %v7119_v21 = vld [vmem:[#allocation2 + $0x15a] sm:$0xff] }
 0x304   : > { %v3285_v50 = vsel %vm1488_vm2, %v3253_v20, %v4779_v47  ;;  %v3348_v14 = vsel %vm1455_vm3, %v3316_v17, %v4774_v4  ;;  %v7086_v31 = vld [vmem:[#allocation2 + $0x158] sm:$0xff]  ;;  %2115 = vst.msk [vmem:[#allocation2 + $0x169] sm:$0xff] %vm255_vm0, %v2083_v43  ;;  %v3349_v5 = vsel %vm1455_vm3, %v3317_v8, %v4775_v41  ;;  %v4790_v17 = vunpack.i.h.bf16 %v6979_v52 }
 0x305   : > { %v2217_v58 = vld [vmem:[#allocation2 + $0x159] sm:$0xff]  ;;  %3546 = vmatmul.f32.gmra.mxu3 %v3285_v50  ;;  %v3380_v29 = vsel %vm1488_vm2, %v3348_v14, %v4760_v54  ;;  %v5001_v24 = vpack.i.bf16 %v7086_v31, %v6981_v7  ;;  %4047 = vmatmul.msk.f32.gmra.mxu0 %vm255_vm0, %v7083_v62  ;;  %v1933_v34 = vpop.f32.mrf.mxu1  ;;  %v3222_v7 = vsel %vm255_vm0, %v2166_v27, %v4734_v39  ;;  %v4740_v39 = vunpack.i.h.bf16 %v6975_v36  ;;  %v2294_v20 = vld [vmem:[#allocation2 + $0x91] sm:$0xff] }
 0x306   : > { %v4996_v32 = vpack.i.bf16 %v2217_v58, %v2404_v18  ;;  %3656 = vmatmul.f32.gmra.mxu2 %v3380_v29  ;;  %v1934_v0 = vadd.f32 %v1933_v34, %v1821_v40  ;;  %v3254_v13 = vsel %vm1455_vm3, %v3222_v7, %v4739_v53  ;;  %v3381_v2 = vsel %vm1488_vm2, %v3349_v5, %v4780_v45  ;;  %v2168_v45 = vld [vmem:[#allocation2 + $0x90] sm:$0xff] }
 0x307   : > { %5002 = vrot.lane.b32.xlu1 %v5001_v24, %s5152_s11  ;;  %4982 = vrot.lane.b32.xlu0 %v4981_v59, %s5151_s10  ;;  %v3286_v56 = vsel %vm1488_vm2, %v3254_v13, %v4789_v1  ;;  %v5006_v40 = vpack.i.bf16 %v2217_v58, %v7025_v61  ;;  %v1827_v61 = vadd.f32 %v6822_v26, %v6398_v42  ;;  %v4764_v58 = vunpack.i.l.bf16 %v7043_v9  ;;  %v2052_v1 = vpop.f32.mrf.mxu3 }
 0x308   : > { %4997 = vrot.lane.b32.xlu2 %v4996_v32, %s5151_s10  ;;  %v2047_v48 = vadd.f32 %v2046_v22, %v1934_v0  ;;  %v2167_v22 = vld [vmem:[#allocation2 + $0x80] sm:$0xff]  ;;  %v5011_v27 = vpack.i.bf16 %v7119_v21, %v7083_v62  ;;  %v4769_v7 = vunpack.i.l.bf16 %v7041_v44 }
 0x309   : > { %v7104_v57 = vpop.permute.xlu1 %4792  ;;  %v7106_v60 = vpop.permute.xlu0 %4782  ;;  %v3223_v43 = vsel %vm255_vm0, %v2167_v22, %v4735_v16  ;;  %v2169_v22 = vld [vmem:[#allocation2 + $0x98] sm:$0xff] }
 0x30a   : > { %v7110_v18 = vpop.permute.xlu2 %4827  ;;  %v2084_v55 = vmax.f32 %v2047_v48, 0.0  ;;  %v4784_v47 = vunpack.i.l.bf16 %v7106_v60  ;;  %v3255_v14 = vsel %vm1455_vm3, %v3223_v43, %v4740_v39  ;;  %v4785_v53 = vunpack.i.h.bf16 %v7106_v60  ;;  %v2295_v48 = vld [vmem:[#allocation2 + $0x99] sm:$0xff] }
 0x30b   : > { %v2406_v37 = vld [vmem:[#allocation2 + $0x169] sm:$0xff]  ;;  %v3287_v42 = vsel %vm1488_vm2, %v3255_v14, %v4809_v35  ;;  %v3224_v60 = vsel %vm255_vm0, %v2168_v45, %v4764_v58 }
 0x30c   : > { %v7116_v19 = vld [vmem:[#allocation2 + $0x168] sm:$0xff]  ;;  %2116 = vst.msk [vmem:[#allocation2 + $0x171] sm:$0xff] %vm255_vm0, %v2084_v55  ;;  %v5021_v33 = vpack.i.bf16 %v2406_v37, %v7056_v30  ;;  %v7133_v30 = vpop.f32.mrf.mxu0  ;;  %v3318_v59 = vsel %vm255_vm0, %v2294_v20, %v4784_v47  ;;  %v3319_v13 = vsel %vm255_vm0, %v2295_v48, %v4785_v53  ;;  %v3256_v16 = vsel %vm1455_vm3, %v3224_v60, %v4769_v7 }
 0x30d   : > { %3549 = vmatmul.f32.gmra.mxu3 %v3286_v56  ;;  %v5016_v12 = vpack.i.bf16 %v7116_v19, %v7022_v38  ;;  %4048 = vmatmul.msk.f32.gmra.mxu0 %vm255_vm0, %v7119_v21  ;;  %v1936_v49 = vpop.f32.mrf.mxu1  ;;  %v4810_v56 = vunpack.i.h.bf16 %v7045_v51  ;;  %v4794_v53 = vunpack.i.l.bf16 %v7104_v57  ;;  %v4830_v7 = vunpack.i.h.bf16 %v7110_v18 }
 0x30e   : > { %3659 = vmatmul.f32.gmra.mxu2 %v3381_v2  ;;  %v1937_v4 = vadd.f32 %v1936_v49, %v1824_v11  ;;  %v4765_v49 = vunpack.i.h.bf16 %v7043_v9  ;;  %v2296_v9 = vld [vmem:[#allocation2 + $0xa9] sm:$0xff] }
 0x30f   : > { %5022 = vrot.lane.b32.xlu1 %v5021_v33, %s5153_s12  ;;  %5017 = vrot.lane.b32.xlu0 %v5016_v12, %s5152_s11 }
 0x310   : > { %5007 = vrot.lane.b32.xlu2 %v5006_v40, %s5153_s12  ;;  %v2050_v38 = vadd.f32 %v2049_v23, %v1937_v4 }
 0x311   : > { %v4803_v6 = vpop.permute.xlu1 %4802  ;;  %v7143_v50 = vpop.permute.xlu0 %4817 }
 0x312   : > { %v4804_v36 = vunpack.i.l.bf16 %v4803_v6  ;;  %v7139_v54 = vpop.permute.xlu2 %4837  ;;  %v2085_v63 = vmax.f32 %v2050_v38, 0.0  ;;  %v4805_v52 = vunpack.i.h.bf16 %v4803_v6  ;;  %v4770_v6 = vunpack.i.h.bf16 %v7041_v44 }
 0x313   : > { %v7150_v26 = vld [vmem:[#allocation2 + $0x16a] sm:$0xff]  ;;  %v7173_v23 = vld [vmem:[#allocation2 + $0x172] sm:$0xff] }
 0x314   : > { %v3350_v29 = vsel %vm1455_vm3, %v3318_v59, %v4804_v36  ;;  %v2407_v24 = vld [vmem:[#allocation2 + $0x171] sm:$0xff]  ;;  %2117 = vst.msk [vmem:[#allocation2 + $0x181] sm:$0xff] %vm255_vm0, %v2085_v63  ;;  %v3351_v55 = vsel %vm1455_vm3, %v3319_v13, %v4805_v52  ;;  %v7168_v11 = vpop.f32.mrf.mxu0  ;;  %v5041_v4 = vpack.i.bf16 %v7173_v23, %v7150_v26  ;;  %v4829_v36 = vunpack.i.l.bf16 %v7110_v18  ;;  %v2410_v18 = vld [vmem:[#allocation2 + $0x199] sm:$0xff] }
 0x315   : > { %3552 = vmatmul.f32.gmra.mxu3 %v3287_v42  ;;  %v3382_v32 = vsel %vm1488_vm2, %v3350_v29, %v4790_v17  ;;  %v5036_v41 = vpack.i.bf16 %v2407_v24, %v7086_v31  ;;  %v5026_v34 = vpack.i.bf16 %v2407_v24, %v2406_v37  ;;  %4049 = vmatmul.msk.f32.gmra.mxu0 %vm255_vm0, %v7150_v26  ;;  %v1939_v0 = vpop.f32.mrf.mxu1  ;;  %v4819_v31 = vunpack.i.l.bf16 %v7143_v50  ;;  %v7175_v2 = vld [vmem:[#allocation2 + $0x170] sm:$0xff]  ;;  %v2378_v17 = vld [vmem:[#allocation2 + $0x198] sm:$0xff] }
 0x316   : > { %3662 = vmatmul.f32.gmra.mxu2 %v3382_v32  ;;  %v1940_v46 = vadd.f32 %v1939_v0, %v1827_v61  ;;  %v3383_v39 = vsel %vm1488_vm2, %v3351_v55, %v4810_v56  ;;  %v5031_v35 = vpack.i.bf16 %v7175_v2, %v7059_v3  ;;  %v4820_v63 = vunpack.i.h.bf16 %v7143_v50  ;;  %v2297_v0 = vld [vmem:[#allocation2 + $0xb1] sm:$0xff] }
 0x317   : > { %5037 = vrot.lane.b32.xlu1 %v5036_v41, %s5153_s12  ;;  %5027 = vrot.lane.b32.xlu0 %v5026_v34, %s5151_s10  ;;  %v3288_v40 = vsel %vm1488_vm2, %v3256_v16, %v4819_v31  ;;  %v5066_v41 = vpack.i.bf16 %v2378_v17, %v7150_v26 }
 0x318   : > { %5012 = vrot.lane.b32.xlu2 %v5011_v27, %s5151_s10  ;;  %v2053_v8 = vadd.f32 %v2052_v1, %v1940_v46  ;;  %v2170_v27 = vld [vmem:[#allocation2 + $0xa8] sm:$0xff] }
 0x319   : > { %v4813_v5 = vpop.permute.xlu1 %4812  ;;  %v4833_v51 = vpop.permute.xlu0 %4832 }
 0x31a   : > { %v7171_v37 = vpop.permute.xlu2 %4867  ;;  %v2086_v33 = vmax.f32 %v2053_v8, 0.0  ;;  %v4814_v12 = vunpack.i.l.bf16 %v4813_v5  ;;  %v4834_v3 = vunpack.i.l.bf16 %v4833_v51  ;;  %v4815_v14 = vunpack.i.h.bf16 %v4813_v5 }
 0x31b   : > { %v7181_v47 = vld [vmem:[#allocation2 + $0x180] sm:$0xff]  ;;  %v4835_v60 = vunpack.i.h.bf16 %v4833_v51  ;;  %v4795_v8 = vunpack.i.h.bf16 %v7104_v57  ;;  %v4839_v57 = vunpack.i.l.bf16 %v7139_v54 }
 0x31c   : > { %2118 = vst.msk [vmem:[#allocation2 + $0x189] sm:$0xff] %vm255_vm0, %v2086_v33  ;;  %v5046_v38 = vpack.i.bf16 %v7181_v47, %v7083_v62  ;;  %v3320_v61 = vsel %vm255_vm0, %v2296_v9, %v4814_v12  ;;  %v3225_v62 = vsel %vm255_vm0, %v2169_v22, %v4765_v49  ;;  %v7202_v44 = vld [vmem:[#allocation2 + $0x181] sm:$0xff]  ;;  %v7206_v58 = vpop.f32.mrf.mxu0  ;;  %v3321_v1 = vsel %vm255_vm0, %v2297_v0, %v4815_v14 }
 0x31d   : > { %3555 = vmatmul.f32.gmra.mxu3 %v3288_v40  ;;  %4050 = vmatmul.msk.f32.gmra.mxu0 %vm255_vm0, %v7173_v23  ;;  %v3352_v20 = vsel %vm1455_vm3, %v3320_v61, %v4829_v36  ;;  %v3257_v59 = vsel %vm1455_vm3, %v3225_v62, %v4770_v6  ;;  %v5051_v50 = vpack.i.bf16 %v7202_v44, %v7116_v19  ;;  %v2171_v40 = vld [vmem:[#allocation2 + $0xb0] sm:$0xff]  ;;  %v2298_v9 = vld [vmem:[#allocation2 + $0xc1] sm:$0xff]  ;;  %v4840_v62 = vunpack.i.h.bf16 %v7139_v54 }
 0x31e   : > { %3665 = vmatmul.f32.gmra.mxu2 %v3383_v39  ;;  %v3289_v29 = vsel %vm1488_vm2, %v3257_v59, %v4834_v3  ;;  %v3384_v32 = vsel %vm1488_vm2, %v3352_v20, %v4820_v63  ;;  %v3226_v19 = vsel %vm255_vm0, %v2170_v27, %v4794_v53  ;;  %v3353_v48 = vsel %vm1455_vm3, %v3321_v1, %v4830_v7  ;;  %v2379_v3 = vld [vmem:[#allocation2 + $0x1a0] sm:$0xff]  ;;  %v2299_v59 = vld [vmem:[#allocation2 + $0xc9] sm:$0xff] }
 0x31f   : > { %5042 = vrot.lane.b32.xlu1 %v5041_v4, %s5151_s10  ;;  %5032 = vrot.lane.b32.xlu0 %v5031_v35, %s5152_s11  ;;  %v3385_v56 = vsel %vm1488_vm2, %v3353_v48, %v4835_v60  ;;  %v5071_v49 = vpack.i.bf16 %v2410_v18, %v7181_v47  ;;  %v3227_v51 = vsel %vm255_vm0, %v2171_v40, %v4795_v8  ;;  %v4800_v4 = vunpack.i.h.bf16 %v7012_v10  ;;  %v7268_v20 = vld [vmem:[%s7653_s4] ss:$0 sm:$0xff]  ;;  %v2411_v48 = vld [vmem:[#allocation2 + $0x1a1] sm:$0xff]  ;;  %v7730_v18 = vld [vmem:[#allocation10_spill] sm:$0xff] }
 0x320   : > { %5047 = vrot.lane.b32.xlu2 %v5046_v38, %s5152_s11  ;;  %v3322_v22 = vsel %vm255_vm0, %v2298_v9, %v4839_v57  ;;  %v4869_v63 = vunpack.i.l.bf16 %v7171_v37  ;;  %v4825_v60 = vunpack.i.h.bf16 %v7076_v25  ;;  %v2173_v57 = vld [vmem:[#allocation2 + $0xc8] sm:$0xff] }
 0x321   : > { %v7199_v43 = vpop.permute.xlu1 %4842 }
 0x322   : > { %v7209_v42 = vpop.permute.xlu2 %4882  ;;  %v4844_v26 = vunpack.i.l.bf16 %v7199_v43  ;;  %v4845_v6 = vunpack.i.h.bf16 %v7199_v43  ;;  %v4824_v43 = vunpack.i.l.bf16 %v7076_v25  ;;  %v4870_v25 = vunpack.i.h.bf16 %v7171_v37 }
 0x323   : > { %v2440_v24 = vld [vmem:[#allocation2 + $0x182] sm:$0xff]  ;;  %v2441_v55 = vld [vmem:[#allocation2 + $0x18a] sm:$0xff] }
 0x324   : > { %v7212_v52 = vld [vmem:[#allocation2 + $0x188] sm:$0xff]  ;;  %v7242_v12 = vpop.f32.mrf.mxu0 }
 0x325   : > { %3558 = vmatmul.f32.gmra.mxu3 %v3289_v29  ;;  %v5056_v34 = vpack.i.bf16 %v7212_v52, %v7119_v21  ;;  %4051 = vmatmul.msk.f32.gmra.mxu0 %vm255_vm0, %v2440_v24  ;;  %v4799_v21 = vunpack.i.l.bf16 %v7012_v10  ;;  %v7234_v31 = vld [vmem:[#allocation2 + $0x189] sm:$0xff] }
 0x326   : > { %3668 = vmatmul.f32.gmra.mxu2 %v3384_v32  ;;  %v5061_v33 = vpack.i.bf16 %v7234_v31, %v7175_v2 }
 0x327   : > { %5067 = vrot.lane.b32.xlu1 %v5066_v41, %s5152_s11  ;;  %5052 = vrot.lane.b32.xlu0 %v5051_v50, %s5153_s12  ;;  %v3258_v13 = vsel %vm1455_vm3, %v3226_v19, %v4799_v21  ;;  %v2172_v41 = vld [vmem:[#allocation2 + $0xc0] sm:$0xff]  ;;  %v3323_v50 = vsel %vm255_vm0, %v2299_v59, %v4840_v62 }
 0x328   : > { %5057 = vrot.lane.b32.xlu2 %v5056_v34, %s5152_s11  ;;  %v3290_v5 = vsel %vm1488_vm2, %v3258_v13, %v4844_v26  ;;  %v3228_v34 = vsel %vm255_vm0, %v2172_v41, %v4824_v43 }
 0x329   : > { %v7229_v46 = vpop.permute.xlu1 %4857  ;;  %v7231_v45 = vpop.permute.xlu0 %4847 }
 0x32a   : > { %v7244_v16 = vpop.permute.xlu2 %4902  ;;  %v4859_v39 = vunpack.i.l.bf16 %v7229_v46  ;;  %v4860_v27 = vunpack.i.h.bf16 %v7229_v46  ;;  %v4884_v46 = vunpack.i.l.bf16 %v7209_v42 }
 0x32b   : > { %v4904_v59 = vunpack.i.l.bf16 %v7244_v16 }
 0x32d   : > { %3561 = vmatmul.f32.gmra.mxu3 %v3290_v5  ;;  %4052 = vmatmul.msk.f32.gmra.mxu0 %vm255_vm0, %v2441_v55  ;;  %v2300_v5 = vld [vmem:[#allocation2 + $0xd9] sm:$0xff] }
 0x32e   : > { %3671 = vmatmul.f32.gmra.mxu2 %v3385_v56 }
 0x32f   : > { %2666 = vrot.lane.b32.xlu1 %v7173_v23, %s5152_s11  ;;  %5062 = vrot.lane.b32.xlu0 %v5061_v33, %s5153_s12  ;;  %v3259_v23 = vsel %vm1455_vm3, %v3227_v51, %v4800_v4  ;;  %v4849_v4 = vunpack.i.l.bf16 %v7231_v45 }
 0x330   : > { %5072 = vrot.lane.b32.xlu2 %v5071_v49, %s5153_s12  ;;  %v3291_v61 = vsel %vm1488_vm2, %v3259_v23, %v4859_v39  ;;  %v2174_v23 = vld [vmem:[#allocation2 + $0xd8] sm:$0xff] }
 0x331   : > { %v7256_v35 = vpop.permute.xlu1 %4862  ;;  %v4853_v38 = vpop.permute.xlu0 %4852 }
 0x332   : > { %v4854_v47 = vunpack.i.l.bf16 %v4853_v38  ;;  %v4855_v17 = vunpack.i.h.bf16 %v4853_v38  ;;  %v7274_v54 = vpop.permute.xlu2 %4907  ;;  %v4864_v19 = vunpack.i.l.bf16 %v7256_v35  ;;  %v4865_v37 = vunpack.i.h.bf16 %v7256_v35  ;;  %v7317_v35 = vpop.f32.mrf.mxu0 }
 0x334   : > { %v3354_v36 = vsel %vm1455_vm3, %v3322_v22, %v4854_v47  ;;  %v3355_v0 = vsel %vm1455_vm3, %v3323_v50, %v4855_v17  ;;  %v3324_v40 = vsel %vm255_vm0, %v2300_v5, %v4864_v19  ;;  %v4850_v50 = vunpack.i.h.bf16 %v7231_v45  ;;  %v2175_v19 = vld [vmem:[#allocation2 + $0xe0] sm:$0xff] }
 0x335   : > { %3564 = vmatmul.f32.gmra.mxu3 %v3291_v61  ;;  %v3386_v10 = vsel %vm1488_vm2, %v3354_v36, %v4845_v6  ;;  %v3387_v21 = vsel %vm1488_vm2, %v3355_v0, %v4860_v27  ;;  %v3356_v47 = vsel %vm1455_vm3, %v3324_v40, %v4870_v25  ;;  %v3230_v61 = vsel %vm255_vm0, %v2174_v23, %v4849_v4  ;;  %v2301_v36 = vld [vmem:[#allocation2 + $0xe1] sm:$0xff]  ;;  %v2176_v4 = vld [vmem:[#allocation2 + $0xf0] sm:$0xff] }
 0x336   : > { %3674 = vmatmul.f32.gmra.mxu2 %v3386_v10  ;;  %v4905_v5 = vunpack.i.h.bf16 %v7244_v16 }
 0x337   : > { %2920 = vrot.lane.b32.xlu0 %v2440_v24, %s5151_s10  ;;  %3050 = vrot.lane.b32.xlu1 %v2379_v3, %s5152_s11  ;;  %v3520_v14 = vpop.f32.mrf.mxu3  ;;  %s3988_s11 = sshll.u32 %s215_s26, 8 }
 0x338   : > { %2794 = vrot.lane.b32.xlu2 %v7212_v52, %s5153_s12  ;;  %v3521_v53 = vadd.f32 %v7268_v20, %v3520_v14  ;;  %v3260_v52 = vsel %vm1455_vm3, %v3228_v34, %v4869_v63  ;;  %s7302_s30 = scalar_lea.vmem [#allocation3], %s3988_s11  ;;  %v3325_v63 = vsel %vm255_vm0, %v2301_v36, %v4865_v37  ;;  %v4885_v14 = vunpack.i.h.bf16 %v7209_v42 }
 0x339   : > { %v7279_v29 = vpop.permute.xlu1 %4877  ;;  %v4873_v32 = vpop.permute.xlu0 %4872  ;;  %s3919_s13 = sshll.u32 %s7302_s30, 4  ;;  %s3920_s13 = int_to_ptr.vmem [resolvable:$true] %s3919_s13 }
 0x33a   : > { %v4874_v24 = vunpack.i.l.bf16 %v4873_v32  ;;  %v4875_v56 = vunpack.i.h.bf16 %v4873_v32  ;;  %v7300_v39 = vpop.permute.xlu2 %4917  ;;  %v3357_v0 = vsel %vm1455_vm3, %v3325_v63, %v4885_v14 }
 0x33b   : > { %v3633_v1 = vpop.f32.mrf.mxu2 }
 0x33c   : > { %v3634_v7 = vadd.f32 %v3633_v1, %v3521_v53  ;;  %v3292_v26 = vsel %vm1488_vm2, %v3260_v52, %v4874_v24  ;;  %v3388_v6 = vsel %vm1488_vm2, %v3356_v47, %v4875_v56  ;;  %v2302_v52 = vld [vmem:[#allocation2 + $0xf1] sm:$0xff] }
 0x33d   : > { %3567 = vmatmul.f32.gmra.mxu3 %v3292_v26 }
 0x33e   : > { %v3747_v13 = vadd.f32 %v7051_v28, %v3634_v7  ;;  %3677 = vmatmul.f32.gmra.mxu2 %v3387_v21  ;;  %v7731_v7 = vld [vmem:[#allocation11_spill] sm:$0xff] }
 0x33f   : > { %2922 = vrot.lane.b32.xlu0 %v2441_v55, %s5151_s10  ;;  %v3229_v55 = vsel %vm255_vm0, %v2173_v57, %v4825_v60  ;;  %v3231_v60 = vsel %vm255_vm0, %v2175_v19, %v4850_v50 }
 0x340   : > { %v3842_v8 = vadd.f32 %v3747_v13, %v7730_v18  ;;  %3178 = vrot.lane.b32.xlu2 %v2411_v48, %s5153_s12  ;;  %v3261_v51 = vsel %vm1455_vm3, %v3229_v55, %v4884_v46  ;;  %v4919_v18 = vunpack.i.l.bf16 %v7300_v39 }
 0x341   : > { %v4898_v33 = vpop.permute.xlu1 %4897  ;;  %v4888_v49 = vpop.permute.xlu0 %4887 }
 0x342   : > { %3874 = vst.msk [vmem:[%s7302_s30] sm:$0xff] %vm255_vm0, %v3842_v8  ;;  %v4889_v28 = vunpack.i.l.bf16 %v4888_v49  ;;  %v4899_v9 = vunpack.i.l.bf16 %v4898_v33  ;;  %v4890_v3 = vunpack.i.h.bf16 %v4888_v49  ;;  %v7322_v24 = vpop.permute.xlu2 %4922  ;;  %v4900_v21 = vunpack.i.h.bf16 %v4898_v33  ;;  %v7337_v49 = vpop.f32.mrf.mxu0 }
 0x343   : > { %v4879_v33 = vunpack.i.l.bf16 %v7279_v29 }
 0x344   : > { %v3293_v38 = vsel %vm1488_vm2, %v3261_v51, %v4889_v28  ;;  %v3262_v17 = vsel %vm1455_vm3, %v3230_v61, %v4899_v9  ;;  %v3389_v42 = vsel %vm1488_vm2, %v3357_v0, %v4890_v3  ;;  %v2303_v51 = vld [vmem:[#allocation2 + $0xf9] sm:$0xff]  ;;  %v4920_v3 = vunpack.i.h.bf16 %v7300_v39 }
 0x345   : > { %3570 = vmatmul.f32.gmra.mxu3 %v3293_v38  ;;  %v3294_v34 = vsel %vm1488_vm2, %v3262_v17, %v4904_v59  ;;  %v3232_v37 = vsel %vm255_vm0, %v2176_v4, %v4879_v33 }
 0x346   : > { %3680 = vmatmul.f32.gmra.mxu2 %v3388_v6 }
 0x347   : > { %v3523_v22 = vpop.f32.mrf.mxu3  ;;  %v3636_v53 = vpop.f32.mrf.mxu2 }
 0x348   : > { %v3524_v62 = vadd.f32 %v7268_v20, %v3523_v22 }
 0x349   : > { %v4913_v10 = vpop.permute.xlu1 %4912  ;;  %v4893_v43 = vpop.permute.xlu0 %4892 }
 0x34a   : > { %v3637_v32 = vadd.f32 %v3636_v53, %v3524_v62  ;;  %v4894_v41 = vunpack.i.l.bf16 %v4893_v43  ;;  %v4914_v1 = vunpack.i.l.bf16 %v4913_v10  ;;  %v4895_v56 = vunpack.i.h.bf16 %v4893_v43  ;;  %v7342_v55 = vpop.permute.xlu2 %4957  ;;  %v7358_v14 = vpop.f32.mrf.mxu0 }
 0x34b   : > { %v4915_v28 = vunpack.i.h.bf16 %v4913_v10  ;;  %v4924_v43 = vunpack.i.l.bf16 %v7322_v24  ;;  %v4880_v53 = vunpack.i.h.bf16 %v7279_v29 }
 0x34c   : > { %v3750_v27 = vadd.f32 %v7095_v15, %v3637_v32  ;;  %v3326_v45 = vsel %vm255_vm0, %v2302_v52, %v4894_v41  ;;  %v3263_v15 = vsel %vm1455_vm3, %v3231_v60, %v4914_v1  ;;  %v3327_v38 = vsel %vm255_vm0, %v2303_v51, %v4895_v56  ;;  %v7732_v32 = vld [vmem:[#allocation8_spill] sm:$0xff]  ;;  %v7733_v56 = vld [vmem:[#allocation9_spill] sm:$0xff] }
 0x34d   : > { %3573 = vmatmul.f32.gmra.mxu3 %v3294_v34  ;;  %v3358_v8 = vsel %vm1455_vm3, %v3326_v45, %v4900_v21  ;;  %v3295_v57 = vsel %vm1488_vm2, %v3263_v15, %v4919_v18  ;;  %v3359_v36 = vsel %vm1455_vm3, %v3327_v38, %v4915_v28  ;;  %v2304_v34 = vld [vmem:[#allocation2 + $0x109] sm:$0xff]  ;;  %v4925_v60 = vunpack.i.h.bf16 %v7322_v24 }
 0x34e   : > { %3683 = vmatmul.f32.gmra.mxu2 %v3389_v42  ;;  %v3843_v26 = vadd.f32 %v3750_v27, %v7731_v7  ;;  %v3390_v25 = vsel %vm1488_vm2, %v3358_v8, %v4905_v5  ;;  %v3391_v63 = vsel %vm1488_vm2, %v3359_v36, %v4920_v3  ;;  %v3328_v42 = vsel %vm255_vm0, %v2304_v34, %v4924_v43  ;;  %v2178_v51 = vld [vmem:[#allocation2 + $0x108] sm:$0xff] }
 0x34f   : > { %v3526_v48 = vpop.f32.mrf.mxu3  ;;  %v4909_v18 = vunpack.i.l.bf16 %v7274_v54  ;;  %v4959_v5 = vunpack.i.l.bf16 %v7342_v55 }
 0x350   : > { %3875 = vst.msk [vmem:[%s7302_s30 + $0x8] sm:$0xff] %vm255_vm0, %v3843_v26  ;;  %v3527_v9 = vadd.f32 %v7268_v20, %v3526_v48  ;;  %v2177_v26 = vld [vmem:[#allocation2 + $0xf8] sm:$0xff] }
 0x351   : > { %v4933_v13 = vpop.permute.xlu1 %4932  ;;  %v4928_v46 = vpop.permute.xlu0 %4927  ;;  %v3233_v21 = vsel %vm255_vm0, %v2177_v26, %v4880_v53 }
 0x352   : > { %v4929_v40 = vunpack.i.l.bf16 %v4928_v46  ;;  %v4934_v16 = vunpack.i.l.bf16 %v4933_v13  ;;  %v4930_v59 = vunpack.i.h.bf16 %v4928_v46  ;;  %v7362_v39 = vpop.permute.xlu2 %4972  ;;  %v4935_v0 = vunpack.i.h.bf16 %v4933_v13 }
 0x354   : > { %v3264_v22 = vsel %vm1455_vm3, %v3232_v37, %v4929_v40  ;;  %v3360_v29 = vsel %vm1455_vm3, %v3328_v42, %v4930_v59  ;;  %v3234_v37 = vsel %vm255_vm0, %v2178_v51, %v4909_v18  ;;  %v7734_v59 = vld [vmem:[#allocation14_spill] sm:$0xff] }
 0x355   : > { %3576 = vmatmul.f32.gmra.mxu3 %v3295_v57  ;;  %v3296_v10 = vsel %vm1488_vm2, %v3264_v22, %v4934_v16  ;;  %v3392_v15 = vsel %vm1488_vm2, %v3360_v29, %v4935_v0  ;;  %v7381_v57 = vpop.f32.mrf.mxu0  ;;  %v3266_v36 = vsel %vm1455_vm3, %v3234_v37, %v4959_v5  ;;  %v2180_v5 = vld [vmem:[#allocation2 + $0x120] sm:$0xff] }
 0x356   : > { %3686 = vmatmul.f32.gmra.mxu2 %v3390_v25  ;;  %v2305_v25 = vld [vmem:[#allocation2 + $0x111] sm:$0xff] }
 0x357   : > { %v3529_v47 = vpop.f32.mrf.mxu3  ;;  %v3329_v4 = vsel %vm255_vm0, %v2305_v25, %v4925_v60 }
 0x358   : > { %v3530_v27 = vadd.f32 %v7268_v20, %v3529_v47 }
 0x359   : > { %v7347_v6 = vpop.permute.xlu1 %4947  ;;  %v7349_v23 = vpop.permute.xlu0 %4937 }
 0x35a   : > { %v3639_v61 = vpop.f32.mrf.mxu2  ;;  %v4949_v19 = vunpack.i.l.bf16 %v7347_v6  ;;  %v7389_v38 = vpop.permute.xlu2 %4992  ;;  %v4950_v22 = vunpack.i.h.bf16 %v7347_v6 }
 0x35b   : > { %v3640_v62 = vadd.f32 %v3639_v61, %v3527_v9 }
 0x35d   : > { %v3753_v17 = vadd.f32 %v7133_v30, %v3640_v62  ;;  %3579 = vmatmul.f32.gmra.mxu3 %v3296_v10 }
 0x35e   : > { %3689 = vmatmul.f32.gmra.mxu2 %v3391_v63  ;;  %v4974_v63 = vunpack.i.l.bf16 %v7362_v39 }
 0x35f   : > { %v3844_v41 = vadd.f32 %v3753_v17, %v7732_v32  ;;  %v3532_v50 = vpop.f32.mrf.mxu3  ;;  %v4910_v17 = vunpack.i.h.bf16 %v7274_v54  ;;  %v2306_v32 = vld [vmem:[#allocation2 + $0x121] sm:$0xff]  ;;  %v4960_v54 = vunpack.i.h.bf16 %v7342_v55 }
 0x360   : > { %v3533_v24 = vadd.f32 %v7268_v20, %v3532_v50 }
 0x361   : > { %3876 = vst.msk [vmem:[%s7302_s30 + $0x10] sm:$0xff] %vm255_vm0, %v3844_v41  ;;  %v7367_v30 = vpop.permute.xlu1 %4952  ;;  %v4943_v1 = vpop.permute.xlu0 %4942 }
 0x362   : > { %v4944_v52 = vunpack.i.l.bf16 %v4943_v1  ;;  %v3642_v7 = vpop.f32.mrf.mxu2  ;;  %v4945_v8 = vunpack.i.h.bf16 %v4943_v1  ;;  %v4954_v62 = vunpack.i.l.bf16 %v7367_v30  ;;  %v4955_v55 = vunpack.i.h.bf16 %v7367_v30 }
 0x363   : > { %v3643_v45 = vadd.f32 %v3642_v7, %v3530_v27  ;;  %v7408_v7 = vpop.f32.mrf.mxu0 }
 0x364   : > { %v3265_v48 = vsel %vm1455_vm3, %v3233_v21, %v4944_v52  ;;  %v3361_v9 = vsel %vm1455_vm3, %v3329_v4, %v4945_v8  ;;  %v3330_v27 = vsel %vm255_vm0, %v2306_v32, %v4954_v62  ;;  %v4994_v4 = vunpack.i.l.bf16 %v7389_v38  ;;  %v2181_v32 = vld [vmem:[#allocation2 + $0x128] sm:$0xff] }
 0x365   : > { %v3756_v13 = vadd.f32 %v7168_v11, %v3643_v45  ;;  %v3297_v46 = vsel %vm1488_vm2, %v3265_v48, %v4949_v19  ;;  %v3393_v43 = vsel %vm1488_vm2, %v3361_v9, %v4950_v22  ;;  %v7411_v19 = vpop.permute.xlu2 %4997  ;;  %v3362_v21 = vsel %vm1455_vm3, %v3330_v27, %v4960_v54 }
 0x366   : > { %3582 = vmatmul.f32.gmra.mxu3 %v3297_v46  ;;  %3692 = vmatmul.f32.gmra.mxu2 %v3392_v15  ;;  %v4939_v48 = vunpack.i.l.bf16 %v7349_v23  ;;  %v7735_v15 = vld [vmem:[#allocation15_spill] sm:$0xff]  ;;  %v4995_v27 = vunpack.i.h.bf16 %v7389_v38 }
 0x367   : > { %v3845_v33 = vadd.f32 %v3756_v13, %v7733_v56  ;;  %v3535_v40 = vpop.f32.mrf.mxu3  ;;  %v2307_v56 = vld [vmem:[#allocation2 + $0x129] sm:$0xff]  ;;  %v7737_v38 = vld [vmem:[#allocation7_spill] sm:$0xff] }
 0x368   : > { %v3536_v41 = vadd.f32 %v7268_v20, %v3535_v40  ;;  %v3236_v30 = vsel %vm255_vm0, %v2180_v5, %v4939_v48 }
 0x369   : > { %3877 = vst.msk [vmem:[%s7302_s30 + $0x18] sm:$0xff] %vm255_vm0, %v3845_v33  ;;  %v7386_v11 = vpop.permute.xlu1 %4967  ;;  %v4963_v28 = vpop.permute.xlu0 %4962 }
 0x36a   : > { %v4964_v16 = vunpack.i.l.bf16 %v4963_v28  ;;  %v3645_v47 = vpop.f32.mrf.mxu2  ;;  %v4965_v50 = vunpack.i.h.bf16 %v4963_v28 }
 0x36b   : > { %v3646_v61 = vadd.f32 %v3645_v47, %v3533_v24  ;;  %v4975_v24 = vunpack.i.h.bf16 %v7362_v39  ;;  %v7429_v22 = vpop.f32.mrf.mxu0 }
 0x36c   : > { %v3298_v3 = vsel %vm1488_vm2, %v3266_v36, %v4964_v16  ;;  %v3394_v13 = vsel %vm1488_vm2, %v3362_v21, %v4965_v50 }
 0x36d   : > { %v3759_v10 = vadd.f32 %v7206_v58, %v3646_v61  ;;  %v2179_v58 = vld [vmem:[#allocation2 + $0x110] sm:$0xff]  ;;  %v4940_v61 = vunpack.i.h.bf16 %v7349_v23  ;;  %v5008_v62 = vpop.permute.xlu2 %5007 }
 0x36e   : > { %3585 = vmatmul.f32.gmra.mxu3 %v3298_v3  ;;  %3695 = vmatmul.f32.gmra.mxu2 %v3393_v43  ;;  %v3235_v52 = vsel %vm255_vm0, %v2179_v58, %v4910_v17  ;;  %v2308_v43 = vld [vmem:[#allocation2 + $0x139] sm:$0xff]  ;;  %v7736_v17 = vld [vmem:[#allocation6_spill] sm:$0xff]  ;;  %v5009_v54 = vunpack.i.l.bf16 %v5008_v62 }
 0x36f   : > { %v3846_v6 = vadd.f32 %v3759_v10, %v7734_v59  ;;  %v3538_v53 = vpop.f32.mrf.mxu3  ;;  %v3267_v29 = vsel %vm1455_vm3, %v3235_v52, %v4974_v63 }
 0x370   : > { %v3539_v33 = vadd.f32 %v7268_v20, %v3538_v53 }
 0x371   : > { %3878 = vst.msk [vmem:[%s7302_s30 + $0x20] sm:$0xff] %vm255_vm0, %v3846_v6  ;;  %v4988_v34 = vpop.permute.xlu1 %4987  ;;  %v4978_v0 = vpop.permute.xlu0 %4977 }
 0x372   : > { %v4979_v1 = vunpack.i.l.bf16 %v4978_v0  ;;  %v3648_v42 = vpop.f32.mrf.mxu2  ;;  %v4989_v46 = vunpack.i.l.bf16 %v4988_v34  ;;  %v4980_v40 = vunpack.i.h.bf16 %v4978_v0  ;;  %v4990_v6 = vunpack.i.h.bf16 %v4988_v34 }
 0x373   : > { %v3649_v26 = vadd.f32 %v3648_v42, %v3536_v41  ;;  %v3237_v41 = vsel %vm255_vm0, %v2181_v32, %v4940_v61  ;;  %v4969_v34 = vunpack.i.l.bf16 %v7386_v11  ;;  %v7738_v61 = vld [vmem:[#allocation12_spill] sm:$0xff] }
 0x374   : > { %v3299_v45 = vsel %vm1488_vm2, %v3267_v29, %v4979_v1  ;;  %v3268_v51 = vsel %vm1455_vm3, %v3236_v30, %v4989_v46 }
 0x375   : > { %v3762_v60 = vadd.f32 %v7242_v12, %v3649_v26  ;;  %v3331_v12 = vsel %vm255_vm0, %v2307_v56, %v4955_v55  ;;  %v3300_v3 = vsel %vm1488_vm2, %v3268_v51, %v4994_v4  ;;  %v2309_v55 = vld [vmem:[#allocation2 + $0x141] sm:$0xff] }
 0x376   : > { %3588 = vmatmul.f32.gmra.mxu3 %v3299_v45  ;;  %3698 = vmatmul.f32.gmra.mxu2 %v3394_v13  ;;  %v3363_v9 = vsel %vm1455_vm3, %v3331_v12, %v4975_v24  ;;  %v5010_v12 = vunpack.i.h.bf16 %v5008_v62 }
 0x377   : > { %v3847_v18 = vadd.f32 %v3762_v60, %v7735_v15  ;;  %v3395_v39 = vsel %vm1488_vm2, %v3363_v9, %v4980_v40  ;;  %v7448_v60 = vpop.f32.mrf.mxu0  ;;  %v5013_v15 = vpop.permute.xlu2 %5012 }
 0x378   : > { %v3541_v8 = vpop.f32.mrf.mxu3 }
 0x379   : > { %3879 = vst.msk [vmem:[%s7302_s30 + $0x28] sm:$0xff] %vm255_vm0, %v3847_v18  ;;  %v4983_v25 = vpop.permute.xlu0 %4982  ;;  %v5003_v16 = vpop.permute.xlu1 %5002  ;;  %v3542_v23 = vadd.f32 %v7268_v20, %v3541_v8  ;;  %v2182_v8 = vld [vmem:[#allocation2 + $0x138] sm:$0xff] }
 0x37a   : > { %v3651_v28 = vpop.f32.mrf.mxu2  ;;  %v4984_v47 = vunpack.i.l.bf16 %v4983_v25  ;;  %v5004_v10 = vunpack.i.l.bf16 %v5003_v16  ;;  %v4985_v1 = vunpack.i.h.bf16 %v4983_v25  ;;  %v5005_v21 = vunpack.i.h.bf16 %v5003_v16 }
 0x37b   : > { %v3652_v37 = vadd.f32 %v3651_v28, %v3539_v33  ;;  %v3238_v33 = vsel %vm255_vm0, %v2182_v8, %v4969_v34  ;;  %v5014_v28 = vunpack.i.l.bf16 %v5013_v15  ;;  %v7739_v34 = vld [vmem:[#allocation13_spill] sm:$0xff] }
 0x37c   : > { %v3332_v59 = vsel %vm255_vm0, %v2308_v43, %v4984_v47  ;;  %v3269_v0 = vsel %vm1455_vm3, %v3237_v41, %v5004_v10  ;;  %v3333_v46 = vsel %vm255_vm0, %v2309_v55, %v4985_v1 }
 0x37d   : > { %v3765_v36 = vadd.f32 %v7317_v35, %v3652_v37  ;;  %v3364_v58 = vsel %vm1455_vm3, %v3332_v59, %v4990_v6  ;;  %v3301_v29 = vsel %vm1488_vm2, %v3269_v0, %v5009_v54  ;;  %v3365_v30 = vsel %vm1455_vm3, %v3333_v46, %v5005_v21 }
 0x37e   : > { %3591 = vmatmul.f32.gmra.mxu3 %v3300_v3  ;;  %3701 = vmatmul.f32.gmra.mxu2 %v3395_v39  ;;  %v3396_v45 = vsel %vm1488_vm2, %v3364_v58, %v4995_v27  ;;  %v3397_v16 = vsel %vm1488_vm2, %v3365_v30, %v5010_v12  ;;  %v4970_v37 = vunpack.i.h.bf16 %v7386_v11  ;;  %v2310_v39 = vld [vmem:[#allocation2 + $0x151] sm:$0xff]  ;;  %v2183_v11 = vld [vmem:[#allocation2 + $0x140] sm:$0xff]  ;;  %v4999_v54 = vunpack.i.l.bf16 %v7411_v19 }
 0x37f   : > { %v3848_v63 = vadd.f32 %v3765_v36, %v7736_v17  ;;  %v7465_v62 = vpop.f32.mrf.mxu0  ;;  %v3334_v17 = vsel %vm255_vm0, %v2310_v39, %v5014_v28 }
 0x380   : > { %v3544_v53 = vpop.f32.mrf.mxu3 }
 0x381   : > { %3880 = vst.msk [vmem:[%s7302_s30 + $0x30] sm:$0xff] %vm255_vm0, %v3848_v63  ;;  %v5018_v35 = vpop.permute.xlu0 %5017  ;;  %v5023_v52 = vpop.permute.xlu1 %5022 }
 0x382   : > { %v3654_v50 = vpop.f32.mrf.mxu2  ;;  %v5019_v48 = vunpack.i.l.bf16 %v5018_v35  ;;  %v5024_v5 = vunpack.i.l.bf16 %v5023_v52  ;;  %v5020_v47 = vunpack.i.h.bf16 %v5018_v35  ;;  %v5025_v10 = vunpack.i.h.bf16 %v5023_v52  ;;  %v7471_v63 = vpop.permute.xlu2 %5047 }
 0x383   : > { %v3655_v42 = vadd.f32 %v3654_v50, %v3542_v23  ;;  %v3239_v35 = vsel %vm255_vm0, %v2183_v11, %v4970_v37  ;;  %v5015_v50 = vunpack.i.h.bf16 %v5013_v15  ;;  %v5050_v39 = vunpack.i.h.bf16 %v7471_v63 }
 0x384   : > { %v3270_v25 = vsel %vm1455_vm3, %v3238_v33, %v5019_v48  ;;  %v2184_v48 = vld [vmem:[#allocation2 + $0x150] sm:$0xff] }
 0x385   : > { %v3768_v26 = vadd.f32 %v7337_v49, %v3655_v42  ;;  %v3545_v49 = vadd.f32 %v7268_v20, %v3544_v53  ;;  %v3302_v4 = vsel %vm1488_vm2, %v3270_v25, %v5024_v5  ;;  %v3366_v53 = vsel %vm1455_vm3, %v3334_v17, %v5020_v47  ;;  %v2312_v47 = vld [vmem:[#allocation2 + $0x169] sm:$0xff] }
 0x386   : > { %3594 = vmatmul.f32.gmra.mxu3 %v3301_v29  ;;  %3704 = vmatmul.f32.gmra.mxu2 %v3396_v45  ;;  %v3398_v27 = vsel %vm1488_vm2, %v3366_v53, %v5025_v10  ;;  %v5049_v42 = vunpack.i.l.bf16 %v7471_v63  ;;  %v2311_v29 = vld [vmem:[#allocation2 + $0x159] sm:$0xff]  ;;  %v3240_v46 = vsel %vm255_vm0, %v2184_v48, %v4999_v54  ;;  %v2186_v54 = vld [vmem:[#allocation2 + $0x168] sm:$0xff] }
 0x387   : > { %v3849_v13 = vadd.f32 %v3768_v26, %v7737_v38  ;;  %v3335_v55 = vsel %vm255_vm0, %v2311_v29, %v5015_v50  ;;  %v7741_v50 = vld [vmem:[#allocation17_spill] sm:$0xff] }
 0x388   : > { %v3547_v18 = vpop.f32.mrf.mxu3  ;;  %v3272_v5 = vsel %vm1455_vm3, %v3240_v46, %v5049_v42 }
 0x389   : > { %3881 = vst.msk [vmem:[%s7302_s30 + $0x38] sm:$0xff] %vm255_vm0, %v3849_v13  ;;  %v7455_v56 = vpop.permute.xlu0 %5027  ;;  %v5038_v9 = vpop.permute.xlu1 %5037  ;;  %v3548_v43 = vadd.f32 %v7268_v20, %v3547_v18 }
 0x38a   : > { %v3657_v40 = vpop.f32.mrf.mxu2  ;;  %v5039_v32 = vunpack.i.l.bf16 %v5038_v9  ;;  %v7488_v18 = vpop.f32.mrf.mxu0  ;;  %v5040_v8 = vunpack.i.h.bf16 %v5038_v9 }
 0x38b   : > { %v3658_v24 = vadd.f32 %v3657_v40, %v3545_v49  ;;  %v5058_v33 = vpop.permute.xlu2 %5057 }
 0x38c   : > { %v5059_v28 = vunpack.i.l.bf16 %v5058_v33 }
 0x38d   : > { %v3771_v51 = vadd.f32 %v7358_v14, %v3658_v24  ;;  %v5000_v24 = vunpack.i.h.bf16 %v7411_v19 }
 0x38e   : > { %3597 = vmatmul.f32.gmra.mxu3 %v3302_v4  ;;  %3707 = vmatmul.f32.gmra.mxu2 %v3397_v16 }
 0x38f   : > { %v3850_v36 = vadd.f32 %v3771_v51, %v7738_v61  ;;  %v7740_v51 = vld [vmem:[#allocation16_spill] sm:$0xff] }
 0x390   : > { %v3550_v3 = vpop.f32.mrf.mxu3 }
 0x391   : > { %3882 = vst.msk [vmem:[%s7302_s30 + $0x40] sm:$0xff] %vm255_vm0, %v3850_v36  ;;  %v5033_v14 = vpop.permute.xlu0 %5032  ;;  %v3551_v45 = vadd.f32 %v7268_v20, %v3550_v3  ;;  %v5043_v21 = vpop.permute.xlu1 %5042  ;;  %v2185_v36 = vld [vmem:[#allocation2 + $0x158] sm:$0xff] }
 0x392   : > { %v5034_v59 = vunpack.i.l.bf16 %v5033_v14  ;;  %v3660_v6 = vpop.f32.mrf.mxu2  ;;  %v5035_v1 = vunpack.i.h.bf16 %v5033_v14  ;;  %v5044_v25 = vunpack.i.l.bf16 %v5043_v21  ;;  %v2442_v3 = vld [vmem:[#allocation2 + $0x19a] sm:$0xff]  ;;  %v7506_v53 = vpop.f32.mrf.mxu0  ;;  %v5045_v63 = vunpack.i.h.bf16 %v5043_v21 }
 0x393   : > { %v3661_v23 = vadd.f32 %v3660_v6, %v3548_v43  ;;  %v3241_v43 = vsel %vm255_vm0, %v2185_v36, %v5000_v24  ;;  %4053 = vmatmul.msk.f32.gmra.mxu0 %vm255_vm0, %v2442_v3 }
 0x394   : > { %v3271_v41 = vsel %vm1455_vm3, %v3239_v35, %v5034_v59  ;;  %v3367_v15 = vsel %vm1455_vm3, %v3335_v55, %v5035_v1  ;;  %v3273_v59 = vsel %vm1455_vm3, %v3241_v43, %v5059_v28  ;;  %v2313_v1 = vld [vmem:[#allocation2 + $0x171] sm:$0xff] }
 0x395   : > { %v3774_v0 = vadd.f32 %v7381_v57, %v3661_v23  ;;  %v3303_v58 = vsel %vm1488_vm2, %v3271_v41, %v5039_v32  ;;  %v3399_v12 = vsel %vm1488_vm2, %v3367_v15, %v5040_v8  ;;  %v5029_v32 = vunpack.i.l.bf16 %v7455_v56 }
 0x396   : > { %3600 = vmatmul.f32.gmra.mxu3 %v3303_v58  ;;  %3710 = vmatmul.f32.gmra.mxu2 %v3398_v27  ;;  %v5073_v58 = vpop.permute.xlu2 %5072 }
 0x397   : > { %v3851_v52 = vadd.f32 %v3774_v0, %v7739_v34 }
 0x398   : > { %v3553_v26 = vpop.f32.mrf.mxu3 }
 0x399   : > { %3883 = vst.msk [vmem:[%s7302_s30 + $0x48] sm:$0xff] %vm255_vm0, %v3851_v52  ;;  %v5053_v57 = vpop.permute.xlu0 %5052  ;;  %v3554_v37 = vadd.f32 %v7268_v20, %v3553_v26  ;;  %v5068_v14 = vpop.permute.xlu1 %5067  ;;  %v3242_v52 = vsel %vm255_vm0, %v2186_v54, %v5029_v32  ;;  %v5060_v26 = vunpack.i.h.bf16 %v5058_v33  ;;  %v7742_v33 = vld [vmem:[#allocation20_spill] sm:$0xff] }
 0x39a   : > { %v5054_v38 = vunpack.i.l.bf16 %v5053_v57  ;;  %v3663_v13 = vpop.f32.mrf.mxu2  ;;  %v5055_v9 = vunpack.i.h.bf16 %v5053_v57  ;;  %v5069_v41 = vunpack.i.l.bf16 %v5068_v14  ;;  %v5074_v57 = vunpack.i.l.bf16 %v5073_v58  ;;  %v3794_v8 = vpop.f32.mrf.mxu0 }
 0x39b   : > { %v3664_v49 = vadd.f32 %v3663_v13, %v3551_v45 }
 0x39c   : > { %v3304_v40 = vsel %vm1488_vm2, %v3272_v5, %v5054_v38  ;;  %v3274_v21 = vsel %vm1455_vm3, %v3242_v52, %v5069_v41  ;;  %v5030_v38 = vunpack.i.h.bf16 %v7455_v56  ;;  %v7746_v52 = vld [vmem:[#allocation22_spill] sm:$0xff] }
 0x39d   : > { %v3777_v30 = vadd.f32 %v7408_v7, %v3664_v49  ;;  %v3336_v7 = vsel %vm255_vm0, %v2312_v47, %v5044_v25  ;;  %v3306_v46 = vsel %vm1488_vm2, %v3274_v21, %v5074_v57  ;;  %v5070_v25 = vunpack.i.h.bf16 %v5068_v14 }
 0x39e   : > { %3603 = vmatmul.f32.gmra.mxu3 %v3304_v40  ;;  %3713 = vmatmul.f32.gmra.mxu2 %v3399_v12  ;;  %v3368_v11 = vsel %vm1455_vm3, %v3336_v7, %v5050_v39  ;;  %v3243_v56 = vsel %vm255_vm0, %v7175_v2, %v5030_v38  ;;  %v2795_v12 = vpop.permute.xlu2 %2794 }
 0x39f   : > { %v3852_v4 = vadd.f32 %v3777_v30, %v7740_v51  ;;  %v3400_v35 = vsel %vm1488_vm2, %v3368_v11, %v5055_v9 }
 0x3a0   : > { %v3556_v16 = vpop.f32.mrf.mxu3 }
 0x3a1   : > { %3884 = vst.msk [vmem:[%s7302_s30 + $0x50] sm:$0xff] %vm255_vm0, %v3852_v4  ;;  %v5063_v61 = vpop.permute.xlu0 %5062  ;;  %v3557_v42 = vadd.f32 %v7268_v20, %v3556_v16  ;;  %v2667_v49 = vpop.permute.xlu1 %2666  ;;  %v5075_v4 = vunpack.i.h.bf16 %v5073_v58 }
 0x3a2   : > { %v5064_v19 = vunpack.i.l.bf16 %v5063_v61  ;;  %v3666_v10 = vpop.f32.mrf.mxu2  ;;  %v5065_v34 = vunpack.i.h.bf16 %v5063_v61  ;;  %v3275_v24 = vsel %vm1455_vm3, %v3243_v56, %v2667_v49  ;;  %v7743_v61 = vld [vmem:[#allocation21_spill] sm:$0xff]  ;;  %v3797_v39 = vpop.f32.mrf.mxu0  ;;  %v7748_v49 = vld [vmem:[#allocation26_spill] sm:$0xff] }
 0x3a3   : > { %v3667_v17 = vadd.f32 %v3666_v10, %v3554_v37  ;;  %v3307_v37 = vsel %vm1488_vm2, %v3275_v24, %v2795_v12  ;;  %v7749_v12 = vld [vmem:[#allocation27_spill] sm:$0xff] }
 0x3a4   : > { %v3305_v6 = vsel %vm1488_vm2, %v3273_v59, %v5064_v19 }
 0x3a5   : > { %v3780_v23 = vadd.f32 %v7429_v22, %v3667_v17  ;;  %v3337_v22 = vsel %vm255_vm0, %v2313_v1, %v5045_v63  ;;  %v2443_v17 = vld [vmem:[#allocation2 + $0x1a2] sm:$0xff] }
 0x3a6   : > { %3606 = vmatmul.f32.gmra.mxu3 %v3305_v6  ;;  %3716 = vmatmul.f32.gmra.mxu2 %v3400_v35  ;;  %v3369_v55 = vsel %vm1455_vm3, %v3337_v22, %v5060_v26  ;;  %v3179_v10 = vpop.permute.xlu2 %3178  ;;  %v7744_v6 = vld [vmem:[#allocation18_spill] sm:$0xff] }
 0x3a7   : > { %v3853_v0 = vadd.f32 %v3780_v23, %v7741_v50  ;;  %v3401_v15 = vsel %vm1488_vm2, %v3369_v55, %v5065_v34 }
 0x3a8   : > { %v3559_v27 = vpop.f32.mrf.mxu3 }
 0x3a9   : > { %3885 = vst.msk [vmem:[%s7302_s30 + $0x58] sm:$0xff] %vm255_vm0, %v3853_v0  ;;  %v2921_v29 = vpop.permute.xlu0 %2920  ;;  %v3051_v7 = vpop.permute.xlu1 %3050  ;;  %v7745_v0 = vld [vmem:[#allocation19_spill] sm:$0xff] }
 0x3aa   : > { %v3669_v45 = vpop.f32.mrf.mxu2  ;;  %v3338_v5 = vsel %vm255_vm0, %v7202_v44, %v2921_v29  ;;  %v3800_v35 = vpop.f32.mrf.mxu0 }
 0x3ab   : > { %v3670_v48 = vadd.f32 %v3669_v45, %v3557_v42  ;;  %v3370_v51 = vsel %vm1455_vm3, %v3338_v5, %v5070_v25 }
 0x3ac   : > { %v3402_v2 = vsel %vm1488_vm2, %v3370_v51, %v5075_v4 }
 0x3ad   : > { %v3783_v13 = vadd.f32 %v7448_v60, %v3670_v48  ;;  %v3560_v60 = vadd.f32 %v7268_v20, %v3559_v27  ;;  %v7747_v48 = vld [vmem:[#allocation23_spill] sm:$0xff] }
 0x3ae   : > { %3609 = vmatmul.f32.gmra.mxu3 %v3306_v46  ;;  %3719 = vmatmul.f32.gmra.mxu2 %v3401_v15 }
 0x3af   : > { %v3854_v40 = vadd.f32 %v3783_v13, %v7742_v33 }
 0x3b0   : > { %v3562_v30 = vpop.f32.mrf.mxu3 }
 0x3b1   : > { %3886 = vst.msk [vmem:[%s7302_s30 + $0x60] sm:$0xff] %vm255_vm0, %v3854_v40  ;;  %v2923_v16 = vpop.permute.xlu0 %2922  ;;  %v3563_v19 = vadd.f32 %v7268_v20, %v3562_v30 }
 0x3b2   : > { %v3672_v28 = vpop.f32.mrf.mxu2  ;;  %v3339_v9 = vsel %vm255_vm0, %v7234_v31, %v2923_v16  ;;  %v3803_v42 = vpop.f32.mrf.mxu0 }
 0x3b3   : > { %v3673_v44 = vadd.f32 %v3672_v28, %v3560_v60 }
 0x3b5   : > { %v3786_v47 = vadd.f32 %v7465_v62, %v3673_v44  ;;  %v3371_v62 = vsel %vm1455_vm3, %v3339_v9, %v3051_v7 }
 0x3b6   : > { %3612 = vmatmul.f32.gmra.mxu3 %v3307_v37  ;;  %3722 = vmatmul.f32.gmra.mxu2 %v3402_v2  ;;  %v3403_v31 = vsel %vm1488_vm2, %v3371_v62, %v3179_v10  ;;  %v7750_v37 = vld [vmem:[#allocation24_spill] sm:$0xff] }
 0x3b7   : > { %v3855_v36 = vadd.f32 %v3786_v47, %v7743_v61 }
 0x3b8   : > { %v3565_v3 = vpop.f32.mrf.mxu3 }
 0x3b9   : > { %3887 = vst.msk [vmem:[%s7302_s30 + $0x68] sm:$0xff] %vm255_vm0, %v3855_v36  ;;  %v3566_v63 = vadd.f32 %v7268_v20, %v3565_v3 }
 0x3ba   : > { %v3675_v43 = vpop.f32.mrf.mxu2  ;;  %v3806_v57 = vpop.f32.mrf.mxu0 }
 0x3bb   : > { %v3676_v14 = vadd.f32 %v3675_v43, %v3563_v19  ;;  %v7751_v19 = vld [vmem:[#allocation25_spill] sm:$0xff] }
 0x3bd   : > { %v3789_v59 = vadd.f32 %v7488_v18, %v3676_v14 }
 0x3be   : > { %3725 = vmatmul.f32.gmra.mxu2 %v3403_v31  ;;  %4054 = vmatmul.msk.f32.vlgmr.msra.gmra.mxu3 %vm255_vm0, %v2443_v17 }
 0x3bf   : > { %v3856_v11 = vadd.f32 %v3789_v59, %v7744_v6  ;;  %v7752_v6 = vld [vmem:[#allocation28_spill] sm:$0xff] }
 0x3c0   : > { %v3568_v32 = vpop.f32.mrf.mxu3 }
 0x3c1   : > { %3888 = vst.msk [vmem:[%s7302_s30 + $0x70] sm:$0xff] %vm255_vm0, %v3856_v11  ;;  %v3569_v27 = vadd.f32 %v7268_v20, %v3568_v32 }
 0x3c2   : > { %v3678_v23 = vpop.f32.mrf.mxu2  ;;  %v3809_v40 = vpop.f32.mrf.mxu0 }
 0x3c3   : > { %v3679_v41 = vadd.f32 %v3678_v23, %v3566_v63 }
 0x3c5   : > { %v3792_v50 = vadd.f32 %v7506_v53, %v3679_v41 }
 0x3c7   : > { %v3857_v18 = vadd.f32 %v3792_v50, %v7745_v0  ;;  %v7753_v50 = vld [vmem:[#allocation29_spill] sm:$0xff] }
 0x3c8   : > { %v3571_v58 = vpop.f32.mrf.mxu3 }
 0x3c9   : > { %3889 = vst.msk [vmem:[%s7302_s30 + $0x78] sm:$0xff] %vm255_vm0, %v3857_v18  ;;  %v3572_v29 = vadd.f32 %v7268_v20, %v3571_v58 }
 0x3ca   : > { %v3681_v54 = vpop.f32.mrf.mxu2  ;;  %v3812_v44 = vpop.f32.mrf.mxu0 }
 0x3cb   : > { %v3682_v1 = vadd.f32 %v3681_v54, %v3569_v27 }
 0x3cd   : > { %v3795_v34 = vadd.f32 %v3794_v8, %v3682_v1 }
 0x3cf   : > { %v3858_v22 = vadd.f32 %v3795_v34, %v7746_v52  ;;  %v7754_v34 = vld [vmem:[#allocation32_spill] sm:$0xff] }
 0x3d0   : > { %v3574_v26 = vpop.f32.mrf.mxu3 }
 0x3d1   : > { %3890 = vst.msk [vmem:[%s7302_s30 + $0x80] sm:$0xff] %vm255_vm0, %v3858_v22  ;;  %v3575_v13 = vadd.f32 %v7268_v20, %v3574_v26 }
 0x3d2   : > { %v3684_v53 = vpop.f32.mrf.mxu2  ;;  %v3815_v3 = vpop.f32.mrf.mxu0 }
 0x3d3   : > { %v3685_v45 = vadd.f32 %v3684_v53, %v3572_v29 }
 0x3d5   : > { %v3798_v21 = vadd.f32 %v3797_v39, %v3685_v45 }
 0x3d7   : > { %v3859_v55 = vadd.f32 %v3798_v21, %v7747_v48 }
 0x3d8   : > { %v3577_v38 = vpop.f32.mrf.mxu3 }
 0x3d9   : > { %3891 = vst.msk [vmem:[%s7302_s30 + $0x88] sm:$0xff] %vm255_vm0, %v3859_v55  ;;  %v3578_v25 = vadd.f32 %v7268_v20, %v3577_v38  ;;  %v5085_v55 = vld [vmem:[%s7653_s4] ss:$0 sm:$0xff] }
 0x3da   : > { %v3687_v46 = vpop.f32.mrf.mxu2  ;;  %v3818_v31 = vpop.f32.mrf.mxu0 }
 0x3db   : > { %v3688_v15 = vadd.f32 %v3687_v46, %v3575_v13 }
 0x3dd   : > { %v3801_v8 = vadd.f32 %v3800_v35, %v3688_v15 }
 0x3df   : > { %v3860_v5 = vadd.f32 %v3801_v8, %v7748_v49  ;;  %v7756_v49 = vld [vmem:[#allocation30_spill] sm:$0xff] }
 0x3e0   : > { %v3580_v33 = vpop.f32.mrf.mxu3 }
 0x3e1   : > { %3892 = vst.msk [vmem:[%s7302_s30 + $0x90] sm:$0xff] %vm255_vm0, %v3860_v5  ;;  %v3581_v28 = vadd.f32 %v7268_v20, %v3580_v33 }
 0x3e2   : > { %v3690_v30 = vpop.f32.mrf.mxu2  ;;  %v3821_v18 = vpop.f32.mrf.mxu0 }
 0x3e3   : > { %v3691_v56 = vadd.f32 %v3690_v30, %v3578_v25 }
 0x3e5   : > { %v3804_v60 = vadd.f32 %v3803_v42, %v3691_v56 }
 0x3e7   : > { %v3861_v24 = vadd.f32 %v3804_v60, %v7749_v12  ;;  %v7757_v12 = vld [vmem:[#allocation31_spill] sm:$0xff] }
 0x3e9   : > { %3893 = vst.msk [vmem:[%s7302_s30 + $0x98] sm:$0xff] %vm255_vm0, %v3861_v24  ;;  %v3583_v51 = vpop.f32.mrf.mxu3 }
 0x3ea   : > { %v3693_v4 = vpop.f32.mrf.mxu2  ;;  %v3584_v9 = vadd.f32 %v7268_v20, %v3583_v51  ;;  %v3824_v53 = vpop.f32.mrf.mxu0 }
 0x3eb   : > { %v3694_v16 = vadd.f32 %v3693_v4, %v3581_v28 }
 0x3ed   : > { %v3807_v47 = vadd.f32 %v3806_v57, %v3694_v16  ;;  %v7755_v57 = vld [vmem:[#allocation33_spill] sm:$0xff] }
 0x3ef   : > { %v3862_v2 = vadd.f32 %v3807_v47, %v7750_v37  ;;  %v7758_v47 = vld [vmem:[#allocation34_spill] sm:$0xff] }
 0x3f1   : > { %3894 = vst.msk [vmem:[%s7302_s30 + $0xa0] sm:$0xff] %vm255_vm0, %v3862_v2  ;;  %v3586_v61 = vpop.f32.mrf.mxu3 }
 0x3f2   : > { %v3696_v36 = vpop.f32.mrf.mxu2  ;;  %v3587_v10 = vadd.f32 %v7268_v20, %v3586_v61  ;;  %v3827_v15 = vpop.f32.mrf.mxu0 }
 0x3f3   : > { %v3697_v7 = vadd.f32 %v3696_v36, %v3584_v9 }
 0x3f5   : > { %v3810_v39 = vadd.f32 %v3809_v40, %v3697_v7 }
 0x3f7   : > { %v3863_v62 = vadd.f32 %v3810_v39, %v7751_v19  ;;  %v7759_v39 = vld [vmem:[#allocation35_spill] sm:$0xff] }
 0x3f9   : > { %3895 = vst.msk [vmem:[%s7302_s30 + $0xa8] sm:$0xff] %vm255_vm0, %v3863_v62  ;;  %v3589_v43 = vpop.f32.mrf.mxu3 }
 0x3fa   : > { %v3699_v14 = vpop.f32.mrf.mxu2  ;;  %v3590_v32 = vadd.f32 %v7268_v20, %v3589_v43  ;;  %v3830_v60 = vpop.f32.mrf.mxu0 }
 0x3fb   : > { %v3700_v17 = vadd.f32 %v3699_v14, %v3587_v10 }
 0x3fd   : > { %v3813_v59 = vadd.f32 %v3812_v44, %v3700_v17 }
 0x3ff   : > { %v3864_v11 = vadd.f32 %v3813_v59, %v7752_v6 }
 0x401   : > { %3896 = vst.msk [vmem:[%s7302_s30 + $0xb0] sm:$0xff] %vm255_vm0, %v3864_v11  ;;  %v3592_v63 = vpop.f32.mrf.mxu3 }
 0x402   : > { %v3702_v23 = vpop.f32.mrf.mxu2  ;;  %v3593_v58 = vadd.f32 %v7268_v20, %v3592_v63  ;;  %v3833_v2 = vpop.f32.mrf.mxu0 }
 0x403   : > { %v3703_v35 = vadd.f32 %v3702_v23, %v3590_v32 }
 0x405   : > { %v3816_v41 = vadd.f32 %v3815_v3, %v3703_v35 }
 0x407   : > { %v3865_v0 = vadd.f32 %v3816_v41, %v7753_v50  ;;  %v7761_v41 = vld [vmem:[#allocation37_spill] sm:$0xff] }
 0x409   : > { %3897 = vst.msk [vmem:[%s7302_s30 + $0xb8] sm:$0xff] %vm255_vm0, %v3865_v0  ;;  %v3595_v27 = vpop.f32.mrf.mxu3 }
 0x40a   : > { %v3705_v54 = vpop.f32.mrf.mxu2  ;;  %v3596_v22 = vadd.f32 %v7268_v20, %v3595_v27 }
 0x40b   : > { %v3706_v1 = vadd.f32 %v3705_v54, %v3593_v58 }
 0x40d   : > { %v3819_v42 = vadd.f32 %v3818_v31, %v3706_v1  ;;  %v7760_v31 = vld [vmem:[#allocation36_spill] sm:$0xff] }
 0x40f   : > { %v3866_v52 = vadd.f32 %v3819_v42, %v7754_v34 }
 0x410   : > { %v3836_v10 = vpop.f32.mrf.mxu0 }
 0x411   : > { %3898 = vst.msk [vmem:[%s7302_s30 + $0xc0] sm:$0xff] %vm255_vm0, %v3866_v52  ;;  %v3598_v26 = vpop.f32.mrf.mxu3 }
 0x412   : > { %v3708_v29 = vpop.f32.mrf.mxu2  ;;  %v3599_v38 = vadd.f32 %v5085_v55, %v3598_v26 }
 0x413   : > { %v3709_v45 = vadd.f32 %v3708_v29, %v3596_v22 }
 0x415   : > { %v3822_v21 = vadd.f32 %v3821_v18, %v3709_v45 }
 0x417   : > { %v3867_v48 = vadd.f32 %v3822_v21, %v7755_v57 }
 0x419   : > { %3899 = vst.msk [vmem:[%s7302_s30 + $0xc8] sm:$0xff] %vm255_vm0, %v3867_v48  ;;  %v3601_v13 = vpop.f32.mrf.mxu3 }
 0x41a   : > { %v3711_v20 = vpop.f32.mrf.mxu2  ;;  %v3602_v33 = vadd.f32 %v5085_v55, %v3601_v13 }
 0x41b   : > { %v3712_v46 = vadd.f32 %v3711_v20, %v3599_v38 }
 0x41d   : > { %v3825_v8 = vadd.f32 %v3824_v53, %v3712_v46 }
 0x41f   : > { %v3868_v5 = vadd.f32 %v3825_v8, %v7756_v49 }
 0x421   : > { %3900 = vst.msk [vmem:[%s7302_s30 + $0xd0] sm:$0xff] %vm255_vm0, %v3868_v5  ;;  %v3604_v40 = vpop.f32.mrf.mxu3 }
 0x422   : > { %v3714_v25 = vpop.f32.mrf.mxu2  ;;  %v3605_v28 = vadd.f32 %v5085_v55, %v3604_v40 }
 0x423   : > { %v3715_v30 = vadd.f32 %v3714_v25, %v3602_v33 }
 0x425   : > { %v3828_v56 = vadd.f32 %v3827_v15, %v3715_v30 }
 0x427   : > { %v3869_v24 = vadd.f32 %v3828_v56, %v7757_v12 }
 0x429   : > { %3901 = vst.msk [vmem:[%s7302_s30 + $0xd8] sm:$0xff] %vm255_vm0, %v3869_v24  ;;  %v3607_v51 = vpop.f32.mrf.mxu3 }
 0x42a   : > { %v3717_v4 = vpop.f32.mrf.mxu2  ;;  %v3608_v9 = vadd.f32 %v5085_v55, %v3607_v51 }
 0x42b   : > { %v3718_v44 = vadd.f32 %v3717_v4, %v3605_v28 }
 0x42d   : > { %v3831_v16 = vadd.f32 %v3830_v60, %v3718_v44 }
 0x42f   : > { %v3870_v37 = vadd.f32 %v3831_v16, %v7758_v47 }
 0x431   : > { %3902 = vst.msk [vmem:[%s7302_s30 + $0xe0] sm:$0xff] %vm255_vm0, %v3870_v37  ;;  %v3610_v61 = vpop.f32.mrf.mxu3 }
 0x432   : > { %v3720_v36 = vpop.f32.mrf.mxu2  ;;  %v3611_v62 = vadd.f32 %v5085_v55, %v3610_v61 }
 0x433   : > { %v3721_v7 = vadd.f32 %v3720_v36, %v3608_v9 }
 0x435   : > { %v3834_v3 = vadd.f32 %v3833_v2, %v3721_v7 }
 0x437   : > { %v3871_v19 = vadd.f32 %v3834_v3, %v7759_v39 }
 0x439   : > { %3903 = vst.msk [vmem:[%s7302_s30 + $0xe8] sm:$0xff] %vm255_vm0, %v3871_v19  ;;  %v3613_v43 = vpop.f32.mrf.mxu3 }
 0x43a   : > { %v3723_v14 = vpop.f32.mrf.mxu2  ;;  %v3614_v11 = vadd.f32 %v5085_v55, %v3613_v43 }
 0x43b   : > { %v3724_v17 = vadd.f32 %v3723_v14, %v3611_v62 }
 0x43d   : > { %v3837_v59 = vadd.f32 %v3836_v10, %v3724_v17 }
 0x43f   : > { %v3872_v6 = vadd.f32 %v3837_v59, %v7760_v31 }
 0x441   : > { %3904 = vst.msk [vmem:[%s7302_s30 + $0xf0] sm:$0xff] %vm255_vm0, %v3872_v6  ;;  %v3839_v63 = vpop.f32.mrf.mxu3 }
 0x442   : > { %v3726_v32 = vpop.f32.mrf.mxu2 }
 0x443   : > { %v3727_v23 = vadd.f32 %v3726_v32, %v3614_v11 }
 0x445   : > { %v3840_v35 = vadd.f32 %v3839_v63, %v3727_v23 }
 0x447   : > { %v3873_v50 = vadd.f32 %v3840_v35, %v7761_v41 }
 0x449   : > { %3905 = vst.msk [vmem:[%s7302_s30 + $0xf8] sm:$0xff] %vm255_vm0, %v3873_v50 }
 0x44a   : > { %5113 = shalt.err (!%p5110_p3)
}
 0x44b   : > { %s5154_s26 = smov 128   ;;  %s5155_s30 = smov 8  }
 0x44c   : > { %4086 = dma.vmem_to_hbm [thread:$0]  (%p5224_p5), %s3920_s13, 4096, %s3922_s14, %s3907_s22, %s5154_s26, %s5154_s26, %s5155_s30  }
 0x44d PF: > { %p4092_p4 = scmp.ge.s32.totalorder %s5148_s21, 2  ;;  %s3936_s12 = sand.u32 1, %s5136_s18  }
 0x44e   : > { %s3937_s6 = scalar_lea.sflag [#allocation4], %s3936_s12 }
 0x44f   : > { %p4089_p7 = pnand %p4092_p4, %p5228_p6 }
 0x451   : > { %p4090_p8 = pneg %p4089_p7 }
 0x453   : > { %5131 = dma.done.wait (%p4090_p8), %s3937_s6, 4096  }
 0x454   : > { %5133 = vsyncadd (%p4090_p8), %s3937_s6, 4294963200  ;;  %p15_p9 = scmp.ge.s32.totalorder %s5211_s24, 4   ;;  %s7762_s18 = smov %s5140_s19 }
 0x455   : > { %s7763_s19 = smov %s5144_s20  ;;  %s7764_s20 = smov %s5222_s27 }
 0x456   : > { %s7765_s21 = smov %s5211_s24  ;;  %17 = sbr.rel (!%p15_p9) target bundleno = 3 (0x3), region = 78 }
 0x45b   :  { %3943 = vsyncpa [#allocation4], 1 }
 0x45c   :  { %3945 = vsyncpa [#allocation4 + $0x1], 1 }

</bundles_post_ra>
